<compile_context>
chip_gen: v5e
topology: v5e:2x2
jax: 0.10.0
libtpu: 0.0.40
codegen_flags: <defaults>
</compile_context>

<pallas_src>
import numpy as np
import jax
import jax.numpy as jnp
from jax import lax
from jax.experimental import pallas as pl
from jax.experimental.pallas import tpu as pltpu


# ----------------------------------------------------------------------------
# Fused 3x3 conv + BatchNorm(train) + LeakyReLU body (shared by two kernels)
# ----------------------------------------------------------------------------
def _conv3x3_bn_lrelu_body(x, yx, w3, b3, h_img, w_img, m_total,
                           eps=1e-5, slope=0.2):
    """x: (Cin, M) bf16, yx: (2, M) int32 (row0=y, row1=x within image),
    w3: (Cout, 9*Cin) bf16, b3: (Cout, 1) f32.
    Returns LeakyReLU(BN(conv3x3(x) + b3)) as (Cout, M) f32.

    Taps on the contraction axis: roll the input along lanes once per tap
    (XLU), zero-mask image borders (also kills cross-image wrap of the roll),
    stack to (9*Cin, M) and do a single MXU matmul with K = 9*Cin."""
    yi = yx[0:1, :]
    xi = yx[1:2, :]
    xf = x.astype(jnp.float32)
    reps = []
    for dy in (-1, 0, 1):
        for dx in (-1, 0, 1):
            shift = (-(dy * w_img + dx)) % m_total
            xr = pltpu.roll(xf, shift, axis=1) if shift else xf
            valid = ((yi >= -dy) & (yi < h_img - dy) &
                     (xi >= -dx) & (xi < w_img - dx))            # (1, M)
            reps.append(jnp.where(valid, xr, 0.0))
    xs = jnp.concatenate(reps, axis=0).astype(jnp.bfloat16)      # (9*Cin, M)
    acc = jnp.dot(w3, xs, preferred_element_type=jnp.float32)    # (Cout, M)
    acc = acc + b3
    # One-pass training-mode BatchNorm (gamma=1, beta=0) over the N*H*W axis.
    inv_m = 1.0 / float(m_total)
    mean = jnp.sum(acc, axis=1, keepdims=True) * inv_m
    ex2 = jnp.sum(acc * acc, axis=1, keepdims=True) * inv_m
    var = jnp.maximum(ex2 - mean * mean, 0.0)
    acc = (acc - mean) * lax.rsqrt(var + eps)
    return jnp.where(acc >= 0.0, acc, slope * acc)


def _make_conv_kernel(h_img, w_img, m_total):
    def kernel(x_ref, yx_ref, w_ref, b_ref, o_ref):
        act = _conv3x3_bn_lrelu_body(x_ref[...], yx_ref[...], w_ref[...],
                                     b_ref[...], h_img, w_img, m_total)
        o_ref[...] = act.astype(o_ref.dtype)
    return kernel


def _make_dec_final_kernel(h_img, w_img, m_total):
    """dec1 conv + BN + LeakyReLU fused with the final 1x1 conv and the
    recursive residual state update (state + W1 @ d1 + b1)."""
    def kernel(x_ref, yx_ref, w3_ref, b3_ref, w1_ref, b1_ref, s_ref, o_ref):
        act = _conv3x3_bn_lrelu_body(x_ref[...], yx_ref[...], w3_ref[...],
                                     b3_ref[...], h_img, w_img, m_total)
        y = jnp.dot(w1_ref[...], act.astype(jnp.bfloat16),
                    preferred_element_type=jnp.float32)          # (n_state, M)
        o_ref[...] = (s_ref[...] + y + b1_ref[...]).astype(o_ref.dtype)
    return kernel


def _sigmoid_kernel(x_ref, o_ref):
    # Implicit-background softmax with 1 class per branch == stable sigmoid,
    # applied independently to each row (target logit, source logit).
    x = x_ref[...]                                               # (2, M) f32
    m = jnp.maximum(x, 0.0)
    e = jnp.exp(x - m)
    o_ref[...] = e / (e + jnp.exp(-m))


# ----------------------------------------------------------------------------
# Pallas wrappers
# ----------------------------------------------------------------------------
def conv3x3_bn_lrelu(x_cm, p, yx):
    """x_cm: (Cin, N, H, W) bf16 -> (Cout, N, H, W) bf16."""
    c_in, n, h, w = x_cm.shape
    m_total = n * h * w
    cout = p['w'].shape[0]
    xf = x_cm.reshape(c_in, m_total)
    out = pl.pallas_call(
        _make_conv_kernel(h, w, m_total),
        out_shape=jax.ShapeDtypeStruct((cout, m_total), jnp.bfloat16),
        grid=(1,),
        in_specs=[
            pl.BlockSpec((c_in, m_total), lambda i: (0, 0)),
            pl.BlockSpec((2, m_total), lambda i: (0, 0)),
            pl.BlockSpec((cout, 9 * c_in), lambda i: (0, 0)),
            pl.BlockSpec((cout, 1), lambda i: (0, 0)),
        ],
        out_specs=pl.BlockSpec((cout, m_total), lambda i: (0, 0)),
        compiler_params=pltpu.CompilerParams(
            dimension_semantics=("arbitrary",)),
    )(xf, yx, p['w'], p['b'])
    return out.reshape(cout, n, h, w)


def conv3x3_final_residual(x_cm, p3, p1, state_cm, yx):
    """dec1 conv + final 1x1 conv + residual: x_cm (Cin, N, H, W) bf16,
    state_cm (n_state, N, H, W) f32 -> new state (n_state, N, H, W) f32."""
    c_in, n, h, w = x_cm.shape
    m_total = n * h * w
    cout3 = p3['w'].shape[0]
    n_state = p1['w'].shape[0]
    xf = x_cm.reshape(c_in, m_total)
    sf = state_cm.reshape(n_state, m_total)
    out = pl.pallas_call(
        _make_dec_final_kernel(h, w, m_total),
        out_shape=jax.ShapeDtypeStruct((n_state, m_total), jnp.float32),
        grid=(1,),
        in_specs=[
            pl.BlockSpec((c_in, m_total), lambda i: (0, 0)),
            pl.BlockSpec((2, m_total), lambda i: (0, 0)),
            pl.BlockSpec((cout3, 9 * c_in), lambda i: (0, 0)),
            pl.BlockSpec((cout3, 1), lambda i: (0, 0)),
            pl.BlockSpec((n_state, cout3), lambda i: (0, 0)),
            pl.BlockSpec((n_state, 1), lambda i: (0, 0)),
            pl.BlockSpec((n_state, m_total), lambda i: (0, 0)),
        ],
        out_specs=pl.BlockSpec((n_state, m_total), lambda i: (0, 0)),
        compiler_params=pltpu.CompilerParams(
            dimension_semantics=("arbitrary",)),
    )(xf, yx, p3['w'], p3['b'], p1['w'], p1['b'], sf)
    return out.reshape(n_state, n, h, w)


def sigmoid_cm(logits_cm):
    """logits: (K, N, H, W) f32 -> probabilities (K, N, H, W) f32 (both
    implicit-softmax branches in one lane-dense block)."""
    k, n, h, w = logits_cm.shape
    m_total = n * h * w
    xf = logits_cm.reshape(k, m_total)
    out = pl.pallas_call(
        _sigmoid_kernel,
        out_shape=jax.ShapeDtypeStruct((k, m_total), jnp.float32),
        grid=(1,),
        in_specs=[pl.BlockSpec((k, m_total), lambda i: (0, 0))],
        out_specs=pl.BlockSpec((k, m_total), lambda i: (0, 0)),
        compiler_params=pltpu.CompilerParams(
            dimension_semantics=("arbitrary",)),
    )(xf)
    return out.reshape(k, n, h, w)


# ----------------------------------------------------------------------------
# Static per-lane (y, x) coordinates (replaces the old (9*Cout, M) premask)
# ----------------------------------------------------------------------------
def make_yx(h, w, n_img):
    yy, xx = np.meshgrid(np.arange(h), np.arange(w), indexing='ij')
    yi = np.tile(yy.reshape(-1), n_img)
    xi = np.tile(xx.reshape(-1), n_img)
    return jnp.asarray(np.stack([yi, xi], axis=0), dtype=jnp.int32)   # (2, M)


# ----------------------------------------------------------------------------
# JAX glue: pooling / upsampling / resize / bilinear pull / exp
# ----------------------------------------------------------------------------
def avg_pool2_cm(x):
    c, n, h, w = x.shape
    return x.reshape(c, n, h // 2, 2, w // 2, 2).mean(axis=(3, 5))


def upsample2_cm(x):
    c, n, h, w = x.shape
    x = jnp.broadcast_to(x[:, :, :, None, :, None], (c, n, h, 2, w, 2))
    return x.reshape(c, n, 2 * h, 2 * w)


def identity_grid(h, w):
    yy, xx = jnp.meshgrid(jnp.arange(h, dtype=jnp.float32),
                          jnp.arange(w, dtype=jnp.float32), indexing='ij')
    return jnp.stack([yy, xx], axis=-1)                        # (H, W, 2)


def grid_pull(img, coords, bound):
    """Bilinear pull. img: (N, C, H, W), coords: (N, Ho, Wo, 2) voxel (y, x).
    4 corners batched into one gather (see header TODO on in-kernel gather)."""
    n, c, h, w = img.shape
    _, ho, wo, _ = coords.shape
    gy, gx = coords[..., 0], coords[..., 1]
    y0f, x0f = jnp.floor(gy), jnp.floor(gx)
    wy, wx = gy - y0f, gx - x0f
    y0, x0 = y0f.astype(jnp.int32), x0f.astype(jnp.int32)
    y1, x1 = y0 + 1, x0 + 1

    def wrap(i, size):
        if bound == 'dft':                                     # circular
            return jnp.mod(i, size)
        mm = jnp.mod(i, 2 * size)                              # dct2 reflect
        return jnp.where(mm < size, mm, 2 * size - 1 - mm)

    iy0, iy1 = wrap(y0, h), wrap(y1, h)
    ix0, ix1 = wrap(x0, w), wrap(x1, w)
    pq = ho * wo
    idx = jnp.stack([iy0 * w + ix0, iy0 * w + ix1,
                     iy1 * w + ix0, iy1 * w + ix1], axis=1)    # (N, 4, Ho, Wo)
    idx = jnp.broadcast_to(idx.reshape(n, 1, 4 * pq), (n, c, 4 * pq))
    vals = jnp.take_along_axis(img.reshape(n, c, h * w), idx, axis=2)
    vals = vals.reshape(n, c, 4, pq)
    wts = jnp.stack([(1.0 - wy) * (1.0 - wx), (1.0 - wy) * wx,
                     wy * (1.0 - wx), wy * wx], axis=1)        # (N, 4, Ho, Wo)
    out = jnp.sum(vals * wts.reshape(n, 1, 4, pq), axis=2)
    return out.reshape(n, c, ho, wo)


def _linear_resize_matrix(n_in, n_out):
    if n_out == 1:                                 # degenerate-size guard
        pos = np.zeros((1,), np.float64)
    else:
        pos = np.arange(n_out) * (n_in - 1) / (n_out - 1)
    i0 = np.clip(np.floor(pos).astype(np.int64), 0, n_in - 1)
    i1 = np.minimum(i0 + 1, n_in - 1)
    t = (pos - i0).astype(np.float32)
    r = np.zeros((n_out, n_in), np.float32)
    r[np.arange(n_out), i0] += 1.0 - t
    r[np.arange(n_out), i1] += t
    return jnp.asarray(r)


def resize_displacement(disp, out_hw):
    """GridResize(type='displacement'): separable linear resample (static
    coordinates -> static matrices) + displacement-value rescale."""
    n, hi, wi, _ = disp.shape
    ho, wo = out_hw
    ry = _linear_resize_matrix(hi, ho)                         # (Ho, Hi)
    rx = _linear_resize_matrix(wi, wo)                         # (Wo, Wi)
    out = jnp.einsum('oh,nhwc->nowc', ry, disp)
    out = jnp.einsum('pw,nowc->nopc', rx, out)
    scale = jnp.array([ho / hi, wo / wi], jnp.float32)
    return out * scale


def velocity_exp(disp, steps=8):
    """Scaling-and-squaring exponentiation of a displacement (dft bound)."""
    n, h, w, _ = disp.shape
    idg = identity_grid(h, w)[None]
    d = disp / (2.0 ** steps)

    def body(_, d):
        d_img = jnp.transpose(d, (0, 3, 1, 2))                 # (N, 2, h, w)
        pulled = grid_pull(d_img, idg + d, bound='dft')
        return d + jnp.transpose(pulled, (0, 2, 3, 1))

    return lax.fori_loop(0, steps, body, d)


# ----------------------------------------------------------------------------
# SegMorphRUNet forward
# ----------------------------------------------------------------------------
def segmorph_runet_forward(params, source, target, nb_iter=5):
    """source/target: (N, 1, H, W) f32 (NCHW).

    Returns (source_seg_pred, target_seg_pred, deformed_source, velocity)
    with shapes (N,1,H,W), (N,1,H,W), (N,1,H,W), (N,H,W,2)."""
    n, _, h, w = source.shape
    dim, oc = 2, 1                            # spatial dims, output classes
    n_state = dim + 2 * oc                    # velocity + target/source logits

    m_full = n * h * w
    m_half = n * (h // 2) * (w // 2)
    # TODO(synk): general shapes need lane padding to a 128 multiple plus a
    #             lane-mask-aware (two-pass) BatchNorm; the toy shapes comply.
    assert m_full % 128 == 0 and m_half % 128 == 0

    yx_full = make_yx(h, w, n)
    yx_half = make_yx(h // 2, w // 2, n)

    img_cm = jnp.transpose(jnp.concatenate([source, target], axis=1),
                           (1, 0, 2, 3))                       # (2, N, H, W)
    img_bf = img_cm.astype(jnp.bfloat16)
    pad_bf = jnp.zeros((2, n, h, w), jnp.bfloat16)             # pad 6->8 chans
    state = jnp.zeros((n_state, n, h, w), jnp.float32)

    def unet_iter(state):
        x = jnp.concatenate([img_bf, state.astype(jnp.bfloat16), pad_bf],
                            axis=0)                                      # 8ch
        e0 = conv3x3_bn_lrelu(x, params['enc0'], yx_full)                # 8ch
        e1 = conv3x3_bn_lrelu(avg_pool2_cm(e0), params['enc1'], yx_half) # 16ch
        d0 = conv3x3_bn_lrelu(e1, params['dec0'], yx_half)               # 16ch
        x1 = jnp.concatenate([upsample2_cm(d0), e0], axis=0)             # 24ch
        # dec1 conv + final 1x1 + residual state update, fused in one kernel
        return conv3x3_final_residual(x1, params['dec1'], params['final'],
                                      state, yx_full)

    for _ in range(nb_iter):
        state = unet_iter(state)

    velocity_cm = state[:dim]
    probs = sigmoid_cm(state[dim:])            # implicit softmax, K=1 per row
    target_seg_pred = probs[0:1]
    source_seg_pred = probs[1:2]
    velocity = jnp.transpose(velocity_cm, (1, 2, 3, 0))        # (N, H, W, 2)

    # BaseMorph.exp: downsample vel x2 -> exponentiate -> upsample -> +identity
    vel_small = resize_displacement(velocity, (h // 2, w // 2))
    disp_small = velocity_exp(vel_small, steps=8)
    disp = resize_displacement(disp_small, (h, w))
    grid = disp + identity_grid(h, w)[None]

    deformed_source = grid_pull(source, grid, bound='dct2')

    to_nchw = lambda t: jnp.transpose(t, (1, 0, 2, 3))
    return (to_nchw(source_seg_pred), to_nchw(target_seg_pred),
            deformed_source, velocity)


# ----------------------------------------------------------------------------
# Deterministic parameter init (synthetic weights, no checkpoint)
# ----------------------------------------------------------------------------
def init_conv3(key, cin, cout, cin_pad=None):
    cin_pad = cin_pad or cin
    kw, kb = jax.random.split(key)
    scale = 1.0 / np.sqrt(9 * cin)
    w = jax.random.normal(kw, (3, 3, cin, cout), jnp.float32) * scale
    b = jax.random.normal(kb, (cout,), jnp.float32) * 0.01
    if cin_pad > cin:                                  # zero-padded channels
        w = jnp.pad(w, ((0, 0), (0, 0), (0, cin_pad - cin), (0, 0)))
    # Pack to (Cout, 9*Cin): columns ordered (dy, dx, cin) row-major, matching
    # the in-kernel tap stacking order.
    wk = jnp.transpose(w, (3, 0, 1, 2)).reshape(cout, 9 * cin_pad)
    return {'w': wk.astype(jnp.bfloat16), 'b': b.reshape(cout, 1)}


def init_conv1(key, cin, cout):
    kw, kb = jax.random.split(key)
    scale = 1.0 / np.sqrt(cin)
    w = jax.random.normal(kw, (cout, cin), jnp.float32) * scale
    b = jax.random.normal(kb, (cout,), jnp.float32) * 0.01
    return {'w': w.astype(jnp.bfloat16), 'b': b.reshape(cout, 1)}


def init_params(key, dim=2, output_classes=1, img_channels=2):
    n_state = dim + 2 * output_classes
    ks = jax.random.split(key, 5)
    return {'enc0': init_conv3(ks[0], img_channels + n_state, 8, cin_pad=8),
            'enc1': init_conv3(ks[1], 8, 16),
            'dec0': init_conv3(ks[2], 16, 16),
            'dec1': init_conv3(ks[3], 24, 8),
            'final': init_conv1(ks[4], 8, n_state)}


if __name__ == "__main__":
    key = jax.random.PRNGKey(0)
    k_src, k_tgt, k_par = jax.random.split(key, 3)
    source = jax.random.normal(k_src, (2, 1, 16, 16), jnp.float32)
    target = jax.random.normal(k_tgt, (2, 1, 16, 16), jnp.float32)
    params = init_params(k_par)

    fwd = jax.jit(segmorph_runet_forward)
    src_pred, tgt_pred, deformed, velocity = fwd(params, source, target)
    jax.block_until_ready((src_pred, tgt_pred, deformed, velocity))

    assert src_pred.shape == (2, 1, 16, 16)
    assert tgt_pred.shape == (2, 1, 16, 16)
    assert deformed.shape == (2, 1, 16, 16)
    assert velocity.shape == (2, 16, 16, 2)
    assert bool(jnp.all(jnp.isfinite(src_pred)))
    assert bool(jnp.all(jnp.isfinite(tgt_pred)))
    assert bool(jnp.all(jnp.isfinite(deformed)))
    assert bool(jnp.all(jnp.isfinite(velocity)))
    assert bool(jnp.all((src_pred >= 0) & (src_pred <= 1)))
    assert bool(jnp.all((tgt_pred >= 0) & (tgt_pred <= 1)))
    print("KERNEL_OK")
</pallas_src>

<mosaic_0001>
module attributes {stable_mosaic.version = 11 : i64} {
  func.func @kernel(%arg0: i32, %arg1: memref<8x512xbf16, #tpu.memory_space<vmem>>, %arg2: memref<2x512xi32, #tpu.memory_space<vmem>>, %arg3: memref<8x72xbf16, #tpu.memory_space<vmem>>, %arg4: memref<8x1xf32, #tpu.memory_space<vmem>>, %arg5: memref<8x512xbf16, #tpu.memory_space<vmem>>) attributes {dimension_semantics = [#tpu.dimension_semantics<arbitrary>], iteration_bounds = array<i64: 1>, scalar_prefetch = 0 : i64, scratch_operands = 0 : i64, tpu.core_type = #tpu.core_type<tc>, window_params = [{pipeline_mode = #tpu.pipeline_mode<synchronous>, transform_indices = @transform_0, window_bounds = array<i64: 8, 512>}, {pipeline_mode = #tpu.pipeline_mode<synchronous>, transform_indices = @transform_1, window_bounds = array<i64: 2, 512>}, {pipeline_mode = #tpu.pipeline_mode<synchronous>, transform_indices = @transform_2, window_bounds = array<i64: 8, 72>}, {pipeline_mode = #tpu.pipeline_mode<synchronous>, transform_indices = @transform_3, window_bounds = array<i64: 8, 1>}, {pipeline_mode = #tpu.pipeline_mode<synchronous>, transform_indices = @transform_4, window_bounds = array<i64: 8, 512>}]} {
    %c0 = arith.constant 0 : index
    %c0_0 = arith.constant 0 : index
    %0 = vector.load %arg1[%c0, %c0_0] : memref<8x512xbf16, #tpu.memory_space<vmem>>, vector<8x512xbf16>
    %c0_1 = arith.constant 0 : index
    %c0_2 = arith.constant 0 : index
    %1 = vector.load %arg2[%c0_1, %c0_2] : memref<2x512xi32, #tpu.memory_space<vmem>>, vector<2x512xi32>
    %c0_3 = arith.constant 0 : index
    %c0_4 = arith.constant 0 : index
    %2 = vector.load %arg3[%c0_3, %c0_4] : memref<8x72xbf16, #tpu.memory_space<vmem>>, vector<8x72xbf16>
    %c0_5 = arith.constant 0 : index
    %c0_6 = arith.constant 0 : index
    %3 = vector.load %arg4[%c0_5, %c0_6] : memref<8x1xf32, #tpu.memory_space<vmem>>, vector<8x1xf32>
    %4 = vector.extract_strided_slice %1 {offsets = [0, 0], sizes = [1, 512], strides = [1, 1]} : vector<2x512xi32> to vector<1x512xi32>
    %5 = vector.extract_strided_slice %1 {offsets = [1, 0], sizes = [1, 512], strides = [1, 1]} : vector<2x512xi32> to vector<1x512xi32>
    %6 = arith.extf %0 : vector<8x512xbf16> to vector<8x512xf32>
    %c17_i32 = arith.constant 17 : i32
    %7 = tpu.dynamic_rotate %6 by %c17_i32 dim 1 : vector<8x512xf32>, i32 -> vector<8x512xf32>
    %c1_i32 = arith.constant 1 : i32
    %8 = vector.broadcast %c1_i32 : i32 to vector<1x512xi32>
    %9 = arith.cmpi sge, %4, %8 : vector<1x512xi32>
    %c17_i32_7 = arith.constant 17 : i32
    %10 = vector.broadcast %c17_i32_7 : i32 to vector<1x512xi32>
    %11 = arith.cmpi slt, %4, %10 : vector<1x512xi32>
    %12 = arith.andi %9, %11 : vector<1x512xi1>
    %c1_i32_8 = arith.constant 1 : i32
    %13 = vector.broadcast %c1_i32_8 : i32 to vector<1x512xi32>
    %14 = arith.cmpi sge, %5, %13 : vector<1x512xi32>
    %15 = arith.andi %12, %14 : vector<1x512xi1>
    %c17_i32_9 = arith.constant 17 : i32
    %16 = vector.broadcast %c17_i32_9 : i32 to vector<1x512xi32>
    %17 = arith.cmpi slt, %5, %16 : vector<1x512xi32>
    %18 = arith.andi %15, %17 : vector<1x512xi1>
    %cst = arith.constant 0.000000e+00 : f32
    %19 = vector.shape_cast %18 : vector<1x512xi1> to vector<1x512xi1>
    %20 = vector.broadcast %19 : vector<1x512xi1> to vector<8x512xi1>
    %21 = vector.broadcast %cst : f32 to vector<8x512xf32>
    %22 = arith.select %20, %7, %21 : vector<8x512xi1>, vector<8x512xf32>
    %c16_i32 = arith.constant 16 : i32
    %23 = tpu.dynamic_rotate %6 by %c16_i32 dim 1 : vector<8x512xf32>, i32 -> vector<8x512xf32>
    %c1_i32_10 = arith.constant 1 : i32
    %24 = vector.broadcast %c1_i32_10 : i32 to vector<1x512xi32>
    %25 = arith.cmpi sge, %4, %24 : vector<1x512xi32>
    %c17_i32_11 = arith.constant 17 : i32
    %26 = vector.broadcast %c17_i32_11 : i32 to vector<1x512xi32>
    %27 = arith.cmpi slt, %4, %26 : vector<1x512xi32>
    %28 = arith.andi %25, %27 : vector<1x512xi1>
    %c0_i32 = arith.constant 0 : i32
    %29 = vector.broadcast %c0_i32 : i32 to vector<1x512xi32>
    %30 = arith.cmpi sge, %5, %29 : vector<1x512xi32>
    %31 = arith.andi %28, %30 : vector<1x512xi1>
    %c16_i32_12 = arith.constant 16 : i32
    %32 = vector.broadcast %c16_i32_12 : i32 to vector<1x512xi32>
    %33 = arith.cmpi slt, %5, %32 : vector<1x512xi32>
    %34 = arith.andi %31, %33 : vector<1x512xi1>
    %cst_13 = arith.constant 0.000000e+00 : f32
    %35 = vector.shape_cast %34 : vector<1x512xi1> to vector<1x512xi1>
    %36 = vector.broadcast %35 : vector<1x512xi1> to vector<8x512xi1>
    %37 = vector.broadcast %cst_13 : f32 to vector<8x512xf32>
    %38 = arith.select %36, %23, %37 : vector<8x512xi1>, vector<8x512xf32>
    %c15_i32 = arith.constant 15 : i32
    %39 = tpu.dynamic_rotate %6 by %c15_i32 dim 1 : vector<8x512xf32>, i32 -> vector<8x512xf32>
    %c1_i32_14 = arith.constant 1 : i32
    %40 = vector.broadcast %c1_i32_14 : i32 to vector<1x512xi32>
    %41 = arith.cmpi sge, %4, %40 : vector<1x512xi32>
    %c17_i32_15 = arith.constant 17 : i32
    %42 = vector.broadcast %c17_i32_15 : i32 to vector<1x512xi32>
    %43 = arith.cmpi slt, %4, %42 : vector<1x512xi32>
    %44 = arith.andi %41, %43 : vector<1x512xi1>
    %c-1_i32 = arith.constant -1 : i32
    %45 = vector.broadcast %c-1_i32 : i32 to vector<1x512xi32>
    %46 = arith.cmpi sge, %5, %45 : vector<1x512xi32>
    %47 = arith.andi %44, %46 : vector<1x512xi1>
    %c15_i32_16 = arith.constant 15 : i32
    %48 = vector.broadcast %c15_i32_16 : i32 to vector<1x512xi32>
    %49 = arith.cmpi slt, %5, %48 : vector<1x512xi32>
    %50 = arith.andi %47, %49 : vector<1x512xi1>
    %cst_17 = arith.constant 0.000000e+00 : f32
    %51 = vector.shape_cast %50 : vector<1x512xi1> to vector<1x512xi1>
    %52 = vector.broadcast %51 : vector<1x512xi1> to vector<8x512xi1>
    %53 = vector.broadcast %cst_17 : f32 to vector<8x512xf32>
    %54 = arith.select %52, %39, %53 : vector<8x512xi1>, vector<8x512xf32>
    %c1_i32_18 = arith.constant 1 : i32
    %55 = tpu.dynamic_rotate %6 by %c1_i32_18 dim 1 : vector<8x512xf32>, i32 -> vector<8x512xf32>
    %c0_i32_19 = arith.constant 0 : i32
    %56 = vector.broadcast %c0_i32_19 : i32 to vector<1x512xi32>
    %57 = arith.cmpi sge, %4, %56 : vector<1x512xi32>
    %c16_i32_20 = arith.constant 16 : i32
    %58 = vector.broadcast %c16_i32_20 : i32 to vector<1x512xi32>
    %59 = arith.cmpi slt, %4, %58 : vector<1x512xi32>
    %60 = arith.andi %57, %59 : vector<1x512xi1>
    %c1_i32_21 = arith.constant 1 : i32
    %61 = vector.broadcast %c1_i32_21 : i32 to vector<1x512xi32>
    %62 = arith.cmpi sge, %5, %61 : vector<1x512xi32>
    %63 = arith.andi %60, %62 : vector<1x512xi1>
    %c17_i32_22 = arith.constant 17 : i32
    %64 = vector.broadcast %c17_i32_22 : i32 to vector<1x512xi32>
    %65 = arith.cmpi slt, %5, %64 : vector<1x512xi32>
    %66 = arith.andi %63, %65 : vector<1x512xi1>
    %cst_23 = arith.constant 0.000000e+00 : f32
    %67 = vector.shape_cast %66 : vector<1x512xi1> to vector<1x512xi1>
    %68 = vector.broadcast %67 : vector<1x512xi1> to vector<8x512xi1>
    %69 = vector.broadcast %cst_23 : f32 to vector<8x512xf32>
    %70 = arith.select %68, %55, %69 : vector<8x512xi1>, vector<8x512xf32>
    %c0_i32_24 = arith.constant 0 : i32
    %71 = vector.broadcast %c0_i32_24 : i32 to vector<1x512xi32>
    %72 = arith.cmpi sge, %4, %71 : vector<1x512xi32>
    %c16_i32_25 = arith.constant 16 : i32
    %73 = vector.broadcast %c16_i32_25 : i32 to vector<1x512xi32>
    %74 = arith.cmpi slt, %4, %73 : vector<1x512xi32>
    %75 = arith.andi %72, %74 : vector<1x512xi1>
    %c0_i32_26 = arith.constant 0 : i32
    %76 = vector.broadcast %c0_i32_26 : i32 to vector<1x512xi32>
    %77 = arith.cmpi sge, %5, %76 : vector<1x512xi32>
    %78 = arith.andi %75, %77 : vector<1x512xi1>
    %c16_i32_27 = arith.constant 16 : i32
    %79 = vector.broadcast %c16_i32_27 : i32 to vector<1x512xi32>
    %80 = arith.cmpi slt, %5, %79 : vector<1x512xi32>
    %81 = arith.andi %78, %80 : vector<1x512xi1>
    %cst_28 = arith.constant 0.000000e+00 : f32
    %82 = vector.shape_cast %81 : vector<1x512xi1> to vector<1x512xi1>
    %83 = vector.broadcast %82 : vector<1x512xi1> to vector<8x512xi1>
    %84 = vector.broadcast %cst_28 : f32 to vector<8x512xf32>
    %85 = arith.select %83, %6, %84 : vector<8x512xi1>, vector<8x512xf32>
    %c511_i32 = arith.constant 511 : i32
    %86 = tpu.dynamic_rotate %6 by %c511_i32 dim 1 : vector<8x512xf32>, i32 -> vector<8x512xf32>
    %c0_i32_29 = arith.constant 0 : i32
    %87 = vector.broadcast %c0_i32_29 : i32 to vector<1x512xi32>
    %88 = arith.cmpi sge, %4, %87 : vector<1x512xi32>
    %c16_i32_30 = arith.constant 16 : i32
    %89 = vector.broadcast %c16_i32_30 : i32 to vector<1x512xi32>
    %90 = arith.cmpi slt, %4, %89 : vector<1x512xi32>
    %91 = arith.andi %88, %90 : vector<1x512xi1>
    %c-1_i32_31 = arith.constant -1 : i32
    %92 = vector.broadcast %c-1_i32_31 : i32 to vector<1x512xi32>
    %93 = arith.cmpi sge, %5, %92 : vector<1x512xi32>
    %94 = arith.andi %91, %93 : vector<1x512xi1>
    %c15_i32_32 = arith.constant 15 : i32
    %95 = vector.broadcast %c15_i32_32 : i32 to vector<1x512xi32>
    %96 = arith.cmpi slt, %5, %95 : vector<1x512xi32>
    %97 = arith.andi %94, %96 : vector<1x512xi1>
    %cst_33 = arith.constant 0.000000e+00 : f32
    %98 = vector.shape_cast %97 : vector<1x512xi1> to vector<1x512xi1>
    %99 = vector.broadcast %98 : vector<1x512xi1> to vector<8x512xi1>
    %100 = vector.broadcast %cst_33 : f32 to vector<8x512xf32>
    %101 = arith.select %99, %86, %100 : vector<8x512xi1>, vector<8x512xf32>
    %c497_i32 = arith.constant 497 : i32
    %102 = tpu.dynamic_rotate %6 by %c497_i32 dim 1 : vector<8x512xf32>, i32 -> vector<8x512xf32>
    %c-1_i32_34 = arith.constant -1 : i32
    %103 = vector.broadcast %c-1_i32_34 : i32 to vector<1x512xi32>
    %104 = arith.cmpi sge, %4, %103 : vector<1x512xi32>
    %c15_i32_35 = arith.constant 15 : i32
    %105 = vector.broadcast %c15_i32_35 : i32 to vector<1x512xi32>
    %106 = arith.cmpi slt, %4, %105 : vector<1x512xi32>
    %107 = arith.andi %104, %106 : vector<1x512xi1>
    %c1_i32_36 = arith.constant 1 : i32
    %108 = vector.broadcast %c1_i32_36 : i32 to vector<1x512xi32>
    %109 = arith.cmpi sge, %5, %108 : vector<1x512xi32>
    %110 = arith.andi %107, %109 : vector<1x512xi1>
    %c17_i32_37 = arith.constant 17 : i32
    %111 = vector.broadcast %c17_i32_37 : i32 to vector<1x512xi32>
    %112 = arith.cmpi slt, %5, %111 : vector<1x512xi32>
    %113 = arith.andi %110, %112 : vector<1x512xi1>
    %cst_38 = arith.constant 0.000000e+00 : f32
    %114 = vector.shape_cast %113 : vector<1x512xi1> to vector<1x512xi1>
    %115 = vector.broadcast %114 : vector<1x512xi1> to vector<8x512xi1>
    %116 = vector.broadcast %cst_38 : f32 to vector<8x512xf32>
    %117 = arith.select %115, %102, %116 : vector<8x512xi1>, vector<8x512xf32>
    %c496_i32 = arith.constant 496 : i32
    %118 = tpu.dynamic_rotate %6 by %c496_i32 dim 1 : vector<8x512xf32>, i32 -> vector<8x512xf32>
    %c-1_i32_39 = arith.constant -1 : i32
    %119 = vector.broadcast %c-1_i32_39 : i32 to vector<1x512xi32>
    %120 = arith.cmpi sge, %4, %119 : vector<1x512xi32>
    %c15_i32_40 = arith.constant 15 : i32
    %121 = vector.broadcast %c15_i32_40 : i32 to vector<1x512xi32>
    %122 = arith.cmpi slt, %4, %121 : vector<1x512xi32>
    %123 = arith.andi %120, %122 : vector<1x512xi1>
    %c0_i32_41 = arith.constant 0 : i32
    %124 = vector.broadcast %c0_i32_41 : i32 to vector<1x512xi32>
    %125 = arith.cmpi sge, %5, %124 : vector<1x512xi32>
    %126 = arith.andi %123, %125 : vector<1x512xi1>
    %c16_i32_42 = arith.constant 16 : i32
    %127 = vector.broadcast %c16_i32_42 : i32 to vector<1x512xi32>
    %128 = arith.cmpi slt, %5, %127 : vector<1x512xi32>
    %129 = arith.andi %126, %128 : vector<1x512xi1>
    %cst_43 = arith.constant 0.000000e+00 : f32
    %130 = vector.shape_cast %129 : vector<1x512xi1> to vector<1x512xi1>
    %131 = vector.broadcast %130 : vector<1x512xi1> to vector<8x512xi1>
    %132 = vector.broadcast %cst_43 : f32 to vector<8x512xf32>
    %133 = arith.select %131, %118, %132 : vector<8x512xi1>, vector<8x512xf32>
    %c495_i32 = arith.constant 495 : i32
    %134 = tpu.dynamic_rotate %6 by %c495_i32 dim 1 : vector<8x512xf32>, i32 -> vector<8x512xf32>
    %c-1_i32_44 = arith.constant -1 : i32
    %135 = vector.broadcast %c-1_i32_44 : i32 to vector<1x512xi32>
    %136 = arith.cmpi sge, %4, %135 : vector<1x512xi32>
    %c15_i32_45 = arith.constant 15 : i32
    %137 = vector.broadcast %c15_i32_45 : i32 to vector<1x512xi32>
    %138 = arith.cmpi slt, %4, %137 : vector<1x512xi32>
    %139 = arith.andi %136, %138 : vector<1x512xi1>
    %c-1_i32_46 = arith.constant -1 : i32
    %140 = vector.broadcast %c-1_i32_46 : i32 to vector<1x512xi32>
    %141 = arith.cmpi sge, %5, %140 : vector<1x512xi32>
    %142 = arith.andi %139, %141 : vector<1x512xi1>
    %c15_i32_47 = arith.constant 15 : i32
    %143 = vector.broadcast %c15_i32_47 : i32 to vector<1x512xi32>
    %144 = arith.cmpi slt, %5, %143 : vector<1x512xi32>
    %145 = arith.andi %142, %144 : vector<1x512xi1>
    %cst_48 = arith.constant 0.000000e+00 : f32
    %146 = vector.shape_cast %145 : vector<1x512xi1> to vector<1x512xi1>
    %147 = vector.broadcast %146 : vector<1x512xi1> to vector<8x512xi1>
    %148 = vector.broadcast %cst_48 : f32 to vector<8x512xf32>
    %149 = arith.select %147, %134, %148 : vector<8x512xi1>, vector<8x512xf32>
    %150 = tpu.concatenate %22, %38, %54, %70, %85, %101, %117, %133, %149 in 0 : vector<8x512xf32>, vector<8x512xf32>, vector<8x512xf32>, vector<8x512xf32>, vector<8x512xf32>, vector<8x512xf32>, vector<8x512xf32>, vector<8x512xf32>, vector<8x512xf32> -> vector<72x512xf32>
    %151 = arith.truncf %150 : vector<72x512xf32> to vector<72x512xbf16>
    %cst_49 = arith.constant dense<0.000000e+00> : vector<8x512xf32>
    %152 = tpu.matmul %2, %151, %cst_49 {dimension_numbers = #tpu.dot_dimension_numbers<[1], [0], [0], [1], [0, 0, 1, 1], [], []>} : vector<8x72xbf16>, vector<72x512xbf16>, vector<8x512xf32> -> vector<8x512xf32>
    %153 = vector.broadcast %3 : vector<8x1xf32> to vector<8x512xf32>
    %154 = arith.addf %152, %153 : vector<8x512xf32>
    %cst_50 = arith.constant dense<0.000000e+00> : vector<8xf32>
    %155 = vector.multi_reduction <add>, %154, %cst_50 [1] : vector<8x512xf32> to vector<8xf32>
    %156 = vector.shape_cast %155 : vector<8xf32> to vector<8x1xf32>
    %cst_51 = arith.constant 0.001953125 : f32
    %157 = vector.broadcast %cst_51 : f32 to vector<8x1xf32>
    %158 = arith.mulf %156, %157 : vector<8x1xf32>
    %159 = arith.mulf %154, %154 : vector<8x512xf32>
    %cst_52 = arith.constant dense<0.000000e+00> : vector<8xf32>
    %160 = vector.multi_reduction <add>, %159, %cst_52 [1] : vector<8x512xf32> to vector<8xf32>
    %161 = vector.shape_cast %160 : vector<8xf32> to vector<8x1xf32>
    %cst_53 = arith.constant 0.001953125 : f32
    %162 = vector.broadcast %cst_53 : f32 to vector<8x1xf32>
    %163 = arith.mulf %161, %162 : vector<8x1xf32>
    %164 = arith.mulf %158, %158 : vector<8x1xf32>
    %165 = arith.subf %163, %164 : vector<8x1xf32>
    %cst_54 = arith.constant 0.000000e+00 : f32
    %166 = vector.broadcast %cst_54 : f32 to vector<8x1xf32>
    %167 = arith.maximumf %165, %166 : vector<8x1xf32>
    %168 = vector.broadcast %158 : vector<8x1xf32> to vector<8x512xf32>
    %169 = arith.subf %154, %168 : vector<8x512xf32>
    %cst_55 = arith.constant 9.99999974E-6 : f32
    %170 = vector.broadcast %cst_55 : f32 to vector<8x1xf32>
    %171 = arith.addf %167, %170 : vector<8x1xf32>
    %172 = math.rsqrt %171 : vector<8x1xf32>
    %173 = vector.broadcast %172 : vector<8x1xf32> to vector<8x512xf32>
    %174 = arith.mulf %169, %173 : vector<8x512xf32>
    %cst_56 = arith.constant 0.000000e+00 : f32
    %175 = vector.broadcast %cst_56 : f32 to vector<8x512xf32>
    %176 = arith.cmpf oge, %174, %175 : vector<8x512xf32>
    %cst_57 = arith.constant 2.000000e-01 : f32
    %177 = vector.broadcast %cst_57 : f32 to vector<8x512xf32>
    %178 = arith.mulf %177, %174 : vector<8x512xf32>
    %179 = arith.select %176, %174, %178 : vector<8x512xi1>, vector<8x512xf32>
    %180 = arith.truncf %179 : vector<8x512xf32> to vector<8x512xbf16>
    %c0_58 = arith.constant 0 : index
    %c0_59 = arith.constant 0 : index
    %181 = vector.load %arg5[%c0_58, %c0_59] : memref<8x512xbf16, #tpu.memory_space<vmem>>, vector<8x512xbf16>
    tpu.vector_store %arg5[%c0_58, %c0_59], %180 {strides = array<i32>} : memref<8x512xbf16, #tpu.memory_space<vmem>>, vector<8x512xbf16>,
    return
  }
  func.func @transform_0(%arg0: i32) -> (i32, i32) {
    %c0_i32 = arith.constant 0 : i32
    %c0_i32_0 = arith.constant 0 : i32
    %c0_i32_1 = arith.constant 0 : i32
    return %c0_i32, %c0_i32_0 : i32, i32
  }
  func.func @transform_1(%arg0: i32) -> (i32, i32) {
    %c0_i32 = arith.constant 0 : i32
    %c0_i32_0 = arith.constant 0 : i32
    %c0_i32_1 = arith.constant 0 : i32
    return %c0_i32, %c0_i32_0 : i32, i32
  }
  func.func @transform_2(%arg0: i32) -> (i32, i32) {
    %c0_i32 = arith.constant 0 : i32
    %c0_i32_0 = arith.constant 0 : i32
    %c0_i32_1 = arith.constant 0 : i32
    return %c0_i32, %c0_i32_0 : i32, i32
  }
  func.func @transform_3(%arg0: i32) -> (i32, i32) {
    %c0_i32 = arith.constant 0 : i32
    %c0_i32_0 = arith.constant 0 : i32
    %c0_i32_1 = arith.constant 0 : i32
    return %c0_i32, %c0_i32_0 : i32, i32
  }
  func.func @transform_4(%arg0: i32) -> (i32, i32) {
    %c0_i32 = arith.constant 0 : i32
    %c0_i32_0 = arith.constant 0 : i32
    %c0_i32_1 = arith.constant 0 : i32
    return %c0_i32, %c0_i32_0 : i32, i32
  }
}

module attributes {stable_mosaic.version = 11 : i64} {
  func.func @kernel(%arg0: i32, %arg1: memref<16x128xbf16, #tpu.memory_space<vmem>>, %arg2: memref<2x128xi32, #tpu.memory_space<vmem>>, %arg3: memref<16x144xbf16, #tpu.memory_space<vmem>>, %arg4: memref<16x1xf32, #tpu.memory_space<vmem>>, %arg5: memref<16x128xbf16, #tpu.memory_space<vmem>>) attributes {dimension_semantics = [#tpu.dimension_semantics<arbitrary>], iteration_bounds = array<i64: 1>, scalar_prefetch = 0 : i64, scratch_operands = 0 : i64, tpu.core_type = #tpu.core_type<tc>, window_params = [{pipeline_mode = #tpu.pipeline_mode<synchronous>, transform_indices = @transform_0, window_bounds = array<i64: 16, 128>}, {pipeline_mode = #tpu.pipeline_mode<synchronous>, transform_indices = @transform_1, window_bounds = array<i64: 2, 128>}, {pipeline_mode = #tpu.pipeline_mode<synchronous>, transform_indices = @transform_2, window_bounds = array<i64: 16, 144>}, {pipeline_mode = #tpu.pipeline_mode<synchronous>, transform_indices = @transform_3, window_bounds = array<i64: 16, 1>}, {pipeline_mode = #tpu.pipeline_mode<synchronous>, transform_indices = @transform_4, window_bounds = array<i64: 16, 128>}]} {
    %c0 = arith.constant 0 : index
    %c0_0 = arith.constant 0 : index
    %0 = vector.load %arg1[%c0, %c0_0] : memref<16x128xbf16, #tpu.memory_space<vmem>>, vector<16x128xbf16>
    %c0_1 = arith.constant 0 : index
    %c0_2 = arith.constant 0 : index
    %1 = vector.load %arg2[%c0_1, %c0_2] : memref<2x128xi32, #tpu.memory_space<vmem>>, vector<2x128xi32>
    %c0_3 = arith.constant 0 : index
    %c0_4 = arith.constant 0 : index
    %2 = vector.load %arg3[%c0_3, %c0_4] : memref<16x144xbf16, #tpu.memory_space<vmem>>, vector<16x144xbf16>
    %c0_5 = arith.constant 0 : index
    %c0_6 = arith.constant 0 : index
    %3 = vector.load %arg4[%c0_5, %c0_6] : memref<16x1xf32, #tpu.memory_space<vmem>>, vector<16x1xf32>
    %4 = vector.extract_strided_slice %1 {offsets = [0, 0], sizes = [1, 128], strides = [1, 1]} : vector<2x128xi32> to vector<1x128xi32>
    %5 = vector.extract_strided_slice %1 {offsets = [1, 0], sizes = [1, 128], strides = [1, 1]} : vector<2x128xi32> to vector<1x128xi32>
    %6 = arith.extf %0 : vector<16x128xbf16> to vector<16x128xf32>
    %c9_i32 = arith.constant 9 : i32
    %7 = tpu.dynamic_rotate %6 by %c9_i32 dim 1 : vector<16x128xf32>, i32 -> vector<16x128xf32>
    %c1_i32 = arith.constant 1 : i32
    %8 = vector.broadcast %c1_i32 : i32 to vector<1x128xi32>
    %9 = arith.cmpi sge, %4, %8 : vector<1x128xi32>
    %c9_i32_7 = arith.constant 9 : i32
    %10 = vector.broadcast %c9_i32_7 : i32 to vector<1x128xi32>
    %11 = arith.cmpi slt, %4, %10 : vector<1x128xi32>
    %12 = arith.andi %9, %11 : vector<1x128xi1>
    %c1_i32_8 = arith.constant 1 : i32
    %13 = vector.broadcast %c1_i32_8 : i32 to vector<1x128xi32>
    %14 = arith.cmpi sge, %5, %13 : vector<1x128xi32>
    %15 = arith.andi %12, %14 : vector<1x128xi1>
    %c9_i32_9 = arith.constant 9 : i32
    %16 = vector.broadcast %c9_i32_9 : i32 to vector<1x128xi32>
    %17 = arith.cmpi slt, %5, %16 : vector<1x128xi32>
    %18 = arith.andi %15, %17 : vector<1x128xi1>
    %cst = arith.constant 0.000000e+00 : f32
    %19 = vector.shape_cast %18 : vector<1x128xi1> to vector<1x128xi1>
    %20 = vector.broadcast %19 : vector<1x128xi1> to vector<16x128xi1>
    %21 = vector.broadcast %cst : f32 to vector<16x128xf32>
    %22 = arith.select %20, %7, %21 : vector<16x128xi1>, vector<16x128xf32>
    %c8_i32 = arith.constant 8 : i32
    %23 = tpu.dynamic_rotate %6 by %c8_i32 dim 1 : vector<16x128xf32>, i32 -> vector<16x128xf32>
    %c1_i32_10 = arith.constant 1 : i32
    %24 = vector.broadcast %c1_i32_10 : i32 to vector<1x128xi32>
    %25 = arith.cmpi sge, %4, %24 : vector<1x128xi32>
    %c9_i32_11 = arith.constant 9 : i32
    %26 = vector.broadcast %c9_i32_11 : i32 to vector<1x128xi32>
    %27 = arith.cmpi slt, %4, %26 : vector<1x128xi32>
    %28 = arith.andi %25, %27 : vector<1x128xi1>
    %c0_i32 = arith.constant 0 : i32
    %29 = vector.broadcast %c0_i32 : i32 to vector<1x128xi32>
    %30 = arith.cmpi sge, %5, %29 : vector<1x128xi32>
    %31 = arith.andi %28, %30 : vector<1x128xi1>
    %c8_i32_12 = arith.constant 8 : i32
    %32 = vector.broadcast %c8_i32_12 : i32 to vector<1x128xi32>
    %33 = arith.cmpi slt, %5, %32 : vector<1x128xi32>
    %34 = arith.andi %31, %33 : vector<1x128xi1>
    %cst_13 = arith.constant 0.000000e+00 : f32
    %35 = vector.shape_cast %34 : vector<1x128xi1> to vector<1x128xi1>
    %36 = vector.broadcast %35 : vector<1x128xi1> to vector<16x128xi1>
    %37 = vector.broadcast %cst_13 : f32 to vector<16x128xf32>
    %38 = arith.select %36, %23, %37 : vector<16x128xi1>, vector<16x128xf32>
    %c7_i32 = arith.constant 7 : i32
    %39 = tpu.dynamic_rotate %6 by %c7_i32 dim 1 : vector<16x128xf32>, i32 -> vector<16x128xf32>
    %c1_i32_14 = arith.constant 1 : i32
    %40 = vector.broadcast %c1_i32_14 : i32 to vector<1x128xi32>
    %41 = arith.cmpi sge, %4, %40 : vector<1x128xi32>
    %c9_i32_15 = arith.constant 9 : i32
    %42 = vector.broadcast %c9_i32_15 : i32 to vector<1x128xi32>
    %43 = arith.cmpi slt, %4, %42 : vector<1x128xi32>
    %44 = arith.andi %41, %43 : vector<1x128xi1>
    %c-1_i32 = arith.constant -1 : i32
    %45 = vector.broadcast %c-1_i32 : i32 to vector<1x128xi32>
    %46 = arith.cmpi sge, %5, %45 : vector<1x128xi32>
    %47 = arith.andi %44, %46 : vector<1x128xi1>
    %c7_i32_16 = arith.constant 7 : i32
    %48 = vector.broadcast %c7_i32_16 : i32 to vector<1x128xi32>
    %49 = arith.cmpi slt, %5, %48 : vector<1x128xi32>
    %50 = arith.andi %47, %49 : vector<1x128xi1>
    %cst_17 = arith.constant 0.000000e+00 : f32
    %51 = vector.shape_cast %50 : vector<1x128xi1> to vector<1x128xi1>
    %52 = vector.broadcast %51 : vector<1x128xi1> to vector<16x128xi1>
    %53 = vector.broadcast %cst_17 : f32 to vector<16x128xf32>
    %54 = arith.select %52, %39, %53 : vector<16x128xi1>, vector<16x128xf32>
    %c1_i32_18 = arith.constant 1 : i32
    %55 = tpu.dynamic_rotate %6 by %c1_i32_18 dim 1 : vector<16x128xf32>, i32 -> vector<16x128xf32>
    %c0_i32_19 = arith.constant 0 : i32
    %56 = vector.broadcast %c0_i32_19 : i32 to vector<1x128xi32>
    %57 = arith.cmpi sge, %4, %56 : vector<1x128xi32>
    %c8_i32_20 = arith.constant 8 : i32
    %58 = vector.broadcast %c8_i32_20 : i32 to vector<1x128xi32>
    %59 = arith.cmpi slt, %4, %58 : vector<1x128xi32>
    %60 = arith.andi %57, %59 : vector<1x128xi1>
    %c1_i32_21 = arith.constant 1 : i32
    %61 = vector.broadcast %c1_i32_21 : i32 to vector<1x128xi32>
    %62 = arith.cmpi sge, %5, %61 : vector<1x128xi32>
    %63 = arith.andi %60, %62 : vector<1x128xi1>
    %c9_i32_22 = arith.constant 9 : i32
    %64 = vector.broadcast %c9_i32_22 : i32 to vector<1x128xi32>
    %65 = arith.cmpi slt, %5, %64 : vector<1x128xi32>
    %66 = arith.andi %63, %65 : vector<1x128xi1>
    %cst_23 = arith.constant 0.000000e+00 : f32
    %67 = vector.shape_cast %66 : vector<1x128xi1> to vector<1x128xi1>
    %68 = vector.broadcast %67 : vector<1x128xi1> to vector<16x128xi1>
    %69 = vector.broadcast %cst_23 : f32 to vector<16x128xf32>
    %70 = arith.select %68, %55, %69 : vector<16x128xi1>, vector<16x128xf32>
    %c0_i32_24 = arith.constant 0 : i32
    %71 = vector.broadcast %c0_i32_24 : i32 to vector<1x128xi32>
    %72 = arith.cmpi sge, %4, %71 : vector<1x128xi32>
    %c8_i32_25 = arith.constant 8 : i32
    %73 = vector.broadcast %c8_i32_25 : i32 to vector<1x128xi32>
    %74 = arith.cmpi slt, %4, %73 : vector<1x128xi32>
    %75 = arith.andi %72, %74 : vector<1x128xi1>
    %c0_i32_26 = arith.constant 0 : i32
    %76 = vector.broadcast %c0_i32_26 : i32 to vector<1x128xi32>
    %77 = arith.cmpi sge, %5, %76 : vector<1x128xi32>
    %78 = arith.andi %75, %77 : vector<1x128xi1>
    %c8_i32_27 = arith.constant 8 : i32
    %79 = vector.broadcast %c8_i32_27 : i32 to vector<1x128xi32>
    %80 = arith.cmpi slt, %5, %79 : vector<1x128xi32>
    %81 = arith.andi %78, %80 : vector<1x128xi1>
    %cst_28 = arith.constant 0.000000e+00 : f32
    %82 = vector.shape_cast %81 : vector<1x128xi1> to vector<1x128xi1>
    %83 = vector.broadcast %82 : vector<1x128xi1> to vector<16x128xi1>
    %84 = vector.broadcast %cst_28 : f32 to vector<16x128xf32>
    %85 = arith.select %83, %6, %84 : vector<16x128xi1>, vector<16x128xf32>
    %c127_i32 = arith.constant 127 : i32
    %86 = tpu.dynamic_rotate %6 by %c127_i32 dim 1 : vector<16x128xf32>, i32 -> vector<16x128xf32>
    %c0_i32_29 = arith.constant 0 : i32
    %87 = vector.broadcast %c0_i32_29 : i32 to vector<1x128xi32>
    %88 = arith.cmpi sge, %4, %87 : vector<1x128xi32>
    %c8_i32_30 = arith.constant 8 : i32
    %89 = vector.broadcast %c8_i32_30 : i32 to vector<1x128xi32>
    %90 = arith.cmpi slt, %4, %89 : vector<1x128xi32>
    %91 = arith.andi %88, %90 : vector<1x128xi1>
    %c-1_i32_31 = arith.constant -1 : i32
    %92 = vector.broadcast %c-1_i32_31 : i32 to vector<1x128xi32>
    %93 = arith.cmpi sge, %5, %92 : vector<1x128xi32>
    %94 = arith.andi %91, %93 : vector<1x128xi1>
    %c7_i32_32 = arith.constant 7 : i32
    %95 = vector.broadcast %c7_i32_32 : i32 to vector<1x128xi32>
    %96 = arith.cmpi slt, %5, %95 : vector<1x128xi32>
    %97 = arith.andi %94, %96 : vector<1x128xi1>
    %cst_33 = arith.constant 0.000000e+00 : f32
    %98 = vector.shape_cast %97 : vector<1x128xi1> to vector<1x128xi1>
    %99 = vector.broadcast %98 : vector<1x128xi1> to vector<16x128xi1>
    %100 = vector.broadcast %cst_33 : f32 to vector<16x128xf32>
    %101 = arith.select %99, %86, %100 : vector<16x128xi1>, vector<16x128xf32>
    %c121_i32 = arith.constant 121 : i32
    %102 = tpu.dynamic_rotate %6 by %c121_i32 dim 1 : vector<16x128xf32>, i32 -> vector<16x128xf32>
    %c-1_i32_34 = arith.constant -1 : i32
    %103 = vector.broadcast %c-1_i32_34 : i32 to vector<1x128xi32>
    %104 = arith.cmpi sge, %4, %103 : vector<1x128xi32>
    %c7_i32_35 = arith.constant 7 : i32
    %105 = vector.broadcast %c7_i32_35 : i32 to vector<1x128xi32>
    %106 = arith.cmpi slt, %4, %105 : vector<1x128xi32>
    %107 = arith.andi %104, %106 : vector<1x128xi1>
    %c1_i32_36 = arith.constant 1 : i32
    %108 = vector.broadcast %c1_i32_36 : i32 to vector<1x128xi32>
    %109 = arith.cmpi sge, %5, %108 : vector<1x128xi32>
    %110 = arith.andi %107, %109 : vector<1x128xi1>
    %c9_i32_37 = arith.constant 9 : i32
    %111 = vector.broadcast %c9_i32_37 : i32 to vector<1x128xi32>
    %112 = arith.cmpi slt, %5, %111 : vector<1x128xi32>
    %113 = arith.andi %110, %112 : vector<1x128xi1>
    %cst_38 = arith.constant 0.000000e+00 : f32
    %114 = vector.shape_cast %113 : vector<1x128xi1> to vector<1x128xi1>
    %115 = vector.broadcast %114 : vector<1x128xi1> to vector<16x128xi1>
    %116 = vector.broadcast %cst_38 : f32 to vector<16x128xf32>
    %117 = arith.select %115, %102, %116 : vector<16x128xi1>, vector<16x128xf32>
    %c120_i32 = arith.constant 120 : i32
    %118 = tpu.dynamic_rotate %6 by %c120_i32 dim 1 : vector<16x128xf32>, i32 -> vector<16x128xf32>
    %c-1_i32_39 = arith.constant -1 : i32
    %119 = vector.broadcast %c-1_i32_39 : i32 to vector<1x128xi32>
    %120 = arith.cmpi sge, %4, %119 : vector<1x128xi32>
    %c7_i32_40 = arith.constant 7 : i32
    %121 = vector.broadcast %c7_i32_40 : i32 to vector<1x128xi32>
    %122 = arith.cmpi slt, %4, %121 : vector<1x128xi32>
    %123 = arith.andi %120, %122 : vector<1x128xi1>
    %c0_i32_41 = arith.constant 0 : i32
    %124 = vector.broadcast %c0_i32_41 : i32 to vector<1x128xi32>
    %125 = arith.cmpi sge, %5, %124 : vector<1x128xi32>
    %126 = arith.andi %123, %125 : vector<1x128xi1>
    %c8_i32_42 = arith.constant 8 : i32
    %127 = vector.broadcast %c8_i32_42 : i32 to vector<1x128xi32>
    %128 = arith.cmpi slt, %5, %127 : vector<1x128xi32>
    %129 = arith.andi %126, %128 : vector<1x128xi1>
    %cst_43 = arith.constant 0.000000e+00 : f32
    %130 = vector.shape_cast %129 : vector<1x128xi1> to vector<1x128xi1>
    %131 = vector.broadcast %130 : vector<1x128xi1> to vector<16x128xi1>
    %132 = vector.broadcast %cst_43 : f32 to vector<16x128xf32>
    %133 = arith.select %131, %118, %132 : vector<16x128xi1>, vector<16x128xf32>
    %c119_i32 = arith.constant 119 : i32
    %134 = tpu.dynamic_rotate %6 by %c119_i32 dim 1 : vector<16x128xf32>, i32 -> vector<16x128xf32>
    %c-1_i32_44 = arith.constant -1 : i32
    %135 = vector.broadcast %c-1_i32_44 : i32 to vector<1x128xi32>
    %136 = arith.cmpi sge, %4, %135 : vector<1x128xi32>
    %c7_i32_45 = arith.constant 7 : i32
    %137 = vector.broadcast %c7_i32_45 : i32 to vector<1x128xi32>
    %138 = arith.cmpi slt, %4, %137 : vector<1x128xi32>
    %139 = arith.andi %136, %138 : vector<1x128xi1>
    %c-1_i32_46 = arith.constant -1 : i32
    %140 = vector.broadcast %c-1_i32_46 : i32 to vector<1x128xi32>
    %141 = arith.cmpi sge, %5, %140 : vector<1x128xi32>
    %142 = arith.andi %139, %141 : vector<1x128xi1>
    %c7_i32_47 = arith.constant 7 : i32
    %143 = vector.broadcast %c7_i32_47 : i32 to vector<1x128xi32>
    %144 = arith.cmpi slt, %5, %143 : vector<1x128xi32>
    %145 = arith.andi %142, %144 : vector<1x128xi1>
    %cst_48 = arith.constant 0.000000e+00 : f32
    %146 = vector.shape_cast %145 : vector<1x128xi1> to vector<1x128xi1>
    %147 = vector.broadcast %146 : vector<1x128xi1> to vector<16x128xi1>
    %148 = vector.broadcast %cst_48 : f32 to vector<16x128xf32>
    %149 = arith.select %147, %134, %148 : vector<16x128xi1>, vector<16x128xf32>
    %150 = tpu.concatenate %22, %38, %54, %70, %85, %101, %117, %133, %149 in 0 : vector<16x128xf32>, vector<16x128xf32>, vector<16x128xf32>, vector<16x128xf32>, vector<16x128xf32>, vector<16x128xf32>, vector<16x128xf32>, vector<16x128xf32>, vector<16x128xf32> -> vector<144x128xf32>
    %151 = arith.truncf %150 : vector<144x128xf32> to vector<144x128xbf16>
    %cst_49 = arith.constant dense<0.000000e+00> : vector<16x128xf32>
    %152 = tpu.matmul %2, %151, %cst_49 {dimension_numbers = #tpu.dot_dimension_numbers<[1], [0], [0], [1], [0, 0, 1, 1], [], []>} : vector<16x144xbf16>, vector<144x128xbf16>, vector<16x128xf32> -> vector<16x128xf32>
    %153 = vector.broadcast %3 : vector<16x1xf32> to vector<16x128xf32>
    %154 = arith.addf %152, %153 : vector<16x128xf32>
    %cst_50 = arith.constant dense<0.000000e+00> : vector<16xf32>
    %155 = vector.multi_reduction <add>, %154, %cst_50 [1] : vector<16x128xf32> to vector<16xf32>
    %156 = vector.shape_cast %155 : vector<16xf32> to vector<16x1xf32>
    %cst_51 = arith.constant 7.812500e-03 : f32
    %157 = vector.broadcast %cst_51 : f32 to vector<16x1xf32>
    %158 = arith.mulf %156, %157 : vector<16x1xf32>
    %159 = arith.mulf %154, %154 : vector<16x128xf32>
    %cst_52 = arith.constant dense<0.000000e+00> : vector<16xf32>
    %160 = vector.multi_reduction <add>, %159, %cst_52 [1] : vector<16x128xf32> to vector<16xf32>
    %161 = vector.shape_cast %160 : vector<16xf32> to vector<16x1xf32>
    %cst_53 = arith.constant 7.812500e-03 : f32
    %162 = vector.broadcast %cst_53 : f32 to vector<16x1xf32>
    %163 = arith.mulf %161, %162 : vector<16x1xf32>
    %164 = arith.mulf %158, %158 : vector<16x1xf32>
    %165 = arith.subf %163, %164 : vector<16x1xf32>
    %cst_54 = arith.constant 0.000000e+00 : f32
    %166 = vector.broadcast %cst_54 : f32 to vector<16x1xf32>
    %167 = arith.maximumf %165, %166 : vector<16x1xf32>
    %168 = vector.broadcast %158 : vector<16x1xf32> to vector<16x128xf32>
    %169 = arith.subf %154, %168 : vector<16x128xf32>
    %cst_55 = arith.constant 9.99999974E-6 : f32
    %170 = vector.broadcast %cst_55 : f32 to vector<16x1xf32>
    %171 = arith.addf %167, %170 : vector<16x1xf32>
    %172 = math.rsqrt %171 : vector<16x1xf32>
    %173 = vector.broadcast %172 : vector<16x1xf32> to vector<16x128xf32>
    %174 = arith.mulf %169, %173 : vector<16x128xf32>
    %cst_56 = arith.constant 0.000000e+00 : f32
    %175 = vector.broadcast %cst_56 : f32 to vector<16x128xf32>
    %176 = arith.cmpf oge, %174, %175 : vector<16x128xf32>
    %cst_57 = arith.constant 2.000000e-01 : f32
    %177 = vector.broadcast %cst_57 : f32 to vector<16x128xf32>
    %178 = arith.mulf %177, %174 : vector<16x128xf32>
    %179 = arith.select %176, %174, %178 : vector<16x128xi1>, vector<16x128xf32>
    %180 = arith.truncf %179 : vector<16x128xf32> to vector<16x128xbf16>
    %c0_58 = arith.constant 0 : index
    %c0_59 = arith.constant 0 : index
    %181 = vector.load %arg5[%c0_58, %c0_59] : memref<16x128xbf16, #tpu.memory_space<vmem>>, vector<16x128xbf16>
    tpu.vector_store %arg5[%c0_58, %c0_59], %180 {strides = array<i32>} : memref<16x128xbf16, #tpu.memory_space<vmem>>, vector<16x128xbf16>,
    return
  }
  func.func @transform_0(%arg0: i32) -> (i32, i32) {
    %c0_i32 = arith.constant 0 : i32
    %c0_i32_0 = arith.constant 0 : i32
    %c0_i32_1 = arith.constant 0 : i32
    return %c0_i32, %c0_i32_0 : i32, i32
  }
  func.func @transform_1(%arg0: i32) -> (i32, i32) {
    %c0_i32 = arith.constant 0 : i32
    %c0_i32_0 = arith.constant 0 : i32
    %c0_i32_1 = arith.constant 0 : i32
    return %c0_i32, %c0_i32_0 : i32, i32
  }
  func.func @transform_2(%arg0: i32) -> (i32, i32) {
    %c0_i32 = arith.constant 0 : i32
    %c0_i32_0 = arith.constant 0 : i32
    %c0_i32_1 = arith.constant 0 : i32
    return %c0_i32, %c0_i32_0 : i32, i32
  }
  func.func @transform_3(%arg0: i32) -> (i32, i32) {
    %c0_i32 = arith.constant 0 : i32
    %c0_i32_0 = arith.constant 0 : i32
    %c0_i32_1 = arith.constant 0 : i32
    return %c0_i32, %c0_i32_0 : i32, i32
  }
  func.func @transform_4(%arg0: i32) -> (i32, i32) {
    %c0_i32 = arith.constant 0 : i32
    %c0_i32_0 = arith.constant 0 : i32
    %c0_i32_1 = arith.constant 0 : i32
    return %c0_i32, %c0_i32_0 : i32, i32
  }
}

module attributes {stable_mosaic.version = 11 : i64} {
  func.func @kernel(%arg0: i32, %arg1: memref<8x128xbf16, #tpu.memory_space<vmem>>, %arg2: memref<2x128xi32, #tpu.memory_space<vmem>>, %arg3: memref<16x72xbf16, #tpu.memory_space<vmem>>, %arg4: memref<16x1xf32, #tpu.memory_space<vmem>>, %arg5: memref<16x128xbf16, #tpu.memory_space<vmem>>) attributes {dimension_semantics = [#tpu.dimension_semantics<arbitrary>], iteration_bounds = array<i64: 1>, scalar_prefetch = 0 : i64, scratch_operands = 0 : i64, tpu.core_type = #tpu.core_type<tc>, window_params = [{pipeline_mode = #tpu.pipeline_mode<synchronous>, transform_indices = @transform_0, window_bounds = array<i64: 8, 128>}, {pipeline_mode = #tpu.pipeline_mode<synchronous>, transform_indices = @transform_1, window_bounds = array<i64: 2, 128>}, {pipeline_mode = #tpu.pipeline_mode<synchronous>, transform_indices = @transform_2, window_bounds = array<i64: 16, 72>}, {pipeline_mode = #tpu.pipeline_mode<synchronous>, transform_indices = @transform_3, window_bounds = array<i64: 16, 1>}, {pipeline_mode = #tpu.pipeline_mode<synchronous>, transform_indices = @transform_4, window_bounds = array<i64: 16, 128>}]} {
    %c0 = arith.constant 0 : index
    %c0_0 = arith.constant 0 : index
    %0 = vector.load %arg1[%c0, %c0_0] : memref<8x128xbf16, #tpu.memory_space<vmem>>, vector<8x128xbf16>
    %c0_1 = arith.constant 0 : index
    %c0_2 = arith.constant 0 : index
    %1 = vector.load %arg2[%c0_1, %c0_2] : memref<2x128xi32, #tpu.memory_space<vmem>>, vector<2x128xi32>
    %c0_3 = arith.constant 0 : index
    %c0_4 = arith.constant 0 : index
    %2 = vector.load %arg3[%c0_3, %c0_4] : memref<16x72xbf16, #tpu.memory_space<vmem>>, vector<16x72xbf16>
    %c0_5 = arith.constant 0 : index
    %c0_6 = arith.constant 0 : index
    %3 = vector.load %arg4[%c0_5, %c0_6] : memref<16x1xf32, #tpu.memory_space<vmem>>, vector<16x1xf32>
    %4 = vector.extract_strided_slice %1 {offsets = [0, 0], sizes = [1, 128], strides = [1, 1]} : vector<2x128xi32> to vector<1x128xi32>
    %5 = vector.extract_strided_slice %1 {offsets = [1, 0], sizes = [1, 128], strides = [1, 1]} : vector<2x128xi32> to vector<1x128xi32>
    %6 = arith.extf %0 : vector<8x128xbf16> to vector<8x128xf32>
    %c9_i32 = arith.constant 9 : i32
    %7 = tpu.dynamic_rotate %6 by %c9_i32 dim 1 : vector<8x128xf32>, i32 -> vector<8x128xf32>
    %c1_i32 = arith.constant 1 : i32
    %8 = vector.broadcast %c1_i32 : i32 to vector<1x128xi32>
    %9 = arith.cmpi sge, %4, %8 : vector<1x128xi32>
    %c9_i32_7 = arith.constant 9 : i32
    %10 = vector.broadcast %c9_i32_7 : i32 to vector<1x128xi32>
    %11 = arith.cmpi slt, %4, %10 : vector<1x128xi32>
    %12 = arith.andi %9, %11 : vector<1x128xi1>
    %c1_i32_8 = arith.constant 1 : i32
    %13 = vector.broadcast %c1_i32_8 : i32 to vector<1x128xi32>
    %14 = arith.cmpi sge, %5, %13 : vector<1x128xi32>
    %15 = arith.andi %12, %14 : vector<1x128xi1>
    %c9_i32_9 = arith.constant 9 : i32
    %16 = vector.broadcast %c9_i32_9 : i32 to vector<1x128xi32>
    %17 = arith.cmpi slt, %5, %16 : vector<1x128xi32>
    %18 = arith.andi %15, %17 : vector<1x128xi1>
    %cst = arith.constant 0.000000e+00 : f32
    %19 = vector.shape_cast %18 : vector<1x128xi1> to vector<1x128xi1>
    %20 = vector.broadcast %19 : vector<1x128xi1> to vector<8x128xi1>
    %21 = vector.broadcast %cst : f32 to vector<8x128xf32>
    %22 = arith.select %20, %7, %21 : vector<8x128xi1>, vector<8x128xf32>
    %c8_i32 = arith.constant 8 : i32
    %23 = tpu.dynamic_rotate %6 by %c8_i32 dim 1 : vector<8x128xf32>, i32 -> vector<8x128xf32>
    %c1_i32_10 = arith.constant 1 : i32
    %24 = vector.broadcast %c1_i32_10 : i32 to vector<1x128xi32>
    %25 = arith.cmpi sge, %4, %24 : vector<1x128xi32>
    %c9_i32_11 = arith.constant 9 : i32
    %26 = vector.broadcast %c9_i32_11 : i32 to vector<1x128xi32>
    %27 = arith.cmpi slt, %4, %26 : vector<1x128xi32>
    %28 = arith.andi %25, %27 : vector<1x128xi1>
    %c0_i32 = arith.constant 0 : i32
    %29 = vector.broadcast %c0_i32 : i32 to vector<1x128xi32>
    %30 = arith.cmpi sge, %5, %29 : vector<1x128xi32>
    %31 = arith.andi %28, %30 : vector<1x128xi1>
    %c8_i32_12 = arith.constant 8 : i32
    %32 = vector.broadcast %c8_i32_12 : i32 to vector<1x128xi32>
    %33 = arith.cmpi slt, %5, %32 : vector<1x128xi32>
    %34 = arith.andi %31, %33 : vector<1x128xi1>
    %cst_13 = arith.constant 0.000000e+00 : f32
    %35 = vector.shape_cast %34 : vector<1x128xi1> to vector<1x128xi1>
    %36 = vector.broadcast %35 : vector<1x128xi1> to vector<8x128xi1>
    %37 = vector.broadcast %cst_13 : f32 to vector<8x128xf32>
    %38 = arith.select %36, %23, %37 : vector<8x128xi1>, vector<8x128xf32>
    %c7_i32 = arith.constant 7 : i32
    %39 = tpu.dynamic_rotate %6 by %c7_i32 dim 1 : vector<8x128xf32>, i32 -> vector<8x128xf32>
    %c1_i32_14 = arith.constant 1 : i32
    %40 = vector.broadcast %c1_i32_14 : i32 to vector<1x128xi32>
    %41 = arith.cmpi sge, %4, %40 : vector<1x128xi32>
    %c9_i32_15 = arith.constant 9 : i32
    %42 = vector.broadcast %c9_i32_15 : i32 to vector<1x128xi32>
    %43 = arith.cmpi slt, %4, %42 : vector<1x128xi32>
    %44 = arith.andi %41, %43 : vector<1x128xi1>
    %c-1_i32 = arith.constant -1 : i32
    %45 = vector.broadcast %c-1_i32 : i32 to vector<1x128xi32>
    %46 = arith.cmpi sge, %5, %45 : vector<1x128xi32>
    %47 = arith.andi %44, %46 : vector<1x128xi1>
    %c7_i32_16 = arith.constant 7 : i32
    %48 = vector.broadcast %c7_i32_16 : i32 to vector<1x128xi32>
    %49 = arith.cmpi slt, %5, %48 : vector<1x128xi32>
    %50 = arith.andi %47, %49 : vector<1x128xi1>
    %cst_17 = arith.constant 0.000000e+00 : f32
    %51 = vector.shape_cast %50 : vector<1x128xi1> to vector<1x128xi1>
    %52 = vector.broadcast %51 : vector<1x128xi1> to vector<8x128xi1>
    %53 = vector.broadcast %cst_17 : f32 to vector<8x128xf32>
    %54 = arith.select %52, %39, %53 : vector<8x128xi1>, vector<8x128xf32>
    %c1_i32_18 = arith.constant 1 : i32
    %55 = tpu.dynamic_rotate %6 by %c1_i32_18 dim 1 : vector<8x128xf32>, i32 -> vector<8x128xf32>
    %c0_i32_19 = arith.constant 0 : i32
    %56 = vector.broadcast %c0_i32_19 : i32 to vector<1x128xi32>
    %57 = arith.cmpi sge, %4, %56 : vector<1x128xi32>
    %c8_i32_20 = arith.constant 8 : i32
    %58 = vector.broadcast %c8_i32_20 : i32 to vector<1x128xi32>
    %59 = arith.cmpi slt, %4, %58 : vector<1x128xi32>
    %60 = arith.andi %57, %59 : vector<1x128xi1>
    %c1_i32_21 = arith.constant 1 : i32
    %61 = vector.broadcast %c1_i32_21 : i32 to vector<1x128xi32>
    %62 = arith.cmpi sge, %5, %61 : vector<1x128xi32>
    %63 = arith.andi %60, %62 : vector<1x128xi1>
    %c9_i32_22 = arith.constant 9 : i32
    %64 = vector.broadcast %c9_i32_22 : i32 to vector<1x128xi32>
    %65 = arith.cmpi slt, %5, %64 : vector<1x128xi32>
    %66 = arith.andi %63, %65 : vector<1x128xi1>
    %cst_23 = arith.constant 0.000000e+00 : f32
    %67 = vector.shape_cast %66 : vector<1x128xi1> to vector<1x128xi1>
    %68 = vector.broadcast %67 : vector<1x128xi1> to vector<8x128xi1>
    %69 = vector.broadcast %cst_23 : f32 to vector<8x128xf32>
    %70 = arith.select %68, %55, %69 : vector<8x128xi1>, vector<8x128xf32>
    %c0_i32_24 = arith.constant 0 : i32
    %71 = vector.broadcast %c0_i32_24 : i32 to vector<1x128xi32>
    %72 = arith.cmpi sge, %4, %71 : vector<1x128xi32>
    %c8_i32_25 = arith.constant 8 : i32
    %73 = vector.broadcast %c8_i32_25 : i32 to vector<1x128xi32>
    %74 = arith.cmpi slt, %4, %73 : vector<1x128xi32>
    %75 = arith.andi %72, %74 : vector<1x128xi1>
    %c0_i32_26 = arith.constant 0 : i32
    %76 = vector.broadcast %c0_i32_26 : i32 to vector<1x128xi32>
    %77 = arith.cmpi sge, %5, %76 : vector<1x128xi32>
    %78 = arith.andi %75, %77 : vector<1x128xi1>
    %c8_i32_27 = arith.constant 8 : i32
    %79 = vector.broadcast %c8_i32_27 : i32 to vector<1x128xi32>
    %80 = arith.cmpi slt, %5, %79 : vector<1x128xi32>
    %81 = arith.andi %78, %80 : vector<1x128xi1>
    %cst_28 = arith.constant 0.000000e+00 : f32
    %82 = vector.shape_cast %81 : vector<1x128xi1> to vector<1x128xi1>
    %83 = vector.broadcast %82 : vector<1x128xi1> to vector<8x128xi1>
    %84 = vector.broadcast %cst_28 : f32 to vector<8x128xf32>
    %85 = arith.select %83, %6, %84 : vector<8x128xi1>, vector<8x128xf32>
    %c127_i32 = arith.constant 127 : i32
    %86 = tpu.dynamic_rotate %6 by %c127_i32 dim 1 : vector<8x128xf32>, i32 -> vector<8x128xf32>
    %c0_i32_29 = arith.constant 0 : i32
    %87 = vector.broadcast %c0_i32_29 : i32 to vector<1x128xi32>
    %88 = arith.cmpi sge, %4, %87 : vector<1x128xi32>
    %c8_i32_30 = arith.constant 8 : i32
    %89 = vector.broadcast %c8_i32_30 : i32 to vector<1x128xi32>
    %90 = arith.cmpi slt, %4, %89 : vector<1x128xi32>
    %91 = arith.andi %88, %90 : vector<1x128xi1>
    %c-1_i32_31 = arith.constant -1 : i32
    %92 = vector.broadcast %c-1_i32_31 : i32 to vector<1x128xi32>
    %93 = arith.cmpi sge, %5, %92 : vector<1x128xi32>
    %94 = arith.andi %91, %93 : vector<1x128xi1>
    %c7_i32_32 = arith.constant 7 : i32
    %95 = vector.broadcast %c7_i32_32 : i32 to vector<1x128xi32>
    %96 = arith.cmpi slt, %5, %95 : vector<1x128xi32>
    %97 = arith.andi %94, %96 : vector<1x128xi1>
    %cst_33 = arith.constant 0.000000e+00 : f32
    %98 = vector.shape_cast %97 : vector<1x128xi1> to vector<1x128xi1>
    %99 = vector.broadcast %98 : vector<1x128xi1> to vector<8x128xi1>
    %100 = vector.broadcast %cst_33 : f32 to vector<8x128xf32>
    %101 = arith.select %99, %86, %100 : vector<8x128xi1>, vector<8x128xf32>
    %c121_i32 = arith.constant 121 : i32
    %102 = tpu.dynamic_rotate %6 by %c121_i32 dim 1 : vector<8x128xf32>, i32 -> vector<8x128xf32>
    %c-1_i32_34 = arith.constant -1 : i32
    %103 = vector.broadcast %c-1_i32_34 : i32 to vector<1x128xi32>
    %104 = arith.cmpi sge, %4, %103 : vector<1x128xi32>
    %c7_i32_35 = arith.constant 7 : i32
    %105 = vector.broadcast %c7_i32_35 : i32 to vector<1x128xi32>
    %106 = arith.cmpi slt, %4, %105 : vector<1x128xi32>
    %107 = arith.andi %104, %106 : vector<1x128xi1>
    %c1_i32_36 = arith.constant 1 : i32
    %108 = vector.broadcast %c1_i32_36 : i32 to vector<1x128xi32>
    %109 = arith.cmpi sge, %5, %108 : vector<1x128xi32>
    %110 = arith.andi %107, %109 : vector<1x128xi1>
    %c9_i32_37 = arith.constant 9 : i32
    %111 = vector.broadcast %c9_i32_37 : i32 to vector<1x128xi32>
    %112 = arith.cmpi slt, %5, %111 : vector<1x128xi32>
    %113 = arith.andi %110, %112 : vector<1x128xi1>
    %cst_38 = arith.constant 0.000000e+00 : f32
    %114 = vector.shape_cast %113 : vector<1x128xi1> to vector<1x128xi1>
    %115 = vector.broadcast %114 : vector<1x128xi1> to vector<8x128xi1>
    %116 = vector.broadcast %cst_38 : f32 to vector<8x128xf32>
    %117 = arith.select %115, %102, %116 : vector<8x128xi1>, vector<8x128xf32>
    %c120_i32 = arith.constant 120 : i32
    %118 = tpu.dynamic_rotate %6 by %c120_i32 dim 1 : vector<8x128xf32>, i32 -> vector<8x128xf32>
    %c-1_i32_39 = arith.constant -1 : i32
    %119 = vector.broadcast %c-1_i32_39 : i32 to vector<1x128xi32>
    %120 = arith.cmpi sge, %4, %119 : vector<1x128xi32>
    %c7_i32_40 = arith.constant 7 : i32
    %121 = vector.broadcast %c7_i32_40 : i32 to vector<1x128xi32>
    %122 = arith.cmpi slt, %4, %121 : vector<1x128xi32>
    %123 = arith.andi %120, %122 : vector<1x128xi1>
    %c0_i32_41 = arith.constant 0 : i32
    %124 = vector.broadcast %c0_i32_41 : i32 to vector<1x128xi32>
    %125 = arith.cmpi sge, %5, %124 : vector<1x128xi32>
    %126 = arith.andi %123, %125 : vector<1x128xi1>
    %c8_i32_42 = arith.constant 8 : i32
    %127 = vector.broadcast %c8_i32_42 : i32 to vector<1x128xi32>
    %128 = arith.cmpi slt, %5, %127 : vector<1x128xi32>
    %129 = arith.andi %126, %128 : vector<1x128xi1>
    %cst_43 = arith.constant 0.000000e+00 : f32
    %130 = vector.shape_cast %129 : vector<1x128xi1> to vector<1x128xi1>
    %131 = vector.broadcast %130 : vector<1x128xi1> to vector<8x128xi1>
    %132 = vector.broadcast %cst_43 : f32 to vector<8x128xf32>
    %133 = arith.select %131, %118, %132 : vector<8x128xi1>, vector<8x128xf32>
    %c119_i32 = arith.constant 119 : i32
    %134 = tpu.dynamic_rotate %6 by %c119_i32 dim 1 : vector<8x128xf32>, i32 -> vector<8x128xf32>
    %c-1_i32_44 = arith.constant -1 : i32
    %135 = vector.broadcast %c-1_i32_44 : i32 to vector<1x128xi32>
    %136 = arith.cmpi sge, %4, %135 : vector<1x128xi32>
    %c7_i32_45 = arith.constant 7 : i32
    %137 = vector.broadcast %c7_i32_45 : i32 to vector<1x128xi32>
    %138 = arith.cmpi slt, %4, %137 : vector<1x128xi32>
    %139 = arith.andi %136, %138 : vector<1x128xi1>
    %c-1_i32_46 = arith.constant -1 : i32
    %140 = vector.broadcast %c-1_i32_46 : i32 to vector<1x128xi32>
    %141 = arith.cmpi sge, %5, %140 : vector<1x128xi32>
    %142 = arith.andi %139, %141 : vector<1x128xi1>
    %c7_i32_47 = arith.constant 7 : i32
    %143 = vector.broadcast %c7_i32_47 : i32 to vector<1x128xi32>
    %144 = arith.cmpi slt, %5, %143 : vector<1x128xi32>
    %145 = arith.andi %142, %144 : vector<1x128xi1>
    %cst_48 = arith.constant 0.000000e+00 : f32
    %146 = vector.shape_cast %145 : vector<1x128xi1> to vector<1x128xi1>
    %147 = vector.broadcast %146 : vector<1x128xi1> to vector<8x128xi1>
    %148 = vector.broadcast %cst_48 : f32 to vector<8x128xf32>
    %149 = arith.select %147, %134, %148 : vector<8x128xi1>, vector<8x128xf32>
    %150 = tpu.concatenate %22, %38, %54, %70, %85, %101, %117, %133, %149 in 0 : vector<8x128xf32>, vector<8x128xf32>, vector<8x128xf32>, vector<8x128xf32>, vector<8x128xf32>, vector<8x128xf32>, vector<8x128xf32>, vector<8x128xf32>, vector<8x128xf32> -> vector<72x128xf32>
    %151 = arith.truncf %150 : vector<72x128xf32> to vector<72x128xbf16>
    %cst_49 = arith.constant dense<0.000000e+00> : vector<16x128xf32>
    %152 = tpu.matmul %2, %151, %cst_49 {dimension_numbers = #tpu.dot_dimension_numbers<[1], [0], [0], [1], [0, 0, 1, 1], [], []>} : vector<16x72xbf16>, vector<72x128xbf16>, vector<16x128xf32> -> vector<16x128xf32>
    %153 = vector.broadcast %3 : vector<16x1xf32> to vector<16x128xf32>
    %154 = arith.addf %152, %153 : vector<16x128xf32>
    %cst_50 = arith.constant dense<0.000000e+00> : vector<16xf32>
    %155 = vector.multi_reduction <add>, %154, %cst_50 [1] : vector<16x128xf32> to vector<16xf32>
    %156 = vector.shape_cast %155 : vector<16xf32> to vector<16x1xf32>
    %cst_51 = arith.constant 7.812500e-03 : f32
    %157 = vector.broadcast %cst_51 : f32 to vector<16x1xf32>
    %158 = arith.mulf %156, %157 : vector<16x1xf32>
    %159 = arith.mulf %154, %154 : vector<16x128xf32>
    %cst_52 = arith.constant dense<0.000000e+00> : vector<16xf32>
    %160 = vector.multi_reduction <add>, %159, %cst_52 [1] : vector<16x128xf32> to vector<16xf32>
    %161 = vector.shape_cast %160 : vector<16xf32> to vector<16x1xf32>
    %cst_53 = arith.constant 7.812500e-03 : f32
    %162 = vector.broadcast %cst_53 : f32 to vector<16x1xf32>
    %163 = arith.mulf %161, %162 : vector<16x1xf32>
    %164 = arith.mulf %158, %158 : vector<16x1xf32>
    %165 = arith.subf %163, %164 : vector<16x1xf32>
    %cst_54 = arith.constant 0.000000e+00 : f32
    %166 = vector.broadcast %cst_54 : f32 to vector<16x1xf32>
    %167 = arith.maximumf %165, %166 : vector<16x1xf32>
    %168 = vector.broadcast %158 : vector<16x1xf32> to vector<16x128xf32>
    %169 = arith.subf %154, %168 : vector<16x128xf32>
    %cst_55 = arith.constant 9.99999974E-6 : f32
    %170 = vector.broadcast %cst_55 : f32 to vector<16x1xf32>
    %171 = arith.addf %167, %170 : vector<16x1xf32>
    %172 = math.rsqrt %171 : vector<16x1xf32>
    %173 = vector.broadcast %172 : vector<16x1xf32> to vector<16x128xf32>
    %174 = arith.mulf %169, %173 : vector<16x128xf32>
    %cst_56 = arith.constant 0.000000e+00 : f32
    %175 = vector.broadcast %cst_56 : f32 to vector<16x128xf32>
    %176 = arith.cmpf oge, %174, %175 : vector<16x128xf32>
    %cst_57 = arith.constant 2.000000e-01 : f32
    %177 = vector.broadcast %cst_57 : f32 to vector<16x128xf32>
    %178 = arith.mulf %177, %174 : vector<16x128xf32>
    %179 = arith.select %176, %174, %178 : vector<16x128xi1>, vector<16x128xf32>
    %180 = arith.truncf %179 : vector<16x128xf32> to vector<16x128xbf16>
    %c0_58 = arith.constant 0 : index
    %c0_59 = arith.constant 0 : index
    %181 = vector.load %arg5[%c0_58, %c0_59] : memref<16x128xbf16, #tpu.memory_space<vmem>>, vector<16x128xbf16>
    tpu.vector_store %arg5[%c0_58, %c0_59], %180 {strides = array<i32>} : memref<16x128xbf16, #tpu.memory_space<vmem>>, vector<16x128xbf16>,
    return
  }
  func.func @transform_0(%arg0: i32) -> (i32, i32) {
    %c0_i32 = arith.constant 0 : i32
    %c0_i32_0 = arith.constant 0 : i32
    %c0_i32_1 = arith.constant 0 : i32
    return %c0_i32, %c0_i32_0 : i32, i32
  }
  func.func @transform_1(%arg0: i32) -> (i32, i32) {
    %c0_i32 = arith.constant 0 : i32
    %c0_i32_0 = arith.constant 0 : i32
    %c0_i32_1 = arith.constant 0 : i32
    return %c0_i32, %c0_i32_0 : i32, i32
  }
  func.func @transform_2(%arg0: i32) -> (i32, i32) {
    %c0_i32 = arith.constant 0 : i32
    %c0_i32_0 = arith.constant 0 : i32
    %c0_i32_1 = arith.constant 0 : i32
    return %c0_i32, %c0_i32_0 : i32, i32
  }
  func.func @transform_3(%arg0: i32) -> (i32, i32) {
    %c0_i32 = arith.constant 0 : i32
    %c0_i32_0 = arith.constant 0 : i32
    %c0_i32_1 = arith.constant 0 : i32
    return %c0_i32, %c0_i32_0 : i32, i32
  }
  func.func @transform_4(%arg0: i32) -> (i32, i32) {
    %c0_i32 = arith.constant 0 : i32
    %c0_i32_0 = arith.constant 0 : i32
    %c0_i32_1 = arith.constant 0 : i32
    return %c0_i32, %c0_i32_0 : i32, i32
  }
}

module attributes {stable_mosaic.version = 11 : i64} {
  func.func @kernel(%arg0: i32, %arg1: memref<24x512xbf16, #tpu.memory_space<vmem>>, %arg2: memref<2x512xi32, #tpu.memory_space<vmem>>, %arg3: memref<8x216xbf16, #tpu.memory_space<vmem>>, %arg4: memref<8x1xf32, #tpu.memory_space<vmem>>, %arg5: memref<4x8xbf16, #tpu.memory_space<vmem>>, %arg6: memref<4x1xf32, #tpu.memory_space<vmem>>, %arg7: memref<4x512xf32, #tpu.memory_space<vmem>>, %arg8: memref<4x512xf32, #tpu.memory_space<vmem>>) attributes {dimension_semantics = [#tpu.dimension_semantics<arbitrary>], iteration_bounds = array<i64: 1>, scalar_prefetch = 0 : i64, scratch_operands = 0 : i64, tpu.core_type = #tpu.core_type<tc>, window_params = [{pipeline_mode = #tpu.pipeline_mode<synchronous>, transform_indices = @transform_0, window_bounds = array<i64: 24, 512>}, {pipeline_mode = #tpu.pipeline_mode<synchronous>, transform_indices = @transform_1, window_bounds = array<i64: 2, 512>}, {pipeline_mode = #tpu.pipeline_mode<synchronous>, transform_indices = @transform_2, window_bounds = array<i64: 8, 216>}, {pipeline_mode = #tpu.pipeline_mode<synchronous>, transform_indices = @transform_3, window_bounds = array<i64: 8, 1>}, {pipeline_mode = #tpu.pipeline_mode<synchronous>, transform_indices = @transform_4, window_bounds = array<i64: 4, 8>}, {pipeline_mode = #tpu.pipeline_mode<synchronous>, transform_indices = @transform_5, window_bounds = array<i64: 4, 1>}, {pipeline_mode = #tpu.pipeline_mode<synchronous>, transform_indices = @transform_6, window_bounds = array<i64: 4, 512>}, {pipeline_mode = #tpu.pipeline_mode<synchronous>, transform_indices = @transform_7, window_bounds = array<i64: 4, 512>}]} {
    %c0 = arith.constant 0 : index
    %c0_0 = arith.constant 0 : index
    %0 = vector.load %arg1[%c0, %c0_0] : memref<24x512xbf16, #tpu.memory_space<vmem>>, vector<24x512xbf16>
    %c0_1 = arith.constant 0 : index
    %c0_2 = arith.constant 0 : index
    %1 = vector.load %arg2[%c0_1, %c0_2] : memref<2x512xi32, #tpu.memory_space<vmem>>, vector<2x512xi32>
    %c0_3 = arith.constant 0 : index
    %c0_4 = arith.constant 0 : index
    %2 = vector.load %arg3[%c0_3, %c0_4] : memref<8x216xbf16, #tpu.memory_space<vmem>>, vector<8x216xbf16>
    %c0_5 = arith.constant 0 : index
    %c0_6 = arith.constant 0 : index
    %3 = vector.load %arg4[%c0_5, %c0_6] : memref<8x1xf32, #tpu.memory_space<vmem>>, vector<8x1xf32>
    %4 = vector.extract_strided_slice %1 {offsets = [0, 0], sizes = [1, 512], strides = [1, 1]} : vector<2x512xi32> to vector<1x512xi32>
    %5 = vector.extract_strided_slice %1 {offsets = [1, 0], sizes = [1, 512], strides = [1, 1]} : vector<2x512xi32> to vector<1x512xi32>
    %6 = arith.extf %0 : vector<24x512xbf16> to vector<24x512xf32>
    %c17_i32 = arith.constant 17 : i32
    %7 = tpu.dynamic_rotate %6 by %c17_i32 dim 1 : vector<24x512xf32>, i32 -> vector<24x512xf32>
    %c1_i32 = arith.constant 1 : i32
    %8 = vector.broadcast %c1_i32 : i32 to vector<1x512xi32>
    %9 = arith.cmpi sge, %4, %8 : vector<1x512xi32>
    %c17_i32_7 = arith.constant 17 : i32
    %10 = vector.broadcast %c17_i32_7 : i32 to vector<1x512xi32>
    %11 = arith.cmpi slt, %4, %10 : vector<1x512xi32>
    %12 = arith.andi %9, %11 : vector<1x512xi1>
    %c1_i32_8 = arith.constant 1 : i32
    %13 = vector.broadcast %c1_i32_8 : i32 to vector<1x512xi32>
    %14 = arith.cmpi sge, %5, %13 : vector<1x512xi32>
    %15 = arith.andi %12, %14 : vector<1x512xi1>
    %c17_i32_9 = arith.constant 17 : i32
    %16 = vector.broadcast %c17_i32_9 : i32 to vector<1x512xi32>
    %17 = arith.cmpi slt, %5, %16 : vector<1x512xi32>
    %18 = arith.andi %15, %17 : vector<1x512xi1>
    %cst = arith.constant 0.000000e+00 : f32
    %19 = vector.shape_cast %18 : vector<1x512xi1> to vector<1x512xi1>
    %20 = vector.broadcast %19 : vector<1x512xi1> to vector<24x512xi1>
    %21 = vector.broadcast %cst : f32 to vector<24x512xf32>
    %22 = arith.select %20, %7, %21 : vector<24x512xi1>, vector<24x512xf32>
    %c16_i32 = arith.constant 16 : i32
    %23 = tpu.dynamic_rotate %6 by %c16_i32 dim 1 : vector<24x512xf32>, i32 -> vector<24x512xf32>
    %c1_i32_10 = arith.constant 1 : i32
    %24 = vector.broadcast %c1_i32_10 : i32 to vector<1x512xi32>
    %25 = arith.cmpi sge, %4, %24 : vector<1x512xi32>
    %c17_i32_11 = arith.constant 17 : i32
    %26 = vector.broadcast %c17_i32_11 : i32 to vector<1x512xi32>
    %27 = arith.cmpi slt, %4, %26 : vector<1x512xi32>
    %28 = arith.andi %25, %27 : vector<1x512xi1>
    %c0_i32 = arith.constant 0 : i32
    %29 = vector.broadcast %c0_i32 : i32 to vector<1x512xi32>
    %30 = arith.cmpi sge, %5, %29 : vector<1x512xi32>
    %31 = arith.andi %28, %30 : vector<1x512xi1>
    %c16_i32_12 = arith.constant 16 : i32
    %32 = vector.broadcast %c16_i32_12 : i32 to vector<1x512xi32>
    %33 = arith.cmpi slt, %5, %32 : vector<1x512xi32>
    %34 = arith.andi %31, %33 : vector<1x512xi1>
    %cst_13 = arith.constant 0.000000e+00 : f32
    %35 = vector.shape_cast %34 : vector<1x512xi1> to vector<1x512xi1>
    %36 = vector.broadcast %35 : vector<1x512xi1> to vector<24x512xi1>
    %37 = vector.broadcast %cst_13 : f32 to vector<24x512xf32>
    %38 = arith.select %36, %23, %37 : vector<24x512xi1>, vector<24x512xf32>
    %c15_i32 = arith.constant 15 : i32
    %39 = tpu.dynamic_rotate %6 by %c15_i32 dim 1 : vector<24x512xf32>, i32 -> vector<24x512xf32>
    %c1_i32_14 = arith.constant 1 : i32
    %40 = vector.broadcast %c1_i32_14 : i32 to vector<1x512xi32>
    %41 = arith.cmpi sge, %4, %40 : vector<1x512xi32>
    %c17_i32_15 = arith.constant 17 : i32
    %42 = vector.broadcast %c17_i32_15 : i32 to vector<1x512xi32>
    %43 = arith.cmpi slt, %4, %42 : vector<1x512xi32>
    %44 = arith.andi %41, %43 : vector<1x512xi1>
    %c-1_i32 = arith.constant -1 : i32
    %45 = vector.broadcast %c-1_i32 : i32 to vector<1x512xi32>
    %46 = arith.cmpi sge, %5, %45 : vector<1x512xi32>
    %47 = arith.andi %44, %46 : vector<1x512xi1>
    %c15_i32_16 = arith.constant 15 : i32
    %48 = vector.broadcast %c15_i32_16 : i32 to vector<1x512xi32>
    %49 = arith.cmpi slt, %5, %48 : vector<1x512xi32>
    %50 = arith.andi %47, %49 : vector<1x512xi1>
    %cst_17 = arith.constant 0.000000e+00 : f32
    %51 = vector.shape_cast %50 : vector<1x512xi1> to vector<1x512xi1>
    %52 = vector.broadcast %51 : vector<1x512xi1> to vector<24x512xi1>
    %53 = vector.broadcast %cst_17 : f32 to vector<24x512xf32>
    %54 = arith.select %52, %39, %53 : vector<24x512xi1>, vector<24x512xf32>
    %c1_i32_18 = arith.constant 1 : i32
    %55 = tpu.dynamic_rotate %6 by %c1_i32_18 dim 1 : vector<24x512xf32>, i32 -> vector<24x512xf32>
    %c0_i32_19 = arith.constant 0 : i32
    %56 = vector.broadcast %c0_i32_19 : i32 to vector<1x512xi32>
    %57 = arith.cmpi sge, %4, %56 : vector<1x512xi32>
    %c16_i32_20 = arith.constant 16 : i32
    %58 = vector.broadcast %c16_i32_20 : i32 to vector<1x512xi32>
    %59 = arith.cmpi slt, %4, %58 : vector<1x512xi32>
    %60 = arith.andi %57, %59 : vector<1x512xi1>
    %c1_i32_21 = arith.constant 1 : i32
    %61 = vector.broadcast %c1_i32_21 : i32 to vector<1x512xi32>
    %62 = arith.cmpi sge, %5, %61 : vector<1x512xi32>
    %63 = arith.andi %60, %62 : vector<1x512xi1>
    %c17_i32_22 = arith.constant 17 : i32
    %64 = vector.broadcast %c17_i32_22 : i32 to vector<1x512xi32>
    %65 = arith.cmpi slt, %5, %64 : vector<1x512xi32>
    %66 = arith.andi %63, %65 : vector<1x512xi1>
    %cst_23 = arith.constant 0.000000e+00 : f32
    %67 = vector.shape_cast %66 : vector<1x512xi1> to vector<1x512xi1>
    %68 = vector.broadcast %67 : vector<1x512xi1> to vector<24x512xi1>
    %69 = vector.broadcast %cst_23 : f32 to vector<24x512xf32>
    %70 = arith.select %68, %55, %69 : vector<24x512xi1>, vector<24x512xf32>
    %c0_i32_24 = arith.constant 0 : i32
    %71 = vector.broadcast %c0_i32_24 : i32 to vector<1x512xi32>
    %72 = arith.cmpi sge, %4, %71 : vector<1x512xi32>
    %c16_i32_25 = arith.constant 16 : i32
    %73 = vector.broadcast %c16_i32_25 : i32 to vector<1x512xi32>
    %74 = arith.cmpi slt, %4, %73 : vector<1x512xi32>
    %75 = arith.andi %72, %74 : vector<1x512xi1>
    %c0_i32_26 = arith.constant 0 : i32
    %76 = vector.broadcast %c0_i32_26 : i32 to vector<1x512xi32>
    %77 = arith.cmpi sge, %5, %76 : vector<1x512xi32>
    %78 = arith.andi %75, %77 : vector<1x512xi1>
    %c16_i32_27 = arith.constant 16 : i32
    %79 = vector.broadcast %c16_i32_27 : i32 to vector<1x512xi32>
    %80 = arith.cmpi slt, %5, %79 : vector<1x512xi32>
    %81 = arith.andi %78, %80 : vector<1x512xi1>
    %cst_28 = arith.constant 0.000000e+00 : f32
    %82 = vector.shape_cast %81 : vector<1x512xi1> to vector<1x512xi1>
    %83 = vector.broadcast %82 : vector<1x512xi1> to vector<24x512xi1>
    %84 = vector.broadcast %cst_28 : f32 to vector<24x512xf32>
    %85 = arith.select %83, %6, %84 : vector<24x512xi1>, vector<24x512xf32>
    %c511_i32 = arith.constant 511 : i32
    %86 = tpu.dynamic_rotate %6 by %c511_i32 dim 1 : vector<24x512xf32>, i32 -> vector<24x512xf32>
    %c0_i32_29 = arith.constant 0 : i32
    %87 = vector.broadcast %c0_i32_29 : i32 to vector<1x512xi32>
    %88 = arith.cmpi sge, %4, %87 : vector<1x512xi32>
    %c16_i32_30 = arith.constant 16 : i32
    %89 = vector.broadcast %c16_i32_30 : i32 to vector<1x512xi32>
    %90 = arith.cmpi slt, %4, %89 : vector<1x512xi32>
    %91 = arith.andi %88, %90 : vector<1x512xi1>
    %c-1_i32_31 = arith.constant -1 : i32
    %92 = vector.broadcast %c-1_i32_31 : i32 to vector<1x512xi32>
    %93 = arith.cmpi sge, %5, %92 : vector<1x512xi32>
    %94 = arith.andi %91, %93 : vector<1x512xi1>
    %c15_i32_32 = arith.constant 15 : i32
    %95 = vector.broadcast %c15_i32_32 : i32 to vector<1x512xi32>
    %96 = arith.cmpi slt, %5, %95 : vector<1x512xi32>
    %97 = arith.andi %94, %96 : vector<1x512xi1>
    %cst_33 = arith.constant 0.000000e+00 : f32
    %98 = vector.shape_cast %97 : vector<1x512xi1> to vector<1x512xi1>
    %99 = vector.broadcast %98 : vector<1x512xi1> to vector<24x512xi1>
    %100 = vector.broadcast %cst_33 : f32 to vector<24x512xf32>
    %101 = arith.select %99, %86, %100 : vector<24x512xi1>, vector<24x512xf32>
    %c497_i32 = arith.constant 497 : i32
    %102 = tpu.dynamic_rotate %6 by %c497_i32 dim 1 : vector<24x512xf32>, i32 -> vector<24x512xf32>
    %c-1_i32_34 = arith.constant -1 : i32
    %103 = vector.broadcast %c-1_i32_34 : i32 to vector<1x512xi32>
    %104 = arith.cmpi sge, %4, %103 : vector<1x512xi32>
    %c15_i32_35 = arith.constant 15 : i32
    %105 = vector.broadcast %c15_i32_35 : i32 to vector<1x512xi32>
    %106 = arith.cmpi slt, %4, %105 : vector<1x512xi32>
    %107 = arith.andi %104, %106 : vector<1x512xi1>
    %c1_i32_36 = arith.constant 1 : i32
    %108 = vector.broadcast %c1_i32_36 : i32 to vector<1x512xi32>
    %109 = arith.cmpi sge, %5, %108 : vector<1x512xi32>
    %110 = arith.andi %107, %109 : vector<1x512xi1>
    %c17_i32_37 = arith.constant 17 : i32
    %111 = vector.broadcast %c17_i32_37 : i32 to vector<1x512xi32>
    %112 = arith.cmpi slt, %5, %111 : vector<1x512xi32>
    %113 = arith.andi %110, %112 : vector<1x512xi1>
    %cst_38 = arith.constant 0.000000e+00 : f32
    %114 = vector.shape_cast %113 : vector<1x512xi1> to vector<1x512xi1>
    %115 = vector.broadcast %114 : vector<1x512xi1> to vector<24x512xi1>
    %116 = vector.broadcast %cst_38 : f32 to vector<24x512xf32>
    %117 = arith.select %115, %102, %116 : vector<24x512xi1>, vector<24x512xf32>
    %c496_i32 = arith.constant 496 : i32
    %118 = tpu.dynamic_rotate %6 by %c496_i32 dim 1 : vector<24x512xf32>, i32 -> vector<24x512xf32>
    %c-1_i32_39 = arith.constant -1 : i32
    %119 = vector.broadcast %c-1_i32_39 : i32 to vector<1x512xi32>
    %120 = arith.cmpi sge, %4, %119 : vector<1x512xi32>
    %c15_i32_40 = arith.constant 15 : i32
    %121 = vector.broadcast %c15_i32_40 : i32 to vector<1x512xi32>
    %122 = arith.cmpi slt, %4, %121 : vector<1x512xi32>
    %123 = arith.andi %120, %122 : vector<1x512xi1>
    %c0_i32_41 = arith.constant 0 : i32
    %124 = vector.broadcast %c0_i32_41 : i32 to vector<1x512xi32>
    %125 = arith.cmpi sge, %5, %124 : vector<1x512xi32>
    %126 = arith.andi %123, %125 : vector<1x512xi1>
    %c16_i32_42 = arith.constant 16 : i32
    %127 = vector.broadcast %c16_i32_42 : i32 to vector<1x512xi32>
    %128 = arith.cmpi slt, %5, %127 : vector<1x512xi32>
    %129 = arith.andi %126, %128 : vector<1x512xi1>
    %cst_43 = arith.constant 0.000000e+00 : f32
    %130 = vector.shape_cast %129 : vector<1x512xi1> to vector<1x512xi1>
    %131 = vector.broadcast %130 : vector<1x512xi1> to vector<24x512xi1>
    %132 = vector.broadcast %cst_43 : f32 to vector<24x512xf32>
    %133 = arith.select %131, %118, %132 : vector<24x512xi1>, vector<24x512xf32>
    %c495_i32 = arith.constant 495 : i32
    %134 = tpu.dynamic_rotate %6 by %c495_i32 dim 1 : vector<24x512xf32>, i32 -> vector<24x512xf32>
    %c-1_i32_44 = arith.constant -1 : i32
    %135 = vector.broadcast %c-1_i32_44 : i32 to vector<1x512xi32>
    %136 = arith.cmpi sge, %4, %135 : vector<1x512xi32>
    %c15_i32_45 = arith.constant 15 : i32
    %137 = vector.broadcast %c15_i32_45 : i32 to vector<1x512xi32>
    %138 = arith.cmpi slt, %4, %137 : vector<1x512xi32>
    %139 = arith.andi %136, %138 : vector<1x512xi1>
    %c-1_i32_46 = arith.constant -1 : i32
    %140 = vector.broadcast %c-1_i32_46 : i32 to vector<1x512xi32>
    %141 = arith.cmpi sge, %5, %140 : vector<1x512xi32>
    %142 = arith.andi %139, %141 : vector<1x512xi1>
    %c15_i32_47 = arith.constant 15 : i32
    %143 = vector.broadcast %c15_i32_47 : i32 to vector<1x512xi32>
    %144 = arith.cmpi slt, %5, %143 : vector<1x512xi32>
    %145 = arith.andi %142, %144 : vector<1x512xi1>
    %cst_48 = arith.constant 0.000000e+00 : f32
    %146 = vector.shape_cast %145 : vector<1x512xi1> to vector<1x512xi1>
    %147 = vector.broadcast %146 : vector<1x512xi1> to vector<24x512xi1>
    %148 = vector.broadcast %cst_48 : f32 to vector<24x512xf32>
    %149 = arith.select %147, %134, %148 : vector<24x512xi1>, vector<24x512xf32>
    %150 = tpu.concatenate %22, %38, %54, %70, %85, %101, %117, %133, %149 in 0 : vector<24x512xf32>, vector<24x512xf32>, vector<24x512xf32>, vector<24x512xf32>, vector<24x512xf32>, vector<24x512xf32>, vector<24x512xf32>, vector<24x512xf32>, vector<24x512xf32> -> vector<216x512xf32>
    %151 = arith.truncf %150 : vector<216x512xf32> to vector<216x512xbf16>
    %cst_49 = arith.constant dense<0.000000e+00> : vector<8x512xf32>
    %152 = tpu.matmul %2, %151, %cst_49 {dimension_numbers = #tpu.dot_dimension_numbers<[1], [0], [0], [1], [0, 0, 1, 1], [], []>} : vector<8x216xbf16>, vector<216x512xbf16>, vector<8x512xf32> -> vector<8x512xf32>
    %153 = vector.broadcast %3 : vector<8x1xf32> to vector<8x512xf32>
    %154 = arith.addf %152, %153 : vector<8x512xf32>
    %cst_50 = arith.constant dense<0.000000e+00> : vector<8xf32>
    %155 = vector.multi_reduction <add>, %154, %cst_50 [1] : vector<8x512xf32> to vector<8xf32>
    %156 = vector.shape_cast %155 : vector<8xf32> to vector<8x1xf32>
    %cst_51 = arith.constant 0.001953125 : f32
    %157 = vector.broadcast %cst_51 : f32 to vector<8x1xf32>
    %158 = arith.mulf %156, %157 : vector<8x1xf32>
    %159 = arith.mulf %154, %154 : vector<8x512xf32>
    %cst_52 = arith.constant dense<0.000000e+00> : vector<8xf32>
    %160 = vector.multi_reduction <add>, %159, %cst_52 [1] : vector<8x512xf32> to vector<8xf32>
    %161 = vector.shape_cast %160 : vector<8xf32> to vector<8x1xf32>
    %cst_53 = arith.constant 0.001953125 : f32
    %162 = vector.broadcast %cst_53 : f32 to vector<8x1xf32>
    %163 = arith.mulf %161, %162 : vector<8x1xf32>
    %164 = arith.mulf %158, %158 : vector<8x1xf32>
    %165 = arith.subf %163, %164 : vector<8x1xf32>
    %cst_54 = arith.constant 0.000000e+00 : f32
    %166 = vector.broadcast %cst_54 : f32 to vector<8x1xf32>
    %167 = arith.maximumf %165, %166 : vector<8x1xf32>
    %168 = vector.broadcast %158 : vector<8x1xf32> to vector<8x512xf32>
    %169 = arith.subf %154, %168 : vector<8x512xf32>
    %cst_55 = arith.constant 9.99999974E-6 : f32
    %170 = vector.broadcast %cst_55 : f32 to vector<8x1xf32>
    %171 = arith.addf %167, %170 : vector<8x1xf32>
    %172 = math.rsqrt %171 : vector<8x1xf32>
    %173 = vector.broadcast %172 : vector<8x1xf32> to vector<8x512xf32>
    %174 = arith.mulf %169, %173 : vector<8x512xf32>
    %cst_56 = arith.constant 0.000000e+00 : f32
    %175 = vector.broadcast %cst_56 : f32 to vector<8x512xf32>
    %176 = arith.cmpf oge, %174, %175 : vector<8x512xf32>
    %cst_57 = arith.constant 2.000000e-01 : f32
    %177 = vector.broadcast %cst_57 : f32 to vector<8x512xf32>
    %178 = arith.mulf %177, %174 : vector<8x512xf32>
    %179 = arith.select %176, %174, %178 : vector<8x512xi1>, vector<8x512xf32>
    %c0_58 = arith.constant 0 : index
    %c0_59 = arith.constant 0 : index
    %180 = vector.load %arg5[%c0_58, %c0_59] : memref<4x8xbf16, #tpu.memory_space<vmem>>, vector<4x8xbf16>
    %181 = arith.truncf %179 : vector<8x512xf32> to vector<8x512xbf16>
    %cst_60 = arith.constant dense<0.000000e+00> : vector<4x512xf32>
    %182 = tpu.matmul %180, %181, %cst_60 {dimension_numbers = #tpu.dot_dimension_numbers<[1], [0], [0], [1], [0, 0, 1, 1], [], []>} : vector<4x8xbf16>, vector<8x512xbf16>, vector<4x512xf32> -> vector<4x512xf32>
    %c0_61 = arith.constant 0 : index
    %c0_62 = arith.constant 0 : index
    %183 = vector.load %arg7[%c0_61, %c0_62] : memref<4x512xf32, #tpu.memory_space<vmem>>, vector<4x512xf32>
    %184 = arith.addf %183, %182 : vector<4x512xf32>
    %c0_63 = arith.constant 0 : index
    %c0_64 = arith.constant 0 : index
    %185 = vector.load %arg6[%c0_63, %c0_64] : memref<4x1xf32, #tpu.memory_space<vmem>>, vector<4x1xf32>
    %186 = vector.broadcast %185 : vector<4x1xf32> to vector<4x512xf32>
    %187 = arith.addf %184, %186 : vector<4x512xf32>
    %c0_65 = arith.constant 0 : index
    %c0_66 = arith.constant 0 : index
    %188 = vector.load %arg8[%c0_65, %c0_66] : memref<4x512xf32, #tpu.memory_space<vmem>>, vector<4x512xf32>
    tpu.vector_store %arg8[%c0_65, %c0_66], %187 {strides = array<i32>} : memref<4x512xf32, #tpu.memory_space<vmem>>, vector<4x512xf32>,
    return
  }
  func.func @transform_0(%arg0: i32) -> (i32, i32) {
    %c0_i32 = arith.constant 0 : i32
    %c0_i32_0 = arith.constant 0 : i32
    %c0_i32_1 = arith.constant 0 : i32
    return %c0_i32, %c0_i32_0 : i32, i32
  }
  func.func @transform_1(%arg0: i32) -> (i32, i32) {
    %c0_i32 = arith.constant 0 : i32
    %c0_i32_0 = arith.constant 0 : i32
    %c0_i32_1 = arith.constant 0 : i32
    return %c0_i32, %c0_i32_0 : i32, i32
  }
  func.func @transform_2(%arg0: i32) -> (i32, i32) {
    %c0_i32 = arith.constant 0 : i32
    %c0_i32_0 = arith.constant 0 : i32
    %c0_i32_1 = arith.constant 0 : i32
    return %c0_i32, %c0_i32_0 : i32, i32
  }
  func.func @transform_3(%arg0: i32) -> (i32, i32) {
    %c0_i32 = arith.constant 0 : i32
    %c0_i32_0 = arith.constant 0 : i32
    %c0_i32_1 = arith.constant 0 : i32
    return %c0_i32, %c0_i32_0 : i32, i32
  }
  func.func @transform_4(%arg0: i32) -> (i32, i32) {
    %c0_i32 = arith.constant 0 : i32
    %c0_i32_0 = arith.constant 0 : i32
    %c0_i32_1 = arith.constant 0 : i32
    return %c0_i32, %c0_i32_0 : i32, i32
  }
  func.func @transform_5(%arg0: i32) -> (i32, i32) {
    %c0_i32 = arith.constant 0 : i32
    %c0_i32_0 = arith.constant 0 : i32
    %c0_i32_1 = arith.constant 0 : i32
    return %c0_i32, %c0_i32_0 : i32, i32
  }
  func.func @transform_6(%arg0: i32) -> (i32, i32) {
    %c0_i32 = arith.constant 0 : i32
    %c0_i32_0 = arith.constant 0 : i32
    %c0_i32_1 = arith.constant 0 : i32
    return %c0_i32, %c0_i32_0 : i32, i32
  }
  func.func @transform_7(%arg0: i32) -> (i32, i32) {
    %c0_i32 = arith.constant 0 : i32
    %c0_i32_0 = arith.constant 0 : i32
    %c0_i32_1 = arith.constant 0 : i32
    return %c0_i32, %c0_i32_0 : i32, i32
  }
}

module attributes {stable_mosaic.version = 11 : i64} {
  func.func @_sigmoid_kernel(%arg0: i32, %arg1: memref<2x512xf32, #tpu.memory_space<vmem>>, %arg2: memref<2x512xf32, #tpu.memory_space<vmem>>) attributes {dimension_semantics = [#tpu.dimension_semantics<arbitrary>], iteration_bounds = array<i64: 1>, scalar_prefetch = 0 : i64, scratch_operands = 0 : i64, tpu.core_type = #tpu.core_type<tc>, window_params = [{pipeline_mode = #tpu.pipeline_mode<synchronous>, transform_indices = @transform_0, window_bounds = array<i64: 2, 512>}, {pipeline_mode = #tpu.pipeline_mode<synchronous>, transform_indices = @transform_1, window_bounds = array<i64: 2, 512>}]} {
    %c0 = arith.constant 0 : index
    %c0_0 = arith.constant 0 : index
    %0 = vector.load %arg1[%c0, %c0_0] : memref<2x512xf32, #tpu.memory_space<vmem>>, vector<2x512xf32>
    %cst = arith.constant 0.000000e+00 : f32
    %1 = vector.broadcast %cst : f32 to vector<2x512xf32>
    %2 = arith.maximumf %0, %1 : vector<2x512xf32>
    %3 = arith.subf %0, %2 : vector<2x512xf32>
    %4 = math.exp %3 : vector<2x512xf32>
    %cst_1 = arith.constant 0.000000e+00 : f32
    %5 = vector.broadcast %cst_1 : f32 to vector<2x512xf32>
    %6 = arith.subf %5, %2 : vector<2x512xf32>
    %7 = math.exp %6 : vector<2x512xf32>
    %8 = arith.addf %4, %7 : vector<2x512xf32>
    %9 = arith.divf %4, %8 : vector<2x512xf32>
    %c0_2 = arith.constant 0 : index
    %c0_3 = arith.constant 0 : index
    %10 = vector.load %arg2[%c0_2, %c0_3] : memref<2x512xf32, #tpu.memory_space<vmem>>, vector<2x512xf32>
    tpu.vector_store %arg2[%c0_2, %c0_3], %9 {strides = array<i32>} : memref<2x512xf32, #tpu.memory_space<vmem>>, vector<2x512xf32>,
    return
  }
  func.func @transform_0(%arg0: i32) -> (i32, i32) {
    %c0_i32 = arith.constant 0 : i32
    %c0_i32_0 = arith.constant 0 : i32
    %c0_i32_1 = arith.constant 0 : i32
    return %c0_i32, %c0_i32_0 : i32, i32
  }
  func.func @transform_1(%arg0: i32) -> (i32, i32) {
    %c0_i32 = arith.constant 0 : i32
    %c0_i32_0 = arith.constant 0 : i32
    %c0_i32_1 = arith.constant 0 : i32
    return %c0_i32, %c0_i32_0 : i32, i32
  }
}

</mosaic_0001>

<bundles_post_ra>
// kernel: segmorph_runet_forward.21
= control target key start
LH: loop header
LB: loop body
LE: loop exit
PB: predicated region body
PF: predicated region fallthrough
CT: control target
= control target key end

     0   :  { %s640_s19 = smov 113   ;;  %s641_s20 = smov 111   ;;  %v648_v11 = vmov 0   ;;  %v35_v33 = vlaneseq  ;;  %s1231_s0 = inlined_call_operand.vmem [shape: bf16[8,512], index: 0, kind: input, shape index: {}]   ;;  %s1232_s1 = inlined_call_operand.vmem [shape: s32[2,512], index: 1, kind: input, shape index: {}]   ;;  %s1233_s3 = inlined_call_operand.vmem [shape: f32[8,1], index: 3, kind: input, shape index: {}]   ;;  %s1234_s2 = inlined_call_operand.vmem [shape: bf16[8,72], index: 2, kind: input, shape index: {}]   ;;  %s1235_s4 = inlined_call_operand.vmem [shape: bf16[8,512], index: 4, kind: output, shape index: {}]  }
   0x1   :  { %v19_v0 = vld [vmem:[%s1231_s0 + $0x8] sm:$0xff]  ;;  %v18_v1 = vld [vmem:[%s1231_s0] sm:$0xff]  ;;  %s642_s0 = smov 112   ;;  %s643_s21 = smov 127   ;;  %636 = vset.pattern.permute.xlu1 %v648_v11  ;;  %637 = vset.pattern.permute.xlu0 %v648_v11 }
   0x2   :  { %v680_v2 = vunpack.c.l.bf16 %v19_v0  ;;  %v682_v3 = vunpack.c.h.bf16 %v19_v0  ;;  %v684_v4 = vunpack.c.l.bf16 %v18_v1  ;;  %v686_v5 = vunpack.c.h.bf16 %v18_v1  ;;  %s644_s22 = smov 15   ;;  %s645_s23 = smov 1   ;;  %v20_v10 = vld [vmem:[%s1232_s1] sm:$0xff] }
   0x3   :  { %s646_s24 = smov 16   ;;  %s647_s25 = smov 17   ;;  %vm127_vm0 = vcmp.ge.s32.totalorder %v20_v10, 4294967295  ;;  %vm133_vm1 = vcmp.lt.s32.totalorder %v20_v10, 15  ;;  %vm1236_vm2 = vcmp.ge.s32.totalorder %v20_v10, 1  ;;  %vm85_vm3 = vcmp.ge.s32.totalorder %v20_v10, 0 }
   0x4   :  { %v566_v6 = vpack.i.bf16 %v682_v3, %v680_v2  ;;  %v576_v7 = vpack.i.bf16 %v686_v5, %v684_v4  ;;  %v596_v8 = vpack.i.bf16 %v680_v2, %v686_v5  ;;  %v606_v9 = vpack.i.bf16 %v684_v4, %v682_v3  ;;  %vm711_vm7 = vmand %vm127_vm0, %vm133_vm1 }
   0x5   :  { %v128_v12 = vsel %vm127_vm0, 1, %v648_v11  ;;  %v134_v14 = vsel %vm133_vm1, 1, %v648_v11  ;;  %vm43_vm4 = vcmp.lt.s32.totalorder %v20_v10, 17  ;;  %v45_v15 = vsel %vm1236_vm2, 1, %v648_v11 }
   0x6   :  { %567 = vrot.lane.b32.xlu1 %v566_v6, %s640_s19  ;;  %557 = vrot.lane.b32.xlu0 %v566_v6, %s641_s20  ;;  %v493_v13 = vrot.slane %v128_v12, 9  ;;  %v86_v16 = vsel %vm85_vm3, 1, %v648_v11  ;;  %vm91_vm5 = vcmp.lt.s32.totalorder %v20_v10, 16  ;;  %v494_v17 = vrot.slane %v134_v14, 9 }
   0x7   :  { %577 = vrot.lane.b32.xlu2 %v576_v7, %s640_s19  ;;  %v489_v20 = vrot.slane %v45_v15, 9  ;;  %v50_v21 = vsel %vm43_vm4, 1, %v648_v11  ;;  %v491_v22 = vrot.slane %v86_v16, 9  ;;  %v92_v23 = vsel %vm91_vm5, 1, %v648_v11  ;;  %vm762_vm2 = vmand %vm85_vm3, %vm91_vm5 }
   0x8   :  { %vm707_vm6 = vcmp.ne.s32.totalorder %v493_v13, 0  ;;  %vm719_vm8 = vcmp.ne.s32.totalorder %v494_v17, 0  ;;  %v490_v25 = vrot.slane %v50_v21, 9  ;;  %v492_v27 = vrot.slane %v92_v23, 9 }
   0x9   :  { %vm318_vm9 = vmand %vm711_vm7, %vm707_vm6  ;;  %vm727_vm10 = vcmp.ne.s32.totalorder %v489_v20, 0  ;;  %vm731_vm11 = vcmp.ne.s32.totalorder %v491_v22, 0  ;;  %v768_v38 = vand.u32 127, %v35_v33 }
   0xa   :  { %vm319_vm12 = vmand %vm318_vm9, %vm719_vm8  ;;  %vm737_vm13 = vcmp.ne.s32.totalorder %v490_v25, 0  ;;  %vm745_vm15 = vcmp.ne.s32.totalorder %v492_v27, 0 }
   0xb   :  { %vm254_vm14 = vmand %vm711_vm7, %vm727_vm10  ;;  %v320_v32 = vsel %vm319_vm12, 1, %v648_v11  ;;  %vm313_vm5 = vcmp.lt.s32.totalorder %v768_v38, 111 }
   0xc   :  { %vm286_vm0 = vmand %vm711_vm7, %vm731_vm11  ;;  %v323_v34 = vperm.slane %v320_v32, 4  ;;  %v321_v44 = vperm.slane %v320_v32, 0  ;;  %v322_v45 = vperm.slane %v320_v32, 2  ;;  %v324_v46 = vperm.slane %v320_v32, 6 }
   0xd   :  { %vm255_vm1 = vmand %vm254_vm14, %vm737_vm13 }
   0xe   :  { %572 = vrot.lane.b32.xlu1 %v566_v6, %s642_s0  ;;  %562 = vrot.lane.b32.xlu0 %v576_v7, %s641_s20  ;;  %vm287_vm9 = vmand %vm286_vm0, %vm745_vm15  ;;  %v256_v36 = vsel %vm255_vm1, 1, %v648_v11  ;;  %v770_v39 = vperm.slane %v323_v34, 0  ;;  %vm1238_vm0 = vcmp.lt.s32.totalorder %v768_v38, 113  ;;  %v815_v60 = vperm.slane %v321_v44, 0 }
   0xf   :  { %582 = vrot.lane.b32.xlu2 %v576_v7, %s642_s0  ;;  %v288_v37 = vsel %vm287_vm9, 1, %v648_v11  ;;  %vm189_vm7 = vmand %vm762_vm2, %vm731_vm11  ;;  %v259_v40 = vperm.slane %v256_v36, 4  ;;  %vm1237_vm9 = vcmp.lt.s32.totalorder %v768_v38, 112  ;;  %v257_v50 = vperm.slane %v256_v36, 0 }
  0x10   :  { %v291_v41 = vperm.slane %v288_v37, 4  ;;  %vm221_vm3 = vmand %vm762_vm2, %vm707_vm6  ;;  %v289_v54 = vperm.slane %v288_v37, 0  ;;  %v258_v55 = vperm.slane %v256_v36, 2  ;;  %v290_v58 = vperm.slane %v288_v37, 2 }
  0x11   :  { %vm785_vm12 = vmand %vm189_vm7, %vm745_vm15  ;;  %v797_v48 = vperm.slane %v259_v40, 0  ;;  %vm1260_vm7 = vcmp.ge.s32.totalorder %v20_v10, 1  ;;  %v817_v61 = vperm.slane %v322_v45, 0  ;;  %v819_v62 = vperm.slane %v324_v46, 0 }
  0x12   :  { %vm793_vm1 = vmand %vm221_vm3, %vm719_vm8  ;;  %v800_v49 = vperm.slane %v291_v41, 0  ;;  %vm1239_vm3 = vcmask 1043456   ;;  %v191_v59 = vsel %vm785_vm12, 1, %v648_v11  ;;  %v836_v1 = vperm.slane %v257_v50, 0 }
  0x13   :  { %vm804_vm14 = vmand %vm1260_vm7, %vm43_vm4  ;;  %v223_v63 = vsel %vm793_vm1, 1, %v648_v11  ;;  %v850_v10 = vperm.slane %v258_v55, 0  ;;  %v194_v12 = vperm.slane %v191_v59, 4  ;;  %v860_v15 = vperm.slane %v290_v58, 0 }
  0x14   :  { %vm132_vm4 = vmand %vm804_vm14, %vm707_vm6  ;;  %v226_v16 = vperm.slane %v223_v63, 4  ;;  %v193_v17 = vperm.slane %v191_v59, 2  ;;  %v195_v19 = vperm.slane %v191_v59, 6  ;;  %vm329_vm1 = vcmp.eq.s32.totalorder %v815_v60, 1 }
  0x15   :  { %vm170_vm7 = vmand %vm762_vm2, %vm727_vm10  ;;  %v225_v23 = vperm.slane %v223_v63, 2  ;;  %v192_v24 = vperm.slane %v191_v59, 0  ;;  %v224_v32 = vperm.slane %v223_v63, 0  ;;  %v897_v34 = vperm.slane %v194_v12, 0 }
  0x16   :  { %592 = vrot.lane.b32.xlu1 %v576_v7, %s643_s21  ;;  %587 = vrot.lane.b32.xlu0 %v566_v6, %s643_s21  ;;  %v260_v6 = vperm.slane %v256_v36, 6  ;;  %v292_v7 = vperm.slane %v288_v37, 6  ;;  %vm171_vm6 = vmand %vm170_vm7, %vm737_vm13  ;;  %v227_v36 = vperm.slane %v223_v63, 6  ;;  %v906_v40 = vperm.slane %v226_v16, 0 }
  0x17   :  { %597 = vrot.lane.b32.xlu2 %v596_v8, %s644_s22  ;;  %v908_v41 = vperm.slane %v193_v17, 0  ;;  %v910_v43 = vperm.slane %v195_v19, 0  ;;  %v914_v45 = vperm.slane %v225_v23, 0  ;;  %v916_v46 = vperm.slane %v192_v24, 0 }
  0x18   :  { %v880_v25 = vperm.slane %v260_v6, 0  ;;  %v882_v27 = vperm.slane %v292_v7, 0  ;;  %v919_v47 = vsel %vm171_vm6, 1, %v648_v11  ;;  %v927_v55 = vperm.slane %v224_v32, 0 }
  0x19   :  { %v935_v7 = vperm.slane %v227_v36, 0  ;;  %v174_v16 = vperm.slane %v919_v47, 2  ;;  %v175_v19 = vperm.slane %v919_v47, 4  ;;  %vm233_vm6 = vcmp.eq.s32.totalorder %v914_v45, 1 }
  0x1a   :  { %vm1266_vm7 = vcmp.lt.s32.totalorder %v768_v38, 113  ;;  %vm1272_vm12 = vcmp.eq.s32.totalorder %v817_v61, 1 }
  0x1b   :  { %v990_v63 = vperm.slane %v174_v16, 0 }
  0x1e   :  { %607 = vrot.lane.b32.xlu1 %v606_v9, %s644_s22  ;;  %602 = vrot.lane.b32.xlu0 %v596_v8, %s645_s23 }
  0x1f   :  { %612 = vrot.lane.b32.xlu2 %v606_v9, %s645_s23 }
  0x26   :  { %622 = vrot.lane.b32.xlu1 %v596_v8, %s646_s24  ;;  %617 = vrot.lane.b32.xlu0 %v596_v8, %s647_s25 }
  0x27   :  { %627 = vrot.lane.b32.xlu2 %v606_v9, %s647_s25 }
  0x2e   :  { %632 = vrot.lane.b32.xlu0 %v606_v9, %s646_s24  ;;  %v848_v9 = vperm.slane %v289_v54, 0 }
  0x61   :  { %v753_v31 = vpop.permute.xlu2 %577 }
  0x62   :  { %v580_v56 = vunpack.i.h.bf16 %v753_v31  ;;  %v579_v57 = vunpack.i.l.bf16 %v753_v31 }
  0x64   :  { %v834_v0 = vsel %vm1238_vm0, %v579_v57, %v580_v56  ;;  %vm1273_vm0 = vcmp.eq.s32.totalorder %v819_v62, 1 }
  0x69   :  { %v781_v42 = vpop.permute.xlu2 %582 }
  0x6a   :  { %v585_v52 = vunpack.i.h.bf16 %v781_v42  ;;  %v584_v53 = vunpack.i.l.bf16 %v781_v42 }
  0x6c   :  { %v846_v8 = vsel %vm1237_vm9, %v584_v53, %v585_v52  ;;  %vm869_vm9 = vmand %vm132_vm4, %vm719_vm8  ;;  %vm1265_vm8 = vcmp.eq.s32.totalorder %v770_v39, 1  ;;  %vm1268_vm4 = vcmp.eq.s32.totalorder %v800_v49, 1 }
  0x6d   :  { %v496_v18 = vpack.c.bf16 %v846_v8, %v834_v0  ;;  %v902_v37 = vsel %vm869_vm9, 1, %v648_v11  ;;  %vm1267_vm9 = vcmp.eq.s32.totalorder %v797_v48, 1 }
  0x6e   :  { %v141_v58 = vperm.slane %v902_v37, 2  ;;  %v142_v17 = vperm.slane %v902_v37, 4  ;;  %vm951_vm2 = vmpackc.low %vm1268_vm4, %vm1267_vm9  ;;  %vm203_vm4 = vcmp.eq.s32.totalorder %v910_v43, 1  ;;  %vm1281_vm9 = vcmp.lt.s32.totalorder %v768_v38, 112 }
  0x6f   :  { %v140_v51 = vperm.slane %v902_v37, 0 }
  0x70   :  { %v1002_v62 = vperm.slane %v142_v17, 0  ;;  %v173_v17 = vperm.slane %v919_v47, 0 }
  0x71   :  { %v923_v54 = vpop.permute.xlu2 %597 }
  0x78   :  { %v856_v13 = vpop.permute.xlu1 %567  ;;  %v858_v14 = vpop.permute.xlu0 %557 }
  0x79   :  { %v560_v21 = vunpack.i.h.bf16 %v858_v14  ;;  %v559_v22 = vunpack.i.l.bf16 %v858_v14  ;;  %v570_v39 = vunpack.i.h.bf16 %v856_v13  ;;  %v569_v50 = vunpack.i.l.bf16 %v856_v13 }
  0x7b   :  { %v314_v33 = vsel %vm313_vm5, %v559_v22, %v560_v21 }
  0x7c   :  { %v335_v35 = vsel %vm1265_vm8, %v314_v33, 0.0  ;;  %vm201_vm8 = vcmp.eq.s32.totalorder %v908_v41, 1  ;;  %v249_v33 = vsel %vm1266_vm7, %v569_v50, %v570_v39  ;;  %vm1271_vm7 = vcmp.lt.s32.totalorder %v768_v38, 112 }
  0x7d   :  { %v355_v44 = vpack.c.bf16 %v335_v35, %v335_v35  ;;  %v958_v35 = vperm.slane %v141_v58, 0  ;;  %v1309_v41 = vunpack.i.l.bf16 %v923_v54 }
  0x7f   :  { %v374_v59 = vsel %vm1239_vm3, %v355_v44, 0  ;;  %vm200_vm3 = vcmp.eq.s32.totalorder %v916_v46, 1  ;;  %v143_v44 = vperm.slane %v902_v37, 6  ;;  %v613_v37 = vpop.permute.xlu2 %612 }
  0x80   :  { %v573_v12 = vpop.permute.xlu1 %572  ;;  %408 = vmatpush.bf16.msra.mxu2 %v374_v59  ;;  %v563_v13 = vpop.permute.xlu0 %562  ;;  %v176_v59 = vperm.slane %v919_v47, 6  ;;  %v615_v0 = vunpack.i.h.bf16 %v613_v37 }
  0x81   :  { %v575_v20 = vunpack.i.h.bf16 %v573_v12  ;;  %v574_v23 = vunpack.i.l.bf16 %v573_v12  ;;  %v565_v24 = vunpack.i.h.bf16 %v563_v13  ;;  %v564_v32 = vunpack.i.l.bf16 %v563_v13 }
  0x82   :  { %v1048_v30 = vperm.slane %v143_v44, 0  ;;  %v180_v47 = vperm.slane %v176_v59, 0  ;;  %v144_v59 = vperm.slane %v140_v51, 0 }
  0x83   :  { %v282_v48 = vsel %vm1271_vm7, %v574_v23, %v575_v20  ;;  %v316_v49 = vsel %vm313_vm5, %v564_v32, %v565_v24  ;;  %v315_v12 = vsel %vm313_vm5, %v565_v24, %v559_v22  ;;  %v317_v58 = vsel %vm313_vm5, %v560_v21, %v564_v32  ;;  %vm49_vm7 = vmand %vm804_vm14, %vm727_vm10 }
  0x84   :  { %v522_v13 = vpack.c.bf16 %v282_v48, %v249_v33  ;;  %v333_v6 = vsel %vm329_vm1, %v316_v49, 0.0  ;;  %v334_v22 = vsel %vm1272_vm12, %v315_v12, 0.0  ;;  %v336_v14 = vsel %vm1273_vm0, %v317_v58, 0.0  ;;  %vm90_vm5 = vmand %vm804_vm14, %vm731_vm11 }
  0x85   :  { %v353_v21 = vpack.c.bf16 %v333_v6, %v333_v6  ;;  %v354_v24 = vpack.c.bf16 %v334_v22, %v334_v22  ;;  %v356_v32 = vpack.c.bf16 %v336_v14, %v336_v14  ;;  %vm1274_vm12 = vcmp.lt.s32.totalorder %v768_v38, 113  ;;  %vm1013_vm1 = vmand %vm49_vm7, %vm737_vm13 }
  0x86   :  { %523 = vmatpush.bf16.msk.msra.mxu2 %vm951_vm2, %v522_v13  ;;  %v250_v60 = vsel %vm1274_vm12, %v580_v56, %v569_v50  ;;  %vm1275_vm0 = vmmov %vm1274_vm12  ;;  %v1004_v6 = vperm.slane %v175_v19, 0  ;;  %vm1278_vm2 = vcmask 1043456   ;;  %v283_v29 = vsel %vm1281_vm9, %v585_v52, %v574_v23 }
  0x87   :  { %v252_v61 = vsel %vm1275_vm0, %v570_v39, %v579_v57  ;;  %v368_v31 = vsel %vm1278_vm2, %v353_v21, 0  ;;  %vm1279_vm12 = vmmov %vm1278_vm2  ;;  %vm1284_vm13 = vcmp.eq.s32.totalorder %v836_v1, 1  ;;  %vm1285_vm7 = vcmp.eq.s32.totalorder %v848_v9, 1 }
  0x88   :  { %v371_v56 = vsel %vm1279_vm12, %v354_v24, 0  ;;  %vm1280_vm0 = vmmov %vm1278_vm2  ;;  %v593_v39 = vpop.permute.xlu1 %592  ;;  %v588_v50 = vpop.permute.xlu0 %587  ;;  %382 = vmatpush.bf16.msra.mxu0 %v368_v31  ;;  %vm1288_vm11 = vcmp.lt.s32.totalorder %v768_v38, 112  ;;  %vm1289_vm14 = vcmp.eq.s32.totalorder %v850_v10, 1  ;;  %v509_v42 = vpack.c.bf16 %v283_v29, %v250_v60 }
  0x89   :  { %v377_v57 = vsel %vm1280_vm0, %v356_v32, 0  ;;  %vm1031_vm10 = vmand %vm90_vm5, %vm745_vm15  ;;  %395 = vmatpush.bf16.msra.mxu1 %v371_v56  ;;  %v285_v28 = vsel %vm1288_vm11, %v575_v20, %v584_v53  ;;  %vm164_vm15 = vcmp.lt.s32.totalorder %v768_v38, 1  ;;  %v595_v1 = vunpack.i.h.bf16 %v593_v39  ;;  %v628_v53 = vpop.permute.xlu2 %627 }
  0x8a   :  { %vm1039_vm9 = vmpackc.low %vm1285_vm7, %vm1284_vm13  ;;  %v594_v19 = vunpack.i.l.bf16 %v593_v39  ;;  %v590_v9 = vunpack.i.h.bf16 %v588_v50  ;;  %v589_v23 = vunpack.i.l.bf16 %v588_v50  ;;  %421 = vmatpush.bf16.msra.mxu3 %v377_v57  ;;  %vm1290_vm5 = vcmp.eq.s32.totalorder %v860_v15, 1  ;;  %v22_v15 = vld [vmem:[%s1233_s3] sm:$0xff] }
  0x8b   :  { %vm508_vm2 = vmpackc.low %vm1290_vm5, %vm1289_vm14  ;;  %vm1291_vm12 = vcmp.eq.s32.totalorder %v880_v25, 1  ;;  %vm1292_vm0 = vcmp.eq.s32.totalorder %v882_v27, 1  ;;  %v1067_v20 = vsel %vm1013_vm1, 1, %v648_v11  ;;  %v1072_v10 = vsel %vm1031_vm10, 1, %v648_v11  ;;  %359 = vperm.xlu1 %636, %v22_v15  }
  0x8c   :  { %vm1060_vm13 = vmpackc.low %vm1292_vm0, %vm1291_vm12  ;;  %v535_v25 = vpack.c.bf16 %v285_v28, %v252_v61  ;;  %vm1295_vm7 = vcmp.lt.s32.totalorder %v768_v38, 127  ;;  %vm1296_vm11 = vcmp.eq.s32.totalorder %v897_v34, 1  ;;  %vm1297_vm14 = vcmp.eq.s32.totalorder %v906_v40, 1  ;;  %497 = vmatpush.bf16.msk.msra.mxu0 %vm1039_vm9, %v496_v18  ;;  %v21_v40 = vld [vmem:[%s1234_s2] sm:$0xf] }
  0x8d   :  { %v217_v27 = vsel %vm1295_vm7, %v589_v23, %v590_v9  ;;  %vm1083_vm5 = vmpackc.low %vm1297_vm14, %vm1296_vm11  ;;  %510 = vmatpush.bf16.msk.msra.mxu1 %vm508_vm2, %v509_v42  ;;  %v177_v48 = vperm.slane %v173_v17, 0  ;;  %vm1305_vm9 = vcmp.eq.s32.totalorder %v927_v55, 1  ;;  %v1308_v18 = vunpack.i.h.bf16 %v923_v54 }
  0x8e   :  { %vm1300_vm1 = vmmov %vm1295_vm7  ;;  %v525_v34 = vpack.c.bf16 %v217_v27, %v680_v2  ;;  %536 = vmatpush.bf16.msk.msra.mxu3 %vm1060_vm13, %v535_v25  ;;  %vm182_vm7 = vcmp.eq.s32.totalorder %v990_v63, 1  ;;  %v58_v55 = vperm.slane %v1067_v20, 4  ;;  %v100_v49 = vperm.slane %v1072_v10, 4 }
  0x8f   :  { %v218_v11 = vsel %vm1300_vm1, %v595_v1, %v589_v23  ;;  %vm1301_vm10 = vmmov %vm1300_vm1  ;;  %v614_v12 = vunpack.i.l.bf16 %v613_v37  ;;  %vm150_vm11 = vcmp.eq.s32.totalorder %v1002_v62, 1  ;;  %vm183_vm14 = vcmp.eq.s32.totalorder %v1004_v6, 1 }
  0x90   :  { %v219_v36 = vsel %vm1301_vm10, %v594_v19, %v595_v1  ;;  %vm1101_vm12 = vmpackc.low %vm233_vm6, %vm201_vm8  ;;  %vm149_vm6 = vcmp.eq.s32.totalorder %v958_v35, 1  ;;  %vm1310_vm8 = vcmp.lt.s32.totalorder %v768_v38, 15  ;;  %526 = vmatpush.bf16.msk.msra.mxu2 %vm1083_vm5, %v525_v34  ;;  %v512_v46 = vpack.c.bf16 %v218_v11, %v686_v5  ;;  %v608_v5 = vpop.permute.xlu1 %607  ;;  %v603_v43 = vpop.permute.xlu0 %602 }
  0x91   :  { %vm1304_vm0 = vmmov %vm1300_vm1  ;;  %v499_v8 = vpack.c.bf16 %v219_v36, %v684_v4  ;;  %v124_v45 = vsel %vm1310_vm8, %v1309_v41, %v1308_v18  ;;  %vm184_vm5 = vcmp.eq.s32.totalorder %v180_v47, 1  ;;  %vm148_vm1 = vcmp.eq.s32.totalorder %v144_v59, 1 }
  0x92   :  { %v220_v44 = vsel %vm1304_vm0, %v590_v9, %v594_v19  ;;  %vm1113_vm2 = vmpackc.low %vm1305_vm9, %vm200_vm3  ;;  %vm1311_vm3 = vcmp.eq.s32.totalorder %v935_v7, 1  ;;  %513 = vmatpush.bf16.msk.msra.mxu1 %vm1101_vm12, %v512_v46  ;;  %vm181_vm10 = vcmp.eq.s32.totalorder %v177_v48, 1  ;;  %v610_v7 = vunpack.i.h.bf16 %v608_v5 }
  0x93   :  { %vm1132_vm13 = vmpackc.low %vm1311_vm3, %vm203_vm4  ;;  %v538_v58 = vpack.c.bf16 %v220_v44, %v682_v3  ;;  %500 = vmatpush.bf16.msk.msra.mxu0 %vm1113_vm2, %v499_v8  ;;  %vm151_vm4 = vcmp.eq.s32.totalorder %v1048_v30, 1  ;;  %v609_v13 = vunpack.i.l.bf16 %v608_v5  ;;  %v605_v3 = vunpack.i.h.bf16 %v603_v43 }
  0x94   :  { %v604_v22 = vunpack.i.l.bf16 %v603_v43  ;;  %vm1153_vm12 = vmpackc.low %vm182_vm7, %vm149_vm6  ;;  %v168_v24 = vsel %vm164_vm15, %v614_v12, %v615_v0  ;;  %v62_v32 = vperm.slane %v58_v55, 0  ;;  %v104_v60 = vperm.slane %v100_v49, 0 }
  0x95   :  { %539 = vmatpush.bf16.msk.msra.mxu3 %vm1132_vm13, %v538_v58  ;;  %vm1161_vm0 = vmpackc.low %vm183_vm14, %vm150_vm11  ;;  %v1318_v35 = vmov %v1309_v41  ;;  %v1320_v6 = vmov %v1308_v18  ;;  %v165_v57 = vsel %vm164_vm15, %v605_v3, %v614_v12  ;;  %vm37_vm13 = vcmp.lt.s32.totalorder %v768_v38, 17 }
  0x96   :  { %vm1319_vm9 = vmmov %vm1310_vm8  ;;  %v167_v61 = vsel %vm164_vm15, %v615_v0, %v604_v22  ;;  %v166_v62 = vsel %vm164_vm15, %v604_v22, %v605_v3  ;;  %vm80_vm7 = vcmp.lt.s32.totalorder %v768_v38, 16  ;;  %vm66_vm15 = vcmp.eq.s32.totalorder %v62_v32, 1 }
  0x97   :  { %v125_v63 = vsel %vm1319_vm9, %v610_v7, %v1318_v35  ;;  %vm1321_vm2 = vmmov %vm1310_vm8  ;;  %v528_v56 = vpack.c.bf16 %v166_v62, %v124_v45  ;;  %vm108_vm11 = vcmp.eq.s32.totalorder %v104_v60, 1  ;;  %v56_v39 = vperm.slane %v1067_v20, 0 }
  0x98   :  { %v123_v16 = vsel %vm1321_vm2, %v1320_v6, %v609_v13  ;;  %vm540_vm6 = vmpackc.low %vm184_vm5, %vm151_vm4  ;;  %v515_v31 = vpack.c.bf16 %v167_v61, %v125_v63  ;;  %v98_v50 = vperm.slane %v1072_v10, 0  ;;  %v623_v52 = vpop.permute.xlu1 %622  ;;  %v618_v28 = vpop.permute.xlu0 %617  ;;  %v57_v30 = vperm.slane %v1067_v20, 2 }
  0x99   :  { %vm1322_vm8 = vmmov %vm1321_vm2  ;;  %v541_v26 = vpack.c.bf16 %v165_v57, %v123_v16  ;;  %529 = vmatpush.bf16.msk.msra.mxu2 %vm1161_vm0, %v528_v56  ;;  %v99_v51 = vperm.slane %v1072_v10, 2  ;;  %v59_v17 = vperm.slane %v1067_v20, 6  ;;  %v101_v1 = vperm.slane %v1072_v10, 6 }
  0x9a   :  { %v126_v29 = vsel %vm1322_vm8, %v609_v13, %v610_v7  ;;  %vm501_vm3 = vmpackc.low %vm181_vm10, %vm148_vm1  ;;  %516 = vmatpush.bf16.msk.msra.mxu1 %vm1153_vm12, %v515_v31  ;;  %v625_v19 = vunpack.i.h.bf16 %v623_v52  ;;  %v624_v9 = vunpack.i.l.bf16 %v623_v52  ;;  %v620_v23 = vunpack.i.h.bf16 %v618_v28 }
  0x9b   :  { %v502_v54 = vpack.c.bf16 %v168_v24, %v126_v29  ;;  %542 = vmatpush.bf16.msk.msra.mxu3 %vm540_vm6, %v541_v26  ;;  %v619_v42 = vunpack.i.l.bf16 %v618_v28  ;;  %vm530_vm14 = vmpackc.low %vm108_vm11, %vm66_vm15  ;;  %v60_v15 = vperm.slane %v56_v39, 0  ;;  %v102_v25 = vperm.slane %v98_v50, 0 }
  0x9c   :  { %v82_v47 = vsel %vm80_vm7, %v624_v9, %v625_v19  ;;  %v61_v20 = vperm.slane %v57_v30, 0  ;;  %v103_v33 = vperm.slane %v99_v51, 0  ;;  %v63_v10 = vperm.slane %v59_v17, 0 }
  0x9d   :  { %503 = vmatpush.bf16.msk.msra.mxu0 %vm501_vm3, %v502_v54  ;;  %v39_v37 = vsel %vm37_vm13, %v619_v42, %v620_v23  ;;  %v105_v11 = vperm.slane %v101_v1, 0  ;;  %v630_v36 = vunpack.i.h.bf16 %v628_v53  ;;  %v629_v34 = vunpack.i.l.bf16 %v628_v53 }
  0x9e   :  { %v531_v27 = vpack.c.bf16 %v82_v47, %v39_v37  ;;  %vm362_vm4 = vcmask 588800   ;;  %vm64_vm5 = vcmp.eq.s32.totalorder %v60_v15, 1  ;;  %vm106_vm1 = vcmp.eq.s32.totalorder %v102_v25, 1 }
  0x9f   :  { %v41_v59 = vsel %vm37_vm13, %v629_v34, %v630_v36  ;;  %vm65_vm10 = vcmp.eq.s32.totalorder %v61_v20, 1  ;;  %vm107_vm12 = vcmp.eq.s32.totalorder %v103_v33, 1  ;;  %vm67_vm0 = vcmp.eq.s32.totalorder %v63_v10, 1  ;;  %vm504_vm2 = vmpackc.low %vm106_vm1, %vm64_vm5 }
  0xa0   :  { %532 = vmatpush.bf16.msk.msra.mxu2 %vm530_vm14, %v531_v27  ;;  %v633_v44 = vpop.permute.xlu0 %632  ;;  %vm109_vm9 = vcmp.eq.s32.totalorder %v105_v11, 1  ;;  %v40_v2 = vsel %vm37_vm13, %v630_v36, %v619_v42  ;;  %vm517_vm6 = vmpackc.low %vm107_vm12, %vm65_vm10  ;;  %v38_v41 = vsel %vm37_vm13, %v620_v23, %v629_v34 }
  0xa1   :  { %v635_v48 = vunpack.i.h.bf16 %v633_v44  ;;  %v634_v0 = vunpack.i.l.bf16 %v633_v44  ;;  %vm543_vm8 = vmpackc.low %vm109_vm9, %vm67_vm0 }
  0xa3   :  { %533 = vmatmul.msk.bf16.vlgmr.msra.gmra.mxu2 %vm362_vm4, %v21_v40  ;;  %v84_v8 = vsel %vm80_vm7, %v634_v0, %v635_v48  ;;  %v83_v18 = vsel %vm80_vm7, %v635_v48, %v624_v9  ;;  %v81_v45 = vsel %vm80_vm7, %v625_v19, %v634_v0 }
  0xa4   :  { %v505_v46 = vpack.c.bf16 %v84_v8, %v41_v59  ;;  %v518_v4 = vpack.c.bf16 %v83_v18, %v40_v2  ;;  %v544_v55 = vpack.c.bf16 %v81_v45, %v38_v41 }
  0xa6   :  { %506 = vmatpush.bf16.msk.msra.mxu0 %vm504_vm2, %v505_v46  ;;  %519 = vmatpush.bf16.msk.msra.mxu1 %vm517_vm6, %v518_v4 }
  0xa7   :  { %545 = vmatpush.bf16.msk.msra.mxu3 %vm543_vm8, %v544_v55 }
  0xa9   :  { %507 = vmatmul.msk.bf16.vlgmr.msra.gmra.mxu0 %vm362_vm4, %v21_v40  ;;  %520 = vmatmul.msk.bf16.vlgmr.msra.gmra.mxu1 %vm362_vm4, %v21_v40 }
  0xaa   :  { %546 = vmatmul.msk.bf16.vlgmr.msra.gmra.mxu3 %vm362_vm4, %v21_v40 }
  0xfd   :  { %v360_v12 = vpop.permute.xlu1 %359 }
 0x126   :  { %v414_v49 = vpop.f32.mrf.mxu2  ;;  %v388_v58 = vpop.f32.mrf.mxu0 }
 0x127   :  { %v401_v5 = vpop.f32.mrf.mxu1  ;;  %v389_v43 = vadd.f32 %v388_v58, %v360_v12  ;;  %v415_v7 = vadd.f32 %v414_v49, %v360_v12 }
 0x128   :  { %v402_v38 = vadd.f32 %v401_v5, %v360_v12 }
 0x129   :  { %v437_v13 = vmul.f32 %v389_v43, %v389_v43  ;;  %v439_v21 = vmul.f32 %v415_v7, %v415_v7 }
 0x12a   :  { %v438_v3 = vmul.f32 %v402_v38, %v402_v38  ;;  %v431_v22 = vadd.f32 %v402_v38, %v389_v43 }
 0x12c   :  { %v441_v24 = vadd.f32 %v438_v3, %v437_v13  ;;  %v432_v61 = vadd.f32 %v431_v22, %v415_v7 }
 0x12d   :  { %v427_v32 = vpop.f32.mrf.mxu3 }
 0x12e   :  { %v416_v14 = vpop.f32.mrf.mxu2  ;;  %v428_v60 = vadd.f32 %v427_v32, %v360_v12  ;;  %v390_v35 = vpop.f32.mrf.mxu0  ;;  %v442_v16 = vadd.f32 %v441_v24, %v439_v21 }
 0x12f   :  { %v403_v63 = vpop.f32.mrf.mxu1 }
 0x130   :  { %v433_v62 = vadd.f32 %v432_v61, %v428_v60  ;;  %v440_v6 = vmul.f32 %v428_v60, %v428_v60 }
 0x132   :  { %434 = vadd.xlane.f32.xlu2 %v433_v62  ;;  %v443_v31 = vadd.f32 %v442_v16, %v440_v6 }
 0x134   :  { %444 = vadd.xlane.f32.xlu0 %v443_v31 }
 0x135   :  { %v429_v56 = vpop.f32.mrf.mxu3 }
 0x1a5   :  { %v435_v57 = vpop.xlane.xlu2 %434 }
 0x1a6   :  { %v436_v29 = vmul.f32 0.001953125, %v435_v57 }
 0x1a7   :  { %v445_v26 = vpop.xlane.xlu0 %444 }
 0x1a8   :  { %v446_v54 = vmul.f32 0.001953125, %v445_v26  ;;  %v447_v39 = vmul.f32 %v436_v29, %v436_v29  ;;  %v450_v23 = vsub.f32 %v389_v43, %v436_v29  ;;  %v451_v42 = vsub.f32 %v402_v38, %v436_v29 }
 0x1a9   :  { %v452_v53 = vsub.f32 %v415_v7, %v436_v29  ;;  %v453_v37 = vsub.f32 %v428_v60, %v436_v29 }
 0x1aa   :  { %v448_v50 = vsub.f32 %v446_v54, %v447_v39 }
 0x1ac   :  { %v449_v52 = vmax.f32 %v448_v50, 0.0 }
 0x1ae   :  { %v454_v28 = vadd.f32 1e-05, %v449_v52 }
 0x1b0   :  { %638 = vrsqrt.f32 %v454_v28  ;;  %vm461_vm13 = vweird.f32 %v454_v28 }
 0x1b6   :  { %v639_v30 = vpop.eup %638 }
 0x1b7   :  { %v456_v51 = vmul.f32 %v639_v30, %v454_v28  ;;  %vm462_vm3 = vweird.f32 %v639_v30 }
 0x1b8   :  { %vm463_vm7 = vmor %vm461_vm13, %vm462_vm3 }
 0x1b9   :  { %v457_v17 = vmul.f32 %v639_v30, %v456_v51 }
 0x1bb   :  { %v458_v1 = vmul.f32 0.5, %v457_v17 }
 0x1bd   :  { %v459_v19 = vsub.f32 1.5, %v458_v1 }
 0x1bf   :  { %v460_v9 = vmul.f32 %v639_v30, %v459_v19 }
 0x1c1   :  { %v464_v47 = vsel %vm463_vm7, %v639_v30, %v460_v9 }
 0x1c2   :  { %v465_v15 = vmul.f32 %v464_v47, %v450_v23  ;;  %v466_v25 = vmul.f32 %v464_v47, %v451_v42  ;;  %v467_v27 = vmul.f32 %v464_v47, %v452_v53  ;;  %v468_v20 = vmul.f32 %v464_v47, %v453_v37 }
 0x1c4   :  { %vm469_vm15 = vcmp.ge.f32.partialorder %v465_v15, 0.0  ;;  %vm470_vm11 = vcmp.ge.f32.partialorder %v466_v25, 0.0  ;;  %vm471_vm14 = vcmp.ge.f32.partialorder %v467_v27, 0.0  ;;  %vm472_vm4 = vcmp.ge.f32.partialorder %v468_v20, 0.0 }
 0x1c5   :  { %v473_v33 = vmul.f32 0.2, %v465_v15  ;;  %v474_v10 = vmul.f32 0.2, %v466_v25  ;;  %v475_v11 = vmul.f32 0.2, %v467_v27 }
 0x1c6   :  { %v476_v36 = vmul.f32 0.2, %v468_v20 }
 0x1c7   :  { %v477_v34 = vsel %vm469_vm15, %v465_v15, %v473_v33  ;;  %v478_v40 = vsel %vm470_vm11, %v466_v25, %v474_v10  ;;  %v479_v44 = vsel %vm471_vm14, %v467_v27, %v475_v11 }
 0x1c8   :  { %v480_v59 = vsel %vm472_vm4, %v468_v20, %v476_v36  ;;  %v481_v48 = vpack.c.bf16 %v478_v40, %v477_v34 }
 0x1c9   :  { %v482_v0 = vpack.c.bf16 %v480_v59, %v479_v44 }
 0x1ca   :  { %483 = vst [vmem:[%s1235_s4] sm:$0xff] %v481_v48 }
 0x1cb   :  { %484 = vst [vmem:[%s1235_s4 + $0x8] sm:$0xff] %v482_v0 }

// kernel: segmorph_runet_forward.22
= control target key start
LH: loop header
LB: loop body
LE: loop exit
PB: predicated region body
PF: predicated region fallthrough
CT: control target
= control target key end

     0   :  { %s262_s17 = smov 119   ;;  %s263_s18 = smov 120   ;;  %v270_v2 = vmov 0   ;;  %v474_v20 = vmov 0  ;;  %s458_s0 = inlined_call_operand.vmem [shape: bf16[8,128], index: 0, kind: input, shape index: {}]   ;;  %s459_s1 = inlined_call_operand.vmem [shape: s32[2,128], index: 1, kind: input, shape index: {}]   ;;  %s460_s3 = inlined_call_operand.vmem [shape: f32[16,1], index: 3, kind: input, shape index: {}]   ;;  %s461_s2 = inlined_call_operand.vmem [shape: bf16[16,72], index: 2, kind: input, shape index: {}]   ;;  %s462_s4 = inlined_call_operand.vmem [shape: bf16[16,128], index: 4, kind: output, shape index: {}]  }
   0x1   :  { %v18_v0 = vld [vmem:[%s458_s0] sm:$0xf]  ;;  %s264_s19 = smov 7   ;;  %s265_s20 = smov 121   ;;  %257 = vset.pattern.permute.xlu0 %v270_v2  ;;  %256 = vset.pattern.permute.xlu2 %v270_v2  ;;  %v23_v26 = vld [vmem:[%s460_s3 + $0x8] sm:$0xff] }
   0x2   :  { %v299_v1 = vunpack.c.l.bf16 %v18_v0  ;;  %s266_s21 = smov 127   ;;  %s267_s22 = smov 1   ;;  %v19_v3 = vld [vmem:[%s459_s1] sm:$0x3] }
   0x3   :  { %s268_s0 = smov 8   ;;  %s269_s23 = smov 9   ;;  %vm60_vm0 = vcmp.ge.s32.totalorder %v19_v3, 4294967295  ;;  %vm65_vm1 = vcmp.lt.s32.totalorder %v19_v3, 7  ;;  %vm463_vm2 = vcmp.ge.s32.totalorder %v19_v3, 1  ;;  %vm44_vm3 = vcmp.ge.s32.totalorder %v19_v3, 0 }
   0x4   :  { %114 = vrot.lane.b32.xlu0 %v299_v1, %s262_s17  ;;  %106 = vrot.lane.b32.xlu1 %v299_v1, %s263_s18  ;;  %v61_v4 = vsel %vm60_vm0, 1, %v270_v2  ;;  %v66_v6 = vsel %vm65_vm1, 1, %v270_v2  ;;  %vm464_vm4 = vcmp.lt.s32.totalorder %v19_v3, 9  ;;  %v30_v7 = vsel %vm463_vm2, 1, %v270_v2  ;;  %vm324_vm7 = vmand %vm60_vm0, %vm65_vm1  ;;  %v22_v27 = vld [vmem:[%s460_s3] sm:$0xff] }
   0x5   :  { %58 = vrot.lane.b32.xlu2 %v299_v1, %s264_s19  ;;  %v62_v5 = vrot.slane %v61_v4, 1  ;;  %v45_v8 = vsel %vm44_vm3, 1, %v270_v2  ;;  %vm49_vm5 = vcmp.lt.s32.totalorder %v19_v3, 8  ;;  %v67_v9 = vrot.slane %v66_v6, 1  ;;  %v241_v63 = vld [vmem:[%s461_s2] sm:$0xff] }
   0x6   :  { %v31_v12 = vrot.slane %v30_v7, 1  ;;  %v34_v13 = vsel %vm464_vm4, 1, %v270_v2  ;;  %v46_v14 = vrot.slane %v45_v8, 1  ;;  %v50_v15 = vsel %vm49_vm5, 1, %v270_v2  ;;  %vm368_vm1 = vmand %vm44_vm3, %vm49_vm5 }
   0x7   :  { %vm320_vm6 = vcmp.ne.s32.totalorder %v62_v5, 0  ;;  %vm332_vm8 = vcmp.ne.s32.totalorder %v67_v9, 0  ;;  %v35_v17 = vrot.slane %v34_v13, 1  ;;  %v51_v19 = vrot.slane %v50_v15, 1 }
   0x8   :  { %vm116_vm9 = vmand %vm324_vm7, %vm320_vm6  ;;  %vm340_vm10 = vcmp.ne.s32.totalorder %v31_v12, 0  ;;  %vm344_vm11 = vcmp.ne.s32.totalorder %v46_v14, 0  ;;  %vm482_vm5 = vcmp.lt.s32.totalorder %v19_v3, 9 }
   0x9   :  { %v475_v20 = vsel %vm344_vm11, 4294967295, %v474_v20  ;;  %vm117_vm12 = vmand %vm116_vm9, %vm332_vm8  ;;  %vm350_vm13 = vcmp.ne.s32.totalorder %v35_v17, 0  ;;  %vm358_vm15 = vcmp.ne.s32.totalorder %v51_v19, 0 }
   0xa   :  { %vm100_vm14 = vmand %vm324_vm7, %vm340_vm10  ;;  %v118_v24 = vsel %vm117_vm12, 1, %v270_v2 }
   0xb   :  { %vm108_vm0 = vmand %vm324_vm7, %vm344_vm11  ;;  %v119_v25 = vperm.slane %v118_v24, 0  ;;  %vm483_vm7 = vcmp.ge.s32.totalorder %v19_v3, 1 }
   0xc   :  { %97 = vrot.lane.b32.xlu0 %v299_v1, %s265_s20  ;;  %89 = vrot.lane.b32.xlu1 %v299_v1, %s266_s21  ;;  %vm101_vm9 = vmand %vm100_vm14, %vm350_vm13 }
   0xd   :  { %74 = vrot.lane.b32.xlu2 %v299_v1, %s267_s22  ;;  %vm109_vm2 = vmand %vm108_vm0, %vm358_vm15  ;;  %v102_v29 = vsel %vm101_vm9, 1, %v270_v2 }
   0xe   :  { %vm83_vm4 = vmand %vm368_vm1, %vm344_vm11  ;;  %vm120_vm11 = vcmp.eq.s32.totalorder %v119_v25, 1  ;;  %v110_v30 = vsel %vm109_vm2, 1, %v270_v2  ;;  %v103_v34 = vperm.slane %v102_v29, 0 }
   0xf   :  { %vm91_vm3 = vmand %vm368_vm1, %vm320_vm6  ;;  %v111_v35 = vperm.slane %v110_v30, 0 }
  0x10   :  { %vm393_vm12 = vmand %vm483_vm7, %vm482_vm5 }
  0x11   :  { %vm84_vm14 = vmand %vm83_vm4, %vm358_vm15  ;;  %vm146_vm4 = vcmask 1043456  }
  0x12   :  { %vm92_vm0 = vmand %vm91_vm3, %vm332_vm8  ;;  %v85_v36 = vsel %vm84_vm14, 1, %v270_v2  ;;  %vm429_vm3 = vcmp.eq.s32.totalorder %v111_v35, 1 }
  0x13   :  { %vm64_vm5 = vmand %vm393_vm12, %vm320_vm6  ;;  %v93_v38 = vsel %vm92_vm0, 1, %v270_v2  ;;  %v86_v41 = vperm.slane %v85_v36, 0 }
  0x14   :  { %42 = vrot.lane.b32.xlu1 %v299_v1, %s268_s0  ;;  %25 = vrot.lane.b32.xlu0 %v299_v1, %s269_s23  ;;  %vm77_vm7 = vmand %vm368_vm1, %vm340_vm10  ;;  %v94_v44 = vperm.slane %v93_v38, 0 }
  0x15   :  { %129 = vperm.xlu2 %256, %v22_v27   ;;  %vm69_vm2 = vmand %vm64_vm5, %vm332_vm8  ;;  %vm425_vm8 = vcmp.eq.s32.totalorder %v103_v34, 1  ;;  %vm443_vm0 = vcmp.eq.s32.totalorder %v86_v41, 1 }
  0x16   :  { %vm78_vm6 = vmand %vm77_vm7, %vm350_vm13  ;;  %v70_v45 = vsel %vm69_vm2, 1, %v270_v2  ;;  %vm95_vm5 = vcmp.eq.s32.totalorder %v94_v44, 1 }
  0x17   :  { %vm33_vm1 = vmand %vm393_vm12, %vm340_vm10  ;;  %v79_v46 = vsel %vm78_vm6, 1, %v270_v2  ;;  %v71_v51 = vperm.slane %v70_v45, 0 }
  0x18   :  { %vm37_vm10 = vmand %vm33_vm1, %vm350_vm13  ;;  %v80_v52 = vperm.slane %v79_v46, 0 }
  0x19   :  { %vm228_vm14 = vmpackc.low %vm429_vm3, %vm425_vm8  ;;  %v38_v53 = vsel %vm37_vm10, 1, %v270_v2 }
  0x1a   :  { %vm231_vm13 = vmpackc.low %vm95_vm5, %vm443_vm0  ;;  %vm81_vm7 = vcmp.eq.s32.totalorder %v80_v52, 1  ;;  %v39_v56 = vperm.slane %v38_v53, 0 }
  0x1c   :  { %134 = vperm.xlu0 %257, %v23_v26   ;;  %vm40_vm2 = vcmp.eq.s32.totalorder %v39_v56, 1 }
  0x5f   :  { %v59_v39 = vpop.permute.xlu2 %58 }
  0x67   :  { %v75_v58 = vpop.permute.xlu2 %74 }
  0x68   :  { %v235_v61 = vpack.c.bf16 %v75_v58, %v59_v39 }
  0x6f   :  { %v130_v0 = vpop.permute.xlu2 %129 }
  0x76   :  { %v115_v31 = vpop.permute.xlu0 %114  ;;  %v107_v32 = vpop.permute.xlu1 %106 }
  0x77   :  { %v121_v33 = vsel %vm120_vm11, %v115_v31, 0.0  ;;  %vm486_vm11 = vnez %v475_v20 }
  0x78   :  { %v126_v37 = vpack.c.bf16 %v121_v33, %v121_v33  ;;  %vm48_vm9 = vmand %vm393_vm12, %vm486_vm11  ;;  %vm142_vm11 = vcmask 588800  }
  0x79   :  { %vm53_vm12 = vmand %vm48_vm9, %vm358_vm15  ;;  %vm72_vm15 = vcmp.eq.s32.totalorder %v71_v51, 1 }
  0x7a   :  { %v148_v40 = vsel %vm146_vm4, %v126_v37, 0  ;;  %v54_v54 = vsel %vm53_vm12, 1, %v270_v2  ;;  %vm234_vm4 = vmpackc.low %vm81_vm7, %vm72_vm15 }
  0x7b   :  { %153 = vmatpush.bf16.msra.mxu0 %v148_v40  ;;  %v55_v57 = vperm.slane %v54_v54, 0 }
  0x7d   :  { %vm56_vm6 = vcmp.eq.s32.totalorder %v55_v57, 1 }
  0x7e   :  { %v98_v47 = vpop.permute.xlu0 %97  ;;  %v90_v48 = vpop.permute.xlu1 %89  ;;  %vm237_vm1 = vmpackc.low %vm56_vm6, %vm40_vm2 }
  0x7f   :  { %v229_v50 = vpack.c.bf16 %v107_v32, %v98_v47  ;;  %v232_v55 = vpack.c.bf16 %v90_v48, %v299_v1 }
  0x81   :  { %230 = vmatpush.bf16.msk.msra.mxu0 %vm228_vm14, %v229_v50 }
  0x85   :  { %233 = vmatpush.bf16.msk.msra.mxu0 %vm231_vm13, %v232_v55 }
  0x86   :  { %v43_v59 = vpop.permute.xlu1 %42  ;;  %v26_v60 = vpop.permute.xlu0 %25 }
  0x87   :  { %v238_v62 = vpack.c.bf16 %v43_v59, %v26_v60 }
  0x89   :  { %236 = vmatpush.bf16.msk.msra.mxu0 %vm234_vm4, %v235_v61 }
  0x8d   :  { %239 = vmatpush.bf16.msk.msra.mxu0 %vm237_vm1, %v238_v62 }
  0x8e   :  { %v135_v4 = vpop.permute.xlu0 %134 }
  0x90   :  { %240 = vmatmul.msk.bf16.vlgmr.msra.gmra.mxu0 %vm142_vm11, %v241_v63 }
 0x10d   :  { %v159_v1 = vpop.f32.mrf.mxu0 }
 0x10e   :  { %v160_v2 = vadd.f32 %v159_v1, %v130_v0 }
 0x110   :  { %164 = vadd.xlane.f32.xlu1 %v160_v2  ;;  %v170_v3 = vmul.f32 %v160_v2, %v160_v2 }
 0x112   :  { %172 = vadd.xlane.f32.xlu0 %v170_v3 }
 0x115   :  { %v161_v5 = vpop.f32.mrf.mxu0 }
 0x116   :  { %v162_v6 = vadd.f32 %v161_v5, %v135_v4 }
 0x118   :  { %166 = vadd.xlane.f32.xlu2 %v162_v6  ;;  %v171_v7 = vmul.f32 %v162_v6, %v162_v6 }
 0x120   :  { %174 = vadd.xlane.f32.xlu2 %v171_v7 }
 0x183   :  { %v165_v8 = vpop.xlane.xlu1 %164 }
 0x184   :  { %v168_v9 = vmul.f32 0.0078125, %v165_v8 }
 0x185   :  { %v173_v10 = vpop.xlane.xlu0 %172 }
 0x186   :  { %v178_v11 = vmul.f32 %v168_v9, %v168_v9  ;;  %v176_v12 = vmul.f32 0.0078125, %v173_v10  ;;  %v184_v35 = vsub.f32 %v160_v2, %v168_v9 }
 0x188   :  { %v180_v13 = vsub.f32 %v176_v12, %v178_v11 }
 0x18a   :  { %v182_v14 = vmax.f32 %v180_v13, 0.0 }
 0x18b   :  { %v167_v15 = vpop.xlane.xlu2 %166 }
 0x18c   :  { %v186_v16 = vadd.f32 1e-05, %v182_v14  ;;  %v169_v17 = vmul.f32 0.0078125, %v167_v15 }
 0x18e   :  { %258 = vrsqrt.f32 %v186_v16  ;;  %v179_v20 = vmul.f32 %v169_v17, %v169_v17  ;;  %vm194_vm8 = vweird.f32 %v186_v16  ;;  %v185_v39 = vsub.f32 %v162_v6, %v169_v17 }
 0x193   :  { %v175_v18 = vpop.xlane.xlu2 %174 }
 0x194   :  { %v259_v19 = vpop.eup %258  ;;  %v177_v21 = vmul.f32 0.0078125, %v175_v18 }
 0x195   :  { %v189_v22 = vmul.f32 %v259_v19, %v186_v16  ;;  %vm195_vm9 = vweird.f32 %v259_v19 }
 0x196   :  { %v181_v23 = vsub.f32 %v177_v21, %v179_v20  ;;  %vm196_vm3 = vmor %vm194_vm8, %vm195_vm9 }
 0x197   :  { %v190_v24 = vmul.f32 %v259_v19, %v189_v22 }
 0x198   :  { %v183_v25 = vmax.f32 %v181_v23, 0.0 }
 0x199   :  { %v191_v27 = vmul.f32 0.5, %v190_v24 }
 0x19a   :  { %v187_v26 = vadd.f32 1e-05, %v183_v25 }
 0x19b   :  { %v192_v28 = vsub.f32 1.5, %v191_v27 }
 0x19c   :  { %260 = vrsqrt.f32 %v187_v26  ;;  %vm204_vm12 = vweird.f32 %v187_v26 }
 0x19d   :  { %v193_v30 = vmul.f32 %v259_v19, %v192_v28 }
 0x19f   :  { %v197_v33 = vsel %vm196_vm3, %v259_v19, %v193_v30 }
 0x1a0   :  { %v208_v37 = vmul.f32 %v197_v33, %v184_v35 }
 0x1a2   :  { %v261_v29 = vpop.eup %260  ;;  %v212_v41 = vmul.f32 0.2, %v208_v37  ;;  %vm210_vm0 = vcmp.ge.f32.partialorder %v208_v37, 0.0 }
 0x1a3   :  { %v199_v31 = vmul.f32 %v261_v29, %v187_v26  ;;  %vm205_vm10 = vweird.f32 %v261_v29 }
 0x1a4   :  { %vm206_vm14 = vmor %vm204_vm12, %vm205_vm10  ;;  %v214_v44 = vsel %vm210_vm0, %v208_v37, %v212_v41 }
 0x1a5   :  { %v200_v32 = vmul.f32 %v261_v29, %v199_v31 }
 0x1a7   :  { %v201_v34 = vmul.f32 0.5, %v200_v32 }
 0x1a9   :  { %v202_v36 = vsub.f32 1.5, %v201_v34 }
 0x1ab   :  { %v203_v38 = vmul.f32 %v261_v29, %v202_v36 }
 0x1ad   :  { %v207_v40 = vsel %vm206_vm14, %v261_v29, %v203_v38 }
 0x1ae   :  { %v209_v42 = vmul.f32 %v207_v40, %v185_v39 }
 0x1b0   :  { %vm211_vm5 = vcmp.ge.f32.partialorder %v209_v42, 0.0  ;;  %v213_v43 = vmul.f32 0.2, %v209_v42 }
 0x1b2   :  { %v215_v45 = vsel %vm211_vm5, %v209_v42, %v213_v43 }
 0x1b3   :  { %v245_v46 = vpack.c.bf16 %v215_v45, %v214_v44 }
 0x1b5   :  { %246 = vst [vmem:[%s462_s4] sm:$0xff] %v245_v46  }

// kernel: segmorph_runet_forward.23
= control target key start
LH: loop header
LB: loop body
LE: loop exit
PB: predicated region body
PF: predicated region fallthrough
CT: control target
= control target key end

     0   :  { %s371_s17 = smov 120   ;;  %s372_s18 = smov 127   ;;  %v379_v4 = vmov 0   ;;  %v619_v12 = vmov 0  ;;  %s607_s0 = inlined_call_operand.vmem [shape: bf16[16,128], index: 0, kind: input, shape index: {}]   ;;  %s608_s1 = inlined_call_operand.vmem [shape: s32[2,128], index: 1, kind: input, shape index: {}]   ;;  %s609_s3 = inlined_call_operand.vmem [shape: f32[16,1], index: 3, kind: input, shape index: {}]   ;;  %s610_s2 = inlined_call_operand.vmem [shape: bf16[16,144], index: 2, kind: input, shape index: {}]   ;;  %s611_s4 = inlined_call_operand.vmem [shape: bf16[16,128], index: 4, kind: output, shape index: {}]  }
   0x1   :  { %v408_v0 = vld [vmem:[%s607_s0] sm:$0xff]   ;;  %s373_s19 = smov 7   ;;  %s374_s20 = smov 121   ;;  %366 = vset.pattern.permute.xlu0 %v379_v4  ;;  %365 = vset.pattern.permute.xlu2 %v379_v4  ;;  %v24_v46 = vld [vmem:[%s609_s3 + $0x8] sm:$0xff] }
   0x2   :  { %v309_v1 = vunpack.c.l.bf16 %v408_v0  ;;  %v310_v2 = vunpack.c.h.bf16 %v408_v0  ;;  %s375_s21 = smov 1   ;;  %s376_s22 = smov 8   ;;  %v20_v5 = vld [vmem:[%s608_s1] sm:$0x3]  ;;  %v306_v26 = vld [vmem:[%s610_s2 + $0x4] sm:$0xf0] }
   0x3   :  { %s377_s23 = smov 119   ;;  %s378_s0 = smov 9   ;;  %vm51_vm0 = vcmp.ge.s32.totalorder %v20_v5, 0  ;;  %vm56_vm1 = vcmp.lt.s32.totalorder %v20_v5, 8  ;;  %vm70_vm2 = vcmp.ge.s32.totalorder %v20_v5, 4294967295  ;;  %vm75_vm3 = vcmp.lt.s32.totalorder %v20_v5, 7 }
   0x4   :  { %v325_v3 = vpack.i.bf16 %v310_v2, %v309_v1  ;;  %v52_v6 = vsel %vm51_vm0, 1, %v379_v4  ;;  %v57_v8 = vsel %vm56_vm1, 1, %v379_v4  ;;  %vm426_vm5 = vmand %vm70_vm2, %vm75_vm3  ;;  %vm612_vm6 = vcmp.ge.s32.totalorder %v20_v5, 1  ;;  %v23_v47 = vld [vmem:[%s609_s3] sm:$0xff] }
   0x5   :  { %v53_v7 = vrot.slane %v52_v6, 1  ;;  %v58_v9 = vrot.slane %v57_v8, 1  ;;  %vm613_vm9 = vcmp.lt.s32.totalorder %v20_v5, 9  ;;  %v34_v13 = vsel %vm612_vm6, 1, %v379_v4  ;;  %vm466_vm15 = vmand %vm51_vm0, %vm56_vm1  ;;  %v273_v6 = vld [vmem:[%s610_s2 + $0x8] sm:$0xf0] }
   0x6   :  { %326 = vrot.lane.b32.xlu0 %v325_v3, %s371_s17  ;;  %336 = vrot.lane.b32.xlu1 %v325_v3, %s372_s18  ;;  %v35_v14 = vrot.slane %v34_v13, 1  ;;  %v38_v15 = vsel %vm613_vm9, 1, %v379_v4  ;;  %v71_v16 = vsel %vm70_vm2, 1, %v379_v4  ;;  %v76_v21 = vsel %vm75_vm3, 1, %v379_v4 }
   0x7   :  { %346 = vrot.lane.b32.xlu2 %v325_v3, %s373_s19  ;;  %vm421_vm4 = vcmp.ne.s32.totalorder %v53_v7, 0  ;;  %vm430_vm7 = vcmp.ne.s32.totalorder %v58_v9, 0  ;;  %v39_v18 = vrot.slane %v38_v15, 1  ;;  %v72_v20 = vrot.slane %v71_v16, 1 }
   0x8   :  { %v620_v12 = vsel %vm430_vm7, 4294967295, %v619_v12  ;;  %vm131_vm8 = vmand %vm426_vm5, %vm421_vm4  ;;  %vm446_vm11 = vcmp.ne.s32.totalorder %v35_v14, 0  ;;  %v77_v24 = vrot.slane %v76_v21, 1 }
   0x9   :  { %vm132_vm10 = vmand %vm131_vm8, %vm430_vm7  ;;  %vm452_vm12 = vcmp.ne.s32.totalorder %v39_v18, 0  ;;  %vm460_vm14 = vcmp.ne.s32.totalorder %v72_v20, 0 }
   0xa   :  { %v133_v17 = vsel %vm132_vm10, 1, %v379_v4  ;;  %vm120_vm13 = vmand %vm426_vm5, %vm446_vm11  ;;  %vm476_vm8 = vcmp.ne.s32.totalorder %v77_v24, 0 }
   0xb   :  { %v134_v22 = vperm.slane %v133_v17, 0  ;;  %vm121_vm3 = vmand %vm120_vm13, %vm452_vm12 }
   0xc   :  { %vm108_vm10 = vmand %vm466_vm15, %vm460_vm14  ;;  %v122_v31 = vsel %vm121_vm3, 1, %v379_v4 }
   0xd   :  { %vm470_vm2 = vcmp.eq.s32.totalorder %v134_v22, 1  ;;  %vm97_vm0 = vmand %vm466_vm15, %vm421_vm4  ;;  %v123_v35 = vperm.slane %v122_v31, 0 }
   0xe   :  { %331 = vrot.lane.b32.xlu0 %v325_v3, %s374_s20  ;;  %341 = vrot.lane.b32.xlu1 %v325_v3, %s375_s21  ;;  %vm277_vm1 = vmpackc.low %vm470_vm2, %vm470_vm2 }
   0xf   :  { %351 = vrot.lane.b32.xlu2 %v325_v3, %s376_s22  ;;  %vm109_vm13 = vmand %vm108_vm10, %vm476_vm8  ;;  %vm633_vm10 = vcmp.lt.s32.totalorder %v20_v5, 9 }
  0x10   :  { %vm98_vm6 = vmand %vm97_vm0, %vm430_vm7  ;;  %v110_v36 = vsel %vm109_vm13, 1, %v379_v4  ;;  %vm634_vm0 = vcmp.ge.s32.totalorder %v20_v5, 1  ;;  %v305_v5 = vld [vmem:[%s610_s2 + $0x4] sm:$0xf] }
  0x11   :  { %vm142_vm9 = vmand %vm426_vm5, %vm460_vm14  ;;  %v99_v37 = vsel %vm98_vm6, 1, %v379_v4  ;;  %vm514_vm5 = vcmp.eq.s32.totalorder %v123_v35, 1  ;;  %v111_v40 = vperm.slane %v110_v36, 0  ;;  %v276_v11 = vor.u32 %v305_v5, %v273_v6 }
  0x12   :  { %vm90_vm2 = vmand %vm466_vm15, %vm446_vm11  ;;  %v100_v43 = vperm.slane %v99_v37, 0 }
  0x13   :  { %vm143_vm3 = vmand %vm142_vm9, %vm476_vm8 }
  0x14   :  { %vm510_vm7 = vmand %vm634_vm0, %vm633_vm10  ;;  %v144_v45 = vsel %vm143_vm3, 1, %v379_v4  ;;  %vm542_vm13 = vcmp.eq.s32.totalorder %v100_v43, 1 }
  0x15   :  { %vm520_vm6 = vmand %vm90_vm2, %vm452_vm12  ;;  %v145_v54 = vperm.slane %v144_v45, 0 }
  0x16   :  { %361 = vrot.lane.b32.xlu1 %v325_v3, %s377_s23  ;;  %356 = vrot.lane.b32.xlu0 %v325_v3, %s378_s0  ;;  %vm74_vm9 = vmand %vm510_vm7, %vm460_vm14  ;;  %v92_v57 = vsel %vm520_vm6, 1, %v379_v4 }
  0x17   :  { %160 = vperm.xlu2 %365, %v23_v47   ;;  %vm280_vm15 = vmpackc.low %vm514_vm5, %vm514_vm5  ;;  %v93_v59 = vperm.slane %v92_v57, 0  ;;  %vm561_vm0 = vcmp.eq.s32.totalorder %v145_v54, 1 }
  0x18   :  { %vm79_vm14 = vmand %vm74_vm9, %vm476_vm8  ;;  %vm647_vm8 = vnez %v620_v12 }
  0x19   :  { %vm55_vm2 = vmand %vm510_vm7, %vm421_vm4  ;;  %v80_v62 = vsel %vm79_vm14, 1, %v379_v4  ;;  %vm581_vm9 = vcmp.eq.s32.totalorder %v93_v59, 1 }
  0x1a   :  { %vm286_vm10 = vmpackc.low %vm542_vm13, %vm542_vm13  ;;  %v81_v8 = vperm.slane %v80_v62, 0 }
  0x1b   :  { %vm60_vm5 = vmand %vm55_vm2, %vm647_vm8 }
  0x1c   :  { %vm37_vm4 = vmand %vm510_vm7, %vm446_vm11  ;;  %v61_v10 = vsel %vm60_vm5, 1, %v379_v4  ;;  %vm177_vm7 = vcmask 130048  }
  0x1d   :  { %vm301_vm6 = vmpackc.low %vm561_vm0, %vm561_vm0  ;;  %v62_v16 = vperm.slane %v61_v10, 0 }
  0x1e   :  { %165 = vperm.xlu0 %366, %v24_v46   ;;  %vm41_vm11 = vmand %vm37_vm4, %vm452_vm12 }
  0x1f   :  { %v42_v17 = vsel %vm41_vm11, 1, %v379_v4  ;;  %vm63_vm14 = vcmp.eq.s32.totalorder %v62_v16, 1  ;;  %v271_v4 = vld [vmem:[%s610_s2] sm:$0xf] }
  0x20   :  { %v43_v21 = vperm.slane %v42_v17, 0  ;;  %vm295_vm12 = vmpackc.low %vm63_vm14, %vm63_vm14  ;;  %v272_v27 = vor.u32 %v306_v26, %v271_v4 }
  0x22   :  { %vm44_vm2 = vcmp.eq.s32.totalorder %v43_v21, 1 }
  0x61   :  { %v347_v55 = vpop.permute.xlu2 %346 }
  0x62   :  { %v349_v14 = vunpack.i.h.bf16 %v347_v55  ;;  %v348_v15 = vunpack.i.l.bf16 %v347_v55 }
  0x64   :  { %v293_v20 = vpack.c.bf16 %v349_v14, %v348_v15 }
  0x69   :  { %v352_v13 = vpop.permute.xlu2 %351 }
  0x6a   :  { %v354_v18 = vunpack.i.h.bf16 %v352_v13 }
  0x71   :  { %v161_v28 = vpop.permute.xlu2 %160 }
  0x78   :  { %v327_v29 = vpop.permute.xlu0 %326  ;;  %v337_v30 = vpop.permute.xlu1 %336 }
  0x79   :  { %v329_v32 = vunpack.i.h.bf16 %v327_v29  ;;  %v328_v33 = vunpack.i.l.bf16 %v327_v29  ;;  %v339_v50 = vunpack.i.h.bf16 %v337_v30  ;;  %v338_v51 = vunpack.i.l.bf16 %v337_v30 }
  0x7b   :  { %v278_v34 = vpack.c.bf16 %v329_v32, %v328_v33  ;;  %v284_v58 = vpack.c.bf16 %v339_v50, %v338_v51 }
  0x7d   :  { %279 = vmatpush.bf16.msk.msra.mxu0 %vm277_vm1, %v278_v34  ;;  %vm538_vm1 = vcmp.eq.s32.totalorder %v111_v40, 1 }
  0x7e   :  { %vm283_vm3 = vmpackc.low %vm538_vm1, %vm538_vm1  ;;  %vm82_vm1 = vcmp.eq.s32.totalorder %v81_v8, 1 }
  0x7f   :  { %vm292_vm13 = vmpackc.low %vm82_vm1, %vm82_vm1 }
  0x80   :  { %v332_v41 = vpop.permute.xlu0 %331  ;;  %v342_v42 = vpop.permute.xlu1 %341 }
  0x81   :  { %v334_v48 = vunpack.i.h.bf16 %v332_v41  ;;  %v333_v49 = vunpack.i.l.bf16 %v332_v41  ;;  %v344_v63 = vunpack.i.h.bf16 %v342_v42  ;;  %v343_v1 = vunpack.i.l.bf16 %v342_v42 }
  0x83   :  { %v281_v52 = vpack.c.bf16 %v334_v48, %v333_v49  ;;  %v290_v12 = vpack.c.bf16 %v344_v63, %v343_v1 }
  0x85   :  { %282 = vmatpush.bf16.msk.msra.mxu0 %vm280_vm15, %v281_v52  ;;  %vm289_vm15 = vmpackc.low %vm581_vm9, %vm581_vm9 }
  0x88   :  { %v362_v61 = vpop.permute.xlu1 %361  ;;  %v357_v19 = vpop.permute.xlu0 %356 }
  0x89   :  { %285 = vmatpush.bf16.msk.msra.mxu0 %vm283_vm3, %v284_v58  ;;  %v364_v2 = vunpack.i.h.bf16 %v362_v61  ;;  %v363_v3 = vunpack.i.l.bf16 %v362_v61  ;;  %v359_v23 = vunpack.i.h.bf16 %v357_v19  ;;  %v358_v24 = vunpack.i.l.bf16 %v357_v19  ;;  %vm298_vm3 = vmpackc.low %vm44_vm2, %vm44_vm2 }
  0x8b   :  { %v302_v9 = vpack.c.bf16 %v364_v2, %v363_v3  ;;  %v299_v25 = vpack.c.bf16 %v359_v23, %v358_v24 }
  0x8d   :  { %288 = vmatpush.bf16.msk.msra.mxu0 %vm286_vm10, %v408_v0  ;;  %303 = vmatpush.bf16.msk.msra.mxu1 %vm301_vm6, %v302_v9  ;;  %v353_v0 = vunpack.i.l.bf16 %v352_v13 }
  0x8f   :  { %v296_v22 = vpack.c.bf16 %v354_v18, %v353_v0 }
  0x90   :  { %304 = vmatmul.msk.bf16.vlgmr.msra.gmra.mxu1 %vm177_vm7, %v276_v11  ;;  %v166_v34 = vpop.permute.xlu0 %165 }
  0x91   :  { %291 = vmatpush.bf16.msk.msra.mxu0 %vm289_vm15, %v290_v12 }
  0x95   :  { %294 = vmatpush.bf16.msk.msra.mxu0 %vm292_vm13, %v293_v20 }
  0x99   :  { %297 = vmatpush.bf16.msk.msra.mxu0 %vm295_vm12, %v296_v22 }
  0x9d   :  { %300 = vmatpush.bf16.msk.msra.mxu0 %vm298_vm3, %v299_v25 }
  0xa0   :  { %189 = vmatmul.bf16.vlgmr.msra.gmra.mxu0 %v272_v27 }
 0x10d   :  { %v204_v29 = vpop.f32.mrf.mxu1 }
 0x115   :  { %v206_v37 = vpop.f32.mrf.mxu1 }
 0x11d   :  { %v190_v30 = vpop.f32.mrf.mxu0 }
 0x11e   :  { %v191_v31 = vadd.f32 %v190_v30, %v161_v28 }
 0x120   :  { %v205_v32 = vadd.f32 %v204_v29, %v191_v31 }
 0x122   :  { %209 = vadd.xlane.f32.xlu1 %v205_v32  ;;  %v215_v33 = vmul.f32 %v205_v32, %v205_v32 }
 0x124   :  { %217 = vadd.xlane.f32.xlu0 %v215_v33 }
 0x125   :  { %v192_v35 = vpop.f32.mrf.mxu0 }
 0x126   :  { %v193_v36 = vadd.f32 %v192_v35, %v166_v34 }
 0x128   :  { %v207_v38 = vadd.f32 %v206_v37, %v193_v36 }
 0x12a   :  { %211 = vadd.xlane.f32.xlu2 %v207_v38  ;;  %v216_v39 = vmul.f32 %v207_v38, %v207_v38 }
 0x132   :  { %219 = vadd.xlane.f32.xlu2 %v216_v39 }
 0x195   :  { %v210_v40 = vpop.xlane.xlu1 %209 }
 0x196   :  { %v213_v41 = vmul.f32 0.0078125, %v210_v40 }
 0x197   :  { %v218_v42 = vpop.xlane.xlu0 %217 }
 0x198   :  { %v223_v43 = vmul.f32 %v213_v41, %v213_v41  ;;  %v221_v44 = vmul.f32 0.0078125, %v218_v42  ;;  %v229_v5 = vsub.f32 %v205_v32, %v213_v41 }
 0x19a   :  { %v225_v45 = vsub.f32 %v221_v44, %v223_v43 }
 0x19c   :  { %v227_v46 = vmax.f32 %v225_v45, 0.0 }
 0x19d   :  { %v212_v47 = vpop.xlane.xlu2 %211 }
 0x19e   :  { %v231_v48 = vadd.f32 1e-05, %v227_v46  ;;  %v214_v49 = vmul.f32 0.0078125, %v212_v47 }
 0x1a0   :  { %367 = vrsqrt.f32 %v231_v48  ;;  %v224_v52 = vmul.f32 %v214_v49, %v214_v49  ;;  %vm239_vm0 = vweird.f32 %v231_v48  ;;  %v230_v9 = vsub.f32 %v207_v38, %v214_v49 }
 0x1a5   :  { %v220_v50 = vpop.xlane.xlu2 %219 }
 0x1a6   :  { %v368_v51 = vpop.eup %367  ;;  %v222_v53 = vmul.f32 0.0078125, %v220_v50 }
 0x1a7   :  { %v234_v54 = vmul.f32 %v368_v51, %v231_v48  ;;  %vm240_vm10 = vweird.f32 %v368_v51 }
 0x1a8   :  { %v226_v55 = vsub.f32 %v222_v53, %v224_v52  ;;  %vm241_vm8 = vmor %vm239_vm0, %vm240_vm10 }
 0x1a9   :  { %v235_v56 = vmul.f32 %v368_v51, %v234_v54 }
 0x1aa   :  { %v228_v57 = vmax.f32 %v226_v55, 0.0 }
 0x1ab   :  { %v236_v59 = vmul.f32 0.5, %v235_v56 }
 0x1ac   :  { %v232_v58 = vadd.f32 1e-05, %v228_v57 }
 0x1ad   :  { %v237_v60 = vsub.f32 1.5, %v236_v59 }
 0x1ae   :  { %369 = vrsqrt.f32 %v232_v58  ;;  %vm249_vm4 = vweird.f32 %v232_v58 }
 0x1af   :  { %v238_v62 = vmul.f32 %v368_v51, %v237_v60 }
 0x1b1   :  { %v242_v2 = vsel %vm241_vm8, %v368_v51, %v238_v62 }
 0x1b2   :  { %v253_v7 = vmul.f32 %v242_v2, %v229_v5 }
 0x1b4   :  { %v370_v61 = vpop.eup %369  ;;  %v257_v11 = vmul.f32 0.2, %v253_v7  ;;  %vm255_vm9 = vcmp.ge.f32.partialorder %v253_v7, 0.0 }
 0x1b5   :  { %v244_v63 = vmul.f32 %v370_v61, %v232_v58  ;;  %vm250_vm5 = vweird.f32 %v370_v61 }
 0x1b6   :  { %vm251_vm6 = vmor %vm249_vm4, %vm250_vm5  ;;  %v259_v14 = vsel %vm255_vm9, %v253_v7, %v257_v11 }
 0x1b7   :  { %v245_v1 = vmul.f32 %v370_v61, %v244_v63 }
 0x1b9   :  { %v246_v3 = vmul.f32 0.5, %v245_v1 }
 0x1bb   :  { %v247_v6 = vsub.f32 1.5, %v246_v3 }
 0x1bd   :  { %v248_v8 = vmul.f32 %v370_v61, %v247_v6 }
 0x1bf   :  { %v252_v10 = vsel %vm251_vm6, %v370_v61, %v248_v8 }
 0x1c0   :  { %v254_v12 = vmul.f32 %v252_v10, %v230_v9 }
 0x1c2   :  { %vm256_vm7 = vcmp.ge.f32.partialorder %v254_v12, 0.0  ;;  %v258_v13 = vmul.f32 0.2, %v254_v12 }
 0x1c4   :  { %v260_v15 = vsel %vm256_vm7, %v254_v12, %v258_v13 }
 0x1c5   :  { %v314_v16 = vpack.c.bf16 %v260_v15, %v259_v14 }
 0x1c7   :  { %315 = vst [vmem:[%s611_s4] sm:$0xff] %v314_v16  }

// kernel: segmorph_runet_forward.24
= control target key start
LH: loop header
LB: loop body
LE: loop exit
PB: predicated region body
PF: predicated region fallthrough
CT: control target
= control target key end

     0   :  { %s1388_s11 = smov 111   ;;  %s1389_s12 = smov 1   ;;  %v2956_v38 = vmov 0   ;;  %s2923_s0 = inlined_call_operand.vmem [shape: bf16[24,512], index: 0, kind: input, shape index: {}]   ;;  %s2924_s1 = inlined_call_operand.vmem [shape: s32[2,512], index: 1, kind: input, shape index: {}]   ;;  %s2925_s2 = inlined_call_operand.vmem [shape: bf16[8,216], index: 2, kind: input, shape index: {}]   ;;  %s2926_s3 = inlined_call_operand.vmem [shape: f32[8,1], index: 3, kind: input, shape index: {}]   ;;  %s2927_s5 = inlined_call_operand.vmem [shape: f32[4,1], index: 5, kind: input, shape index: {}]   ;;  %s2928_s4 = inlined_call_operand.vmem [shape: bf16[4,8], index: 4, kind: input, shape index: {}]   ;;  %s2929_s6 = inlined_call_operand.vmem [shape: f32[4,512], index: 6, kind: input, shape index: {}]   ;;  %s2930_s7 = inlined_call_operand.vmem [shape: f32[4,512], index: 7, kind: output, shape index: {}]  }
   0x1   :  { %v31_v0 = vld [vmem:[%s2923_s0 + $0x20] sm:$0xff]  ;;  %v32_v1 = vld [vmem:[%s2923_s0 + $0x28] sm:$0xff]  ;;  %v29_v2 = vld [vmem:[%s2923_s0 + $0x10] sm:$0xff]  ;;  %s1390_s13 = smov 127   ;;  %s1392_s16 = smov 112   ;;  %1385 = vset.pattern.permute.xlu0 %v2956_v38 }
   0x2   :  { %v1447_v3 = vunpack.c.h.bf16 %v31_v0  ;;  %v1449_v4 = vunpack.c.l.bf16 %v32_v1  ;;  %v27_v5 = vld [vmem:[%s2923_s0] sm:$0xff]  ;;  %v28_v6 = vld [vmem:[%s2923_s0 + $0x8] sm:$0xff]  ;;  %v1457_v7 = vunpack.c.h.bf16 %v29_v2  ;;  %v1472_v13 = vunpack.c.l.bf16 %v31_v0  ;;  %v30_v20 = vld [vmem:[%s2923_s0 + $0x18] sm:$0xff]  ;;  %s1391_s0 = smov 15   ;;  %s1393_s17 = smov 113  }
   0x3   :  { %v1459_v8 = vunpack.c.h.bf16 %v27_v5  ;;  %v1461_v9 = vunpack.c.l.bf16 %v28_v6  ;;  %v1474_v14 = vunpack.c.l.bf16 %v29_v2  ;;  %v1478_v15 = vunpack.c.h.bf16 %v28_v6  ;;  %s1394_s18 = smov 16   ;;  %s1395_s19 = smov 17   ;;  %v1581_v39 = vld [vmem:[%s2924_s1] sm:$0xff] }
   0x4   :  { %v1155_v10 = vpack.i.bf16 %v1449_v4, %v1447_v3  ;;  %v1467_v11 = vpack.i.bf16 %v1447_v3, %v1457_v7  ;;  %v1481_v16 = vunpack.c.l.bf16 %v27_v5  ;;  %v1496_v21 = vunpack.c.l.bf16 %v30_v20 }
   0x5   :  { %v1145_v12 = vpack.i.bf16 %v1461_v9, %v1459_v8  ;;  %v1485_v17 = vpack.i.bf16 %v1472_v13, %v1474_v14  ;;  %v1170_v18 = vpack.i.bf16 %v1459_v8, %v1472_v13  ;;  %v1185_v23 = vpack.i.bf16 %v1447_v3, %v1472_v13 }
   0x6   :  { %1156 = vrot.lane.b32.xlu1 %v1155_v10, %s1388_s11  ;;  %1166 = vrot.lane.b32.xlu2 %v1467_v11, %s1389_s12  ;;  %v1150_v19 = vpack.i.bf16 %v1478_v15, %v1481_v16  ;;  %v1180_v22 = vpack.i.bf16 %v1481_v16, %v1496_v21  ;;  %v1175_v24 = vpack.i.bf16 %v1461_v9, %v1457_v7  ;;  %v1506_v25 = vunpack.c.h.bf16 %v32_v1 }
   0x7   :  { %1146 = vrot.lane.b32.xlu0 %v1145_v12, %s1390_s13  ;;  %v1509_v26 = vunpack.c.h.bf16 %v30_v20  ;;  %v1190_v28 = vpack.i.bf16 %v1459_v8, %v1481_v16  ;;  %v1528_v30 = vpack.i.bf16 %v1474_v14, %v1481_v16  ;;  %v1205_v31 = vpack.i.bf16 %v1449_v4, %v1496_v21 }
   0x8   :  { %v1210_v29 = vpack.i.bf16 %v1506_v25, %v1474_v14  ;;  %v1538_v32 = vpack.i.bf16 %v1478_v15, %v1506_v25  ;;  %v1542_v33 = vpack.i.bf16 %v1496_v21, %v1478_v15  ;;  %v1220_v34 = vpack.i.bf16 %v1457_v7, %v1459_v8 }
   0x9   :  { %3004 = vst [vmem:[#allocation2_spill] sm:$0xff] %v1509_v26  ;;  %v1515_v27 = vpack.i.bf16 %v1506_v25, %v1509_v26  ;;  %v1557_v35 = vpack.i.bf16 %v1449_v4, %v1509_v26  ;;  %v1280_v36 = vpack.i.bf16 %v1509_v26, %v1481_v16  ;;  %v1575_v37 = vpack.i.bf16 %v1461_v9, %v1449_v4 }
   0xa   :  { %vm162_vm0 = vcmp.ge.s32.totalorder %v1581_v39, 0  ;;  %vm236_vm1 = vcmp.ge.s32.totalorder %v1581_v39, 4294967295  ;;  %v1593_v40 = vpack.i.bf16 %v1509_v26, %v1478_v15  ;;  %vm168_vm2 = vcmp.lt.s32.totalorder %v1581_v39, 16 }
   0xb   :  { %v163_v41 = vsel %vm162_vm0, 1, %v2956_v38  ;;  %v237_v42 = vsel %vm236_vm1, 1, %v2956_v38  ;;  %vm242_vm3 = vcmp.lt.s32.totalorder %v1581_v39, 15  ;;  %v169_v44 = vsel %vm168_vm2, 1, %v2956_v38  ;;  %vm1619_vm5 = vmand %vm162_vm0, %vm168_vm2 }
   0xc   :  { %v967_v43 = vrot.slane %v163_v41, 9  ;;  %v969_v45 = vrot.slane %v237_v42, 9  ;;  %v243_v46 = vsel %vm242_vm3, 1, %v2956_v38  ;;  %v968_v48 = vrot.slane %v169_v44, 9  ;;  %vm1632_vm8 = vmand %vm236_vm1, %vm242_vm3 }
   0xd   :  { %v970_v50 = vrot.slane %v243_v46, 9  ;;  %vm87_vm7 = vcmp.ge.s32.totalorder %v1581_v39, 1  ;;  %vm88_vm13 = vcmp.lt.s32.totalorder %v1581_v39, 17  ;;  %v72_v1 = vlaneseq }
   0xe   :  { %1161 = vrot.lane.b32.xlu1 %v1485_v17, %s1389_s12  ;;  %1171 = vrot.lane.b32.xlu2 %v1170_v18, %s1388_s11  ;;  %vm1613_vm4 = vcmp.ne.s32.totalorder %v967_v43, 0  ;;  %vm1623_vm6 = vcmp.ne.s32.totalorder %v969_v45, 0  ;;  %vm1636_vm9 = vcmp.ne.s32.totalorder %v968_v48, 0  ;;  %v90_v56 = vsel %vm87_vm7, 1, %v2956_v38 }
   0xf   :  { %1151 = vrot.lane.b32.xlu0 %v1150_v19, %s1390_s13  ;;  %vm338_vm10 = vmand %vm1619_vm5, %vm1613_vm4  ;;  %vm1645_vm11 = vcmp.ne.s32.totalorder %v970_v50, 0  ;;  %v965_v58 = vrot.slane %v90_v56, 9  ;;  %v95_v59 = vsel %vm88_vm13, 1, %v2956_v38 }
  0x10   :  { %vm402_vm12 = vmand %vm1619_vm5, %vm1623_vm6  ;;  %v966_v61 = vrot.slane %v95_v59, 9 }
  0x11   :  { %vm595_vm14 = vmand %vm1632_vm8, %vm1623_vm6  ;;  %vm1685_vm2 = vcmp.ne.s32.totalorder %v965_v58, 0 }
  0x12   :  { %vm339_vm15 = vmand %vm338_vm10, %vm1636_vm9  ;;  %vm1698_vm3 = vcmp.ne.s32.totalorder %v966_v61, 0 }
  0x13   :  { %vm403_vm0 = vmand %vm402_vm12, %vm1645_vm11  ;;  %v1677_v60 = vsel %vm339_vm15, 1, %v2956_v38 }
  0x14   :  { %vm596_vm1 = vmand %vm595_vm14, %vm1645_vm11  ;;  %v1680_v62 = vsel %vm403_vm0, 1, %v2956_v38  ;;  %v342_v2 = vperm.slane %v1677_v60, 2 }
  0x15   :  { %v1683_v63 = vsel %vm596_vm1, 1, %v2956_v38  ;;  %v406_v5 = vperm.slane %v1680_v62, 2  ;;  %vm311_vm10 = vmand %vm1619_vm5, %vm1685_vm2 }
  0x16   :  { %1181 = vrot.lane.b32.xlu1 %v1180_v22, %s1388_s11  ;;  %1186 = vrot.lane.b32.xlu2 %v1185_v23, %s1391_s0  ;;  %v598_v6 = vperm.slane %v1683_v63, 0  ;;  %v346_v19 = vperm.slane %v342_v2, 0  ;;  %vm312_vm12 = vmand %vm311_vm10, %vm1698_vm3 }
  0x17   :  { %1176 = vrot.lane.b32.xlu0 %v1175_v24, %s1388_s11  ;;  %v1715_v20 = vperm.slane %v406_v5, 0 }
  0x18   :  { %vm2932_vm14 = vcmp.eq.s32.totalorder %v346_v19, 1 }
  0x19   :  { %vm2931_vm15 = vcmp.eq.s32.totalorder %v1715_v20, 1 }
  0x1e   :  { %1196 = vrot.lane.b32.xlu1 %v1515_v27, %s1389_s12  ;;  %1201 = vrot.lane.b32.xlu2 %v1467_v11, %s1392_s16 }
  0x1f   :  { %1191 = vrot.lane.b32.xlu0 %v1190_v28, %s1389_s12 }
  0x26   :  { %1211 = vrot.lane.b32.xlu1 %v1210_v29, %s1388_s11  ;;  %1216 = vrot.lane.b32.xlu2 %v1528_v30, %s1391_s0 }
  0x27   :  { %1206 = vrot.lane.b32.xlu0 %v1205_v31, %s1392_s16 }
  0x2e   :  { %1226 = vrot.lane.b32.xlu1 %v1538_v32, %s1391_s0  ;;  %1231 = vrot.lane.b32.xlu2 %v1542_v33, %s1389_s12 }
  0x2f   :  { %1221 = vrot.lane.b32.xlu0 %v1220_v34, %s1391_s0 }
  0x36   :  { %1241 = vrot.lane.b32.xlu1 %v1485_v17, %s1392_s16  ;;  %1246 = vrot.lane.b32.xlu2 %v1145_v12, %s1392_s16  ;;  %v599_v12 = vperm.slane %v1683_v63, 2 }
  0x37   :  { %1236 = vrot.lane.b32.xlu0 %v1155_v10, %s1393_s17 }
  0x3e   :  { %1256 = vrot.lane.b32.xlu1 %v1467_v11, %s1394_s18  ;;  %1261 = vrot.lane.b32.xlu2 %v1557_v35, %s1391_s0 }
  0x3f   :  { %1251 = vrot.lane.b32.xlu0 %v1485_v17, %s1394_s18 }
  0x46   :  { %1271 = vrot.lane.b32.xlu1 %v1175_v24, %s1393_s17  ;;  %1276 = vrot.lane.b32.xlu2 %v1180_v22, %s1393_s17  ;;  %v1717_v22 = vperm.slane %v598_v6, 0  ;;  %v1724_v24 = vsel %vm312_vm12, 1, %v2956_v38  ;;  %vm1747_vm12 = vmpackc.low %vm2931_vm15, %vm2932_vm14  ;;  %vm2936_vm15 = vcmask 1043456  }
  0x47   :  { %1266 = vrot.lane.b32.xlu0 %v1170_v18, %s1393_s17  ;;  %v1711_v18 = vand.u32 127, %v72_v1  ;;  %vm1771_vm14 = vmand %vm87_vm7, %vm88_vm13 }
  0x48   :  { %vm2933_vm1 = vcmp.eq.s32.totalorder %v1717_v22, 1  ;;  %vm241_vm7 = vmand %vm1771_vm14, %vm1623_vm6 }
  0x49   :  { %vm2937_vm5 = vcmp.lt.s32.totalorder %v1711_v18, 127  ;;  %vm2935_vm0 = vcmp.lt.s32.totalorder %v1711_v18, 111 }
  0x4e   :  { %1286 = vrot.lane.b32.xlu1 %v1185_v23, %s1395_s19  ;;  %1291 = vrot.lane.b32.xlu2 %v1190_v28, %s1394_s18  ;;  %v1719_v23 = vperm.slane %v599_v12, 0 }
  0x4f   :  { %1281 = vrot.lane.b32.xlu0 %v1280_v36, %s1392_s16  ;;  %v315_v36 = vperm.slane %v1724_v24, 2 }
  0x50   :  { %vm2934_vm10 = vcmp.eq.s32.totalorder %v1719_v23, 1 }
  0x51   :  { %v1776_v1 = vperm.slane %v315_v36, 0 }
  0x53   :  { %vm3027_vm6 = vcmp.eq.s32.totalorder %v1776_v1, 1 }
  0x56   :  { %1301 = vrot.lane.b32.xlu1 %v1575_v37, %s1389_s12  ;;  %1306 = vrot.lane.b32.xlu2 %v1467_v11, %s1390_s13 }
  0x57   :  { %1296 = vrot.lane.b32.xlu0 %v1515_v27, %s1394_s18 }
  0x5e   :  { %1316 = vrot.lane.b32.xlu1 %v1210_v29, %s1393_s17  ;;  %1321 = vrot.lane.b32.xlu2 %v1593_v40, %s1388_s11  ;;  %v341_v29 = vperm.slane %v1677_v60, 0 }
  0x5f   :  { %1311 = vrot.lane.b32.xlu0 %v1205_v31, %s1390_s13 }
  0x60   :  { %v1611_v47 = vpop.permute.xlu2 %1166  ;;  %v345_v43 = vperm.slane %v341_v29, 0 }
  0x61   :  { %v2938_v2 = vunpack.i.h.bf16 %v1611_v47  ;;  %v1168_v5 = vunpack.i.l.bf16 %v1611_v47 }
  0x62   :  { %vm349_vm13 = vcmp.eq.s32.totalorder %v345_v43, 1 }
  0x66   :  { %1331 = vrot.lane.b32.xlu1 %v1220_v34, %s1395_s19  ;;  %1336 = vrot.lane.b32.xlu2 %v1538_v32, %s1395_s19 }
  0x67   :  { %1326 = vrot.lane.b32.xlu0 %v1528_v30, %s1395_s19  ;;  %v405_v30 = vperm.slane %v1680_v62, 0 }
  0x68   :  { %v1667_v57 = vpop.permute.xlu2 %1171 }
  0x69   :  { %v1173_v28 = vunpack.i.l.bf16 %v1667_v57  ;;  %v1751_v44 = vperm.slane %v405_v30, 0 }
  0x6e   :  { %1346 = vrot.lane.b32.xlu1 %v1485_v17, %s1390_s13  ;;  %1351 = vrot.lane.b32.xlu2 %v1538_v32, %s1392_s16  ;;  %v1360_v17 = vpack.i.bf16 %v1496_v21, %v1461_v9 }
  0x6f   :  { %1341 = vrot.lane.b32.xlu0 %v1542_v33, %s1394_s18 }
  0x70   :  { %v1706_v11 = vpop.permute.xlu2 %1186 }
  0x76   :  { %1361 = vrot.lane.b32.xlu1 %v1360_v17, %s1391_s0  ;;  %1366 = vrot.lane.b32.xlu2 %v1575_v37, %s1394_s18 }
  0x77   :  { %1356 = vrot.lane.b32.xlu0 %v1557_v35, %s1395_s19 }
  0x78   :  { %v1733_v31 = vpop.permute.xlu1 %1156  ;;  %v1740_v34 = vpop.permute.xlu2 %1201 }
  0x79   :  { %v1159_v32 = vunpack.i.h.bf16 %v1733_v31  ;;  %v1158_v33 = vunpack.i.l.bf16 %v1733_v31  ;;  %v1147_v35 = vpop.permute.xlu0 %1146 }
  0x7a   :  { %v1149_v37 = vunpack.i.h.bf16 %v1147_v35  ;;  %v1148_v41 = vunpack.i.l.bf16 %v1147_v35 }
  0x7b   :  { %v591_v45 = vsel %vm2935_vm0, %v1173_v28, %v1158_v33  ;;  %v588_v46 = vsel %vm2935_vm0, %v1158_v33, %v1159_v32  ;;  %vm2947_vm0 = vcmp.lt.s32.totalorder %v1711_v18, 1 }
  0x7c   :  { %v393_v48 = vsel %vm2937_vm5, %v1148_v41, %v1149_v37  ;;  %v618_v50 = vsel %vm2933_vm1, %v591_v45, 0.0  ;;  %v619_v51 = vsel %vm2934_vm10, %v588_v46, 0.0  ;;  %vm3025_vm1 = vcmp.eq.s32.totalorder %v346_v19, 1 }
  0x7d   :  { %v1012_v58 = vpack.c.bf16 %v393_v48, %v1447_v3  ;;  %v674_v59 = vpack.c.bf16 %v618_v50, %v618_v50  ;;  %v675_v61 = vpack.c.bf16 %v619_v51, %v619_v51  ;;  %v1015_v3 = vpack.c.bf16 %v1457_v7, %v1459_v8  ;;  %vm1014_vm10 = vmpackc.low %vm3025_vm1, %vm3025_vm1 }
  0x7e   :  { %1376 = vrot.lane.b32.xlu1 %v1515_v27, %s1390_s13  ;;  %1381 = vrot.lane.b32.xlu2 %v1360_v17, %s1395_s19  ;;  %vm247_vm1 = vmand %vm241_vm7, %vm1645_vm11  ;;  %v1174_v45 = vunpack.i.h.bf16 %v1667_v57 }
  0x7f   :  { %1013 = vmatpush.bf16.msk.msra.mxu2 %vm1747_vm12, %v1012_v58  ;;  %1371 = vrot.lane.b32.xlu0 %v1593_v40, %s1393_s17  ;;  %v695_v39 = vsel %vm2936_vm15, %v674_v59, 0  ;;  %v698_v6 = vsel %vm2936_vm15, %v675_v61, 0  ;;  %vm2942_vm12 = vcmp.eq.s32.totalorder %v1751_v44, 1  ;;  %vm3026_vm15 = vcmp.lt.s32.totalorder %v1711_v18, 127  ;;  %vm1017_vm11 = vmpackc.low %vm3027_vm6, %vm3027_vm6 }
  0x80   :  { %v1794_v27 = vpop.permute.xlu1 %1161  ;;  %721 = vmatpush.bf16.msra.mxu1 %v695_v39  ;;  %v1803_v40 = vpop.permute.xlu2 %1216  ;;  %747 = vmatpush.bf16.msra.mxu3 %v698_v6  ;;  %vm971_vm5 = vmpackc.low %vm2942_vm12, %vm349_vm13  ;;  %v1839_v42 = vsel %vm247_vm1, 1, %v2956_v38  ;;  %vm3031_vm1 = vcmp.lt.s32.totalorder %v1711_v18, 111  ;;  %vm3037_vm12 = vcmp.eq.s32.totalorder %v1717_v22, 1 }
  0x81   :  { %v1164_v7 = vunpack.i.h.bf16 %v1794_v27  ;;  %v1163_v8 = vunpack.i.l.bf16 %v1794_v27  ;;  %v1152_v12 = vpop.permute.xlu0 %1151  ;;  %v250_v48 = vperm.slane %v1839_v42, 2  ;;  %vm3032_vm6 = vmmov %vm3031_vm1 }
  0x82   :  { %v1154_v17 = vunpack.i.h.bf16 %v1152_v12  ;;  %v1153_v29 = vunpack.i.l.bf16 %v1152_v12  ;;  %v1189_v12 = vunpack.i.h.bf16 %v1706_v11 }
  0x83   :  { %1016 = vmatpush.bf16.msk.msra.mxu2 %vm1014_vm10, %v1015_v3  ;;  %v305_v19 = vsel %vm2947_vm0, %v1163_v8, %v1168_v5  ;;  %v306_v55 = vsel %vm2947_vm0, %v1164_v7, %v2938_v2  ;;  %vm3028_vm10 = vmmov %vm3026_vm15  ;;  %v1879_v39 = vperm.slane %v250_v48, 0 }
  0x84   :  { %v396_v52 = vsel %vm3026_vm15, %v1153_v29, %v1148_v41  ;;  %v1018_v30 = vpack.c.bf16 %v306_v55, %v305_v19  ;;  %v1831_v33 = vsel %vm3028_vm10, %v1149_v37, %v1154_v17  ;;  %vm3029_vm7 = vmmov %vm3028_vm10  ;;  %v975_v41 = vpack.c.bf16 %v1474_v14, %v1481_v16 }
  0x85   :  { %v1835_v35 = vsel %vm3029_vm7, %v1154_v17, %v1153_v29  ;;  %v972_v36 = vpack.c.bf16 %v396_v52, %v1472_v13  ;;  %vm974_vm15 = vmpackc.low %vm349_vm13, %vm349_vm13  ;;  %v314_v37 = vperm.slane %v1724_v24, 0  ;;  %v2946_v17 = vunpack.i.l.bf16 %v1706_v11 }
  0x86   :  { %vm2949_vm7 = vcmp.lt.s32.totalorder %v1711_v18, 15 }
  0x87   :  { %973 = vmatpush.bf16.msk.msra.mxu0 %vm971_vm5, %v972_v36  ;;  %1019 = vmatpush.bf16.msk.msra.mxu2 %vm1017_vm11, %v1018_v30  ;;  %vm531_vm5 = vmand %vm1632_vm8, %vm1613_vm4  ;;  %v1862_v58 = vperm.slane %v314_v37, 0  ;;  %vm3033_vm11 = vcmp.eq.s32.totalorder %v1719_v23, 1 }
  0x88   :  { %v1847_v46 = vpop.permute.xlu1 %1181  ;;  %v1854_v13 = vpop.permute.xlu2 %1231  ;;  %vm532_vm13 = vmand %vm531_vm5, %vm1636_vm9  ;;  %vm2943_vm5 = vcmp.eq.s32.totalorder %v1879_v39, 1 }
  0x89   :  { %3030 = vst [vmem:[#allocation3_spill] sm:$0xff] %v1854_v13  ;;  %v2941_v43 = vunpack.i.l.bf16 %v1847_v46  ;;  %v1857_v50 = vpop.permute.xlu0 %1176  ;;  %v1234_v14 = vunpack.i.h.bf16 %v1854_v13  ;;  %vm1035_vm10 = vmpackc.low %vm3033_vm11, %vm3033_vm11  ;;  %v1888_v29 = vsel %vm532_vm13, 1, %v2956_v38  ;;  %vm518_vm11 = vcmp.lt.s32.totalorder %v1711_v18, 112 }
  0x8a   :  { %v2944_v16 = vunpack.i.h.bf16 %v1857_v50  ;;  %v1178_v51 = vunpack.i.l.bf16 %v1857_v50  ;;  %v535_v36 = vperm.slane %v1888_v29, 2 }
  0x8b   :  { %976 = vmatpush.bf16.msk.msra.mxu0 %vm974_vm15, %v975_v41  ;;  %v1883_v3 = vsel %vm2947_vm0, %v1168_v5, %v1234_v14  ;;  %vm2945_vm15 = vcmp.eq.s32.totalorder %v1862_v58, 1  ;;  %v600_v5 = vperm.slane %v1683_v63, 4  ;;  %v601_v41 = vperm.slane %v1683_v63, 6 }
  0x8c   :  { %v586_v59 = vsel %vm3031_vm1, %v1174_v45, %v2944_v16  ;;  %v587_v61 = vsel %vm3032_vm6, %v1178_v51, %v2941_v43  ;;  %vm977_vm13 = vmpackc.low %vm2945_vm15, %vm2945_vm15  ;;  %vm3034_vm1 = vcmp.eq.s32.totalorder %v1776_v1, 1  ;;  %v2954_v1 = vunpack.i.h.bf16 %v1740_v34 }
  0x8d   :  { %v1036_v6 = vpack.c.bf16 %v587_v61, %v586_v59  ;;  %v232_v59 = vsel %vm2949_vm7, %v2946_v17, %v1189_v12  ;;  %vm1020_vm6 = vmpackc.low %vm3034_vm1, %vm2943_vm5  ;;  %v1933_v27 = vperm.slane %v600_v5, 0  ;;  %v2955_v5 = vunpack.i.l.bf16 %v1740_v34 }
  0x8e   :  { %vm1969_vm5 = vmpackc.low %vm3037_vm12, %vm3037_vm12  ;;  %vm3040_vm15 = vcmp.lt.s32.totalorder %v1711_v18, 111 }
  0x8f   :  { %1037 = vmatpush.bf16.msk.msra.mxu3 %vm1035_vm10, %v1036_v6  ;;  %vm467_vm10 = vmand %vm1632_vm8, %vm1685_vm2 }
  0x90   :  { %v1891_v23 = vpop.permute.xlu1 %1196  ;;  %v1896_v19 = vpop.permute.xlu2 %1246  ;;  %vm468_vm12 = vmand %vm467_vm10, %vm1698_vm3  ;;  %vm3051_vm10 = vcmp.eq.s32.totalorder %v1862_v58, 1 }
  0x91   :  { %v2939_v55 = vunpack.i.h.bf16 %v1891_v23  ;;  %v1198_v52 = vunpack.i.l.bf16 %v1891_v23  ;;  %v1900_v30 = vpop.permute.xlu0 %1191 }
  0x92   :  { %v2940_v37 = vunpack.i.h.bf16 %v1900_v30  ;;  %v2948_v48 = vunpack.i.l.bf16 %v1900_v30 }
  0x93   :  { %v308_v61 = vsel %vm2947_vm0, %v1198_v52, %v1163_v8  ;;  %v309_v63 = vsel %vm2947_vm0, %v2939_v55, %v1164_v7  ;;  %v1935_v8 = vperm.slane %v535_v36, 0  ;;  %v1937_v55 = vperm.slane %v601_v41, 0 }
  0x94   :  { %v978_v6 = vpack.c.bf16 %v309_v63, %v308_v61  ;;  %v304_v2 = vsel %vm2947_vm0, %v2948_v48, %v2940_v37  ;;  %v1941_v61 = vsel %vm2947_vm0, %v1234_v14, %v1198_v52  ;;  %v249_v63 = vperm.slane %v1839_v42, 0  ;;  %vm3041_vm0 = vmmov %vm3040_vm15 }
  0x95   :  { %v1021_v7 = vpack.c.bf16 %v304_v2, %v232_v59  ;;  %3035 = vst [vmem:[#allocation4_spill] sm:$0xff] %v1941_v61  ;;  %v2953_v37 = vunpack.i.h.bf16 %v1847_v46  ;;  %vm543_vm1 = vcmp.eq.s32.totalorder %v1935_v8, 1  ;;  %vm3042_vm7 = vmmov %vm3041_vm0 }
  0x96   :  { %979 = vmatpush.bf16.msk.msra.mxu0 %vm977_vm13, %v978_v6  ;;  %vm608_vm13 = vcmp.eq.s32.totalorder %v1933_v27, 1  ;;  %v253_v16 = vperm.slane %v249_v63, 0  ;;  %vm1038_vm8 = vmpackc.low %vm543_vm1, %vm543_vm1 }
  0x97   :  { %1022 = vmatpush.bf16.msk.msra.mxu2 %vm1020_vm6, %v1021_v7  ;;  %vm2958_vm6 = vcmp.eq.s32.totalorder %v1937_v55, 1  ;;  %v589_v17 = vsel %vm3040_vm15, %v2953_v37, %v1174_v45  ;;  %vm3043_vm15 = vmmov %vm3041_vm0  ;;  %v3052_v37 = vunpack.i.l.bf16 %v1706_v11 }
  0x98   :  { %v1947_v43 = vpop.permute.xlu1 %1211  ;;  %v1955_v2 = vpop.permute.xlu2 %1261 }
  0x99   :  { %3036 = vst [vmem:[#allocation5_spill] sm:$0xff] %v1955_v2  ;;  %v1214_v14 = vunpack.i.h.bf16 %v1947_v43  ;;  %v2952_v52 = vunpack.i.l.bf16 %v1947_v43  ;;  %v1959_v36 = vpop.permute.xlu0 %1206  ;;  %v1264_v41 = vunpack.i.h.bf16 %v1955_v2 }
  0x9a   :  { %v2950_v59 = vunpack.i.h.bf16 %v1959_v36  ;;  %v2951_v6 = vunpack.i.l.bf16 %v1959_v36 }
  0x9b   :  { %v590_v48 = vsel %vm3041_vm0, %v2952_v52, %v1178_v51  ;;  %v585_v22 = vsel %vm3042_vm7, %v1159_v32, %v1214_v14  ;;  %v594_v45 = vsel %vm3043_vm15, %v1214_v14, %v1173_v28  ;;  %vm3044_vm0 = vcmp.lt.s32.totalorder %v1711_v18, 15 }
  0x9c   :  { %v996_v63 = vpack.c.bf16 %v590_v48, %v589_v17  ;;  %v523_v53 = vsel %vm518_vm11, %v2955_v5, %v2951_v6  ;;  %v524_v31 = vsel %vm518_vm11, %v2954_v1, %v2950_v59  ;;  %v2015_v28 = vsel %vm608_vm13, %v585_v22, 0.0  ;;  %vm3053_vm15 = vmmov %vm3044_vm0 }
  0x9d   :  { %v1039_v57 = vpack.c.bf16 %v524_v31, %v523_v53  ;;  %v2019_v32 = vsel %vm2958_vm6, %v594_v45, 0.0  ;;  %v2025_v51 = vsel %vm3044_vm0, %v1189_v12, %v1264_v41  ;;  %v2961_v17 = vunpack.i.l.bf16 %v1854_v13 }
  0x9e   :  { %3045 = vst [vmem:[#allocation6_spill] sm:$0xff] %v2025_v51  ;;  %997 = vmatpush.bf16.msk.msra.mxu1 %vm1969_vm5, %v996_v63  ;;  %v2031_v48 = vsel %vm468_vm12, 1, %v2956_v38  ;;  %v2959_v14 = vunpack.i.l.bf16 %v1955_v2  ;;  %vm257_vm7 = vcmp.eq.s32.totalorder %v253_v16, 1  ;;  %v1219_v22 = vunpack.i.h.bf16 %v1803_v40  ;;  %vm167_vm5 = vmand %vm1771_vm14, %vm1613_vm4 }
  0x9f   :  { %1040 = vmatpush.bf16.msk.msra.mxu3 %vm1038_vm8, %v1039_v57  ;;  %v1218_v45 = vunpack.i.l.bf16 %v1803_v40  ;;  %v534_v12 = vperm.slane %v1888_v29, 0  ;;  %v471_v59 = vperm.slane %v2031_v48, 2  ;;  %v3049_v52 = vunpack.i.l.bf16 %v1900_v30  ;;  %vm980_vm12 = vmpackc.low %vm3051_vm10, %vm257_vm7 }
  0xa0   :  { %v2036_v53 = vpop.permute.xlu1 %1226  ;;  %v2043_v7 = vpop.permute.xlu2 %1276  ;;  %vm3050_vm4 = vcmp.lt.s32.totalorder %v1711_v18, 1  ;;  %vm3054_vm8 = vmmov %vm3044_vm0  ;;  %v234_v38 = vsel %vm3044_vm0, %v2959_v14, %v1219_v22  ;;  %v3064_v2 = vunpack.i.h.bf16 %v1857_v50  ;;  %v3075_v50 = vunpack.i.l.bf16 %v1896_v19 }
  0xa1   :  { %3046 = vst [vmem:[#allocation7_spill] sm:$0xff] %v2036_v53  ;;  %v2960_v63 = vunpack.i.h.bf16 %v2036_v53  ;;  %v1228_v31 = vunpack.i.l.bf16 %v2036_v53  ;;  %v2047_v57 = vpop.permute.xlu0 %1221  ;;  %v307_v49 = vsel %vm3050_vm4, %v2961_v17, %v3049_v52  ;;  %vm173_vm4 = vmand %vm167_vm5, %vm1636_vm9  ;;  %v2090_v54 = vperm.slane %v534_v12, 0 }
  0xa2   :  { %3047 = vst [vmem:[#allocation8_spill] sm:$0xff] %v2043_v7  ;;  %v2962_v40 = vunpack.i.h.bf16 %v2047_v57  ;;  %v2963_v6 = vunpack.i.l.bf16 %v2047_v57  ;;  %vm3055_vm10 = vmmov %vm3044_vm0  ;;  %v3062_v17 = vunpack.i.h.bf16 %v1740_v34 }
  0xa3   :  { %3048 = vst [vmem:[#allocation9_spill] sm:$0xff] %v2047_v57  ;;  %v235_v1 = vsel %vm3053_vm15, %v1228_v31, %v3052_v37  ;;  %v233_v5 = vsel %vm3054_vm8, %v2960_v63, %v1218_v45  ;;  %v2077_v58 = vsel %vm3055_vm10, %v1264_v41, %v1228_v31  ;;  %vm3057_vm15 = vmmov %vm3044_vm0  ;;  %v2092_v41 = vperm.slane %v471_v59, 0 }
  0xa4   :  { %3056 = vst [vmem:[#allocation10_spill] sm:$0xff] %v2077_v58  ;;  %v981_v11 = vpack.c.bf16 %v307_v49, %v235_v1  ;;  %v230_v37 = vsel %vm3057_vm15, %v1218_v45, %v2963_v6  ;;  %vm3058_vm8 = vmmov %vm3044_vm0  ;;  %vm3059_vm0 = vcmp.eq.s32.totalorder %v1879_v39, 1  ;;  %v2965_v1 = vunpack.i.h.bf16 %v1896_v19 }
  0xa5   :  { %v231_v52 = vsel %vm3058_vm8, %v1219_v22, %v2962_v40  ;;  %vm1023_vm6 = vmpackc.low %vm3059_vm0, %vm3059_vm0  ;;  %v2972_v31 = vunpack.i.l.bf16 %v1896_v19  ;;  %v984_v45 = vpack.c.bf16 %v234_v38, %v233_v5  ;;  %v3060_v49 = vmov 0  }
  0xa6   :  { %v1024_v14 = vpack.c.bf16 %v231_v52, %v230_v37  ;;  %982 = vmatpush.bf16.msk.msra.mxu0 %vm980_vm12, %v981_v11  ;;  %v2097_v63 = vsel %vm173_vm4, 1, %v3060_v49  ;;  %vm983_vm9 = vmpackc.low %vm257_vm7, %vm257_vm7  ;;  %vm542_vm5 = vcmp.eq.s32.totalorder %v2090_v54, 1  ;;  %vm453_vm10 = vcmp.lt.s32.totalorder %v1711_v18, 113 }
  0xa7   :  { %vm479_vm12 = vcmp.eq.s32.totalorder %v2092_v41, 1  ;;  %v176_v16 = vperm.slane %v2097_v63, 2  ;;  %v522_v11 = vsel %vm518_vm11, %v2972_v31, %v2965_v1  ;;  %v3061_v37 = vunpack.i.l.bf16 %v1740_v34  ;;  %vm94_vm4 = vmand %vm1771_vm14, %vm1685_vm2 }
  0xa8   :  { %1025 = vmatpush.bf16.msk.msra.mxu2 %vm1023_vm6, %v1024_v14  ;;  %v2101_v39 = vpop.permute.xlu1 %1241  ;;  %v2105_v59 = vpop.permute.xlu2 %1291  ;;  %vm998_vm6 = vmpackc.low %vm542_vm5, %vm542_vm5  ;;  %vm3065_vm8 = vcmp.lt.s32.totalorder %v1711_v18, 111  ;;  %v3066_v31 = vunpack.i.l.bf16 %v1847_v46  ;;  %v3068_v41 = vunpack.i.h.bf16 %v1847_v46 }
  0xa9   :  { %v2964_v22 = vunpack.i.h.bf16 %v2101_v39  ;;  %v2967_v12 = vunpack.i.l.bf16 %v2101_v39  ;;  %v2109_v38 = vpop.permute.xlu0 %1236  ;;  %vm1041_vm7 = vmpackc.low %vm543_vm1, %vm479_vm12  ;;  %vm149_vm1 = vcmp.lt.s32.totalorder %v1711_v18, 16 }
  0xaa   :  { %v2968_v5 = vunpack.i.h.bf16 %v2109_v38  ;;  %v2973_v14 = vunpack.i.l.bf16 %v2109_v38  ;;  %985 = vmatpush.bf16.msk.msra.mxu0 %vm983_vm9, %v984_v45  ;;  %vm99_vm2 = vmand %vm94_vm4, %vm1698_vm3  ;;  %v3073_v53 = vunpack.i.l.bf16 %v2109_v38 }
  0xab   :  { %v526_v52 = vsel %vm518_vm11, %v2967_v12, %v3061_v37  ;;  %v527_v45 = vsel %vm518_vm11, %v2964_v22, %v3062_v17  ;;  %v180_v37 = vperm.slane %v176_v16, 0  ;;  %v2178_v10 = vsel %vm99_vm2, 1, %v3060_v49  ;;  %vm1044_vm3 = vmpackc.low %vm479_vm12, %vm479_vm12 }
  0xac   :  { %v999_v40 = vpack.c.bf16 %v527_v45, %v526_v52  ;;  %v459_v6 = vsel %vm453_vm10, %v2973_v14, %v2968_v5  ;;  %v2975_v16 = vunpack.i.l.bf16 %v2043_v7  ;;  %vm3067_vm0 = vmmov %vm3065_vm8 }
  0xad   :  { %v1042_v34 = vpack.c.bf16 %v522_v11, %v459_v6  ;;  %vm184_vm15 = vcmp.eq.s32.totalorder %v180_v37, 1  ;;  %v470_v11 = vperm.slane %v2031_v48, 0  ;;  %vm3069_vm9 = vmmov %vm3067_vm0 }
  0xae   :  { %1000 = vmatpush.bf16.msk.msra.mxu1 %vm998_vm6, %v999_v40  ;;  %vm1026_vm14 = vmpackc.low %vm184_vm15, %vm184_vm15 }
  0xaf   :  { %1043 = vmatpush.bf16.msk.msra.mxu3 %vm1041_vm7, %v1042_v34  ;;  %vm3071_vm12 = vmmov %vm3067_vm0  ;;  %vm74_vm7 = vcmp.lt.s32.totalorder %v1711_v18, 17 }
  0xb0   :  { %v2150_v17 = vpop.permute.xlu1 %1256  ;;  %v2152_v52 = vpop.permute.xlu2 %1306 }
  0xb1   :  { %v2969_v45 = vunpack.i.h.bf16 %v2150_v17  ;;  %v2966_v22 = vunpack.i.l.bf16 %v2150_v17  ;;  %v2156_v1 = vpop.permute.xlu0 %1251 }
  0xb2   :  { %v2970_v8 = vunpack.i.h.bf16 %v2156_v1  ;;  %v2971_v0 = vunpack.i.l.bf16 %v2156_v1 }
  0xb4   :  { %v157_v56 = vsel %vm149_vm1, %v2971_v0, %v2966_v22  ;;  %v158_v6 = vsel %vm149_vm1, %v2970_v8, %v2969_v45  ;;  %v102_v22 = vperm.slane %v2178_v10, 2  ;;  %v2196_v0 = vperm.slane %v470_v11, 0 }
  0xb5   :  { %v1027_v40 = vpack.c.bf16 %v158_v6, %v157_v56 }
  0xb6   :  { %v2208_v14 = vperm.slane %v102_v22, 0  ;;  %vm478_vm6 = vcmp.eq.s32.totalorder %v2196_v0, 1 }
  0xb7   :  { %1028 = vmatpush.bf16.msk.msra.mxu2 %vm1026_vm14, %v1027_v40  ;;  %vm1001_vm14 = vmpackc.low %vm542_vm5, %vm478_vm6 }
  0xb8   :  { %v2182_v34 = vpop.permute.xlu1 %1271  ;;  %v1322_v12 = vpop.permute.xlu2 %1321  ;;  %vm110_vm4 = vcmp.eq.s32.totalorder %v2208_v14, 1  ;;  %v1052_v14 = vpack.c.bf16 %v1831_v33, %v1449_v4 }
  0xb9   :  { %3063 = vst [vmem:[#allocation11_spill] sm:$0xff] %v2182_v34  ;;  %v2977_v5 = vunpack.i.h.bf16 %v2182_v34  ;;  %v2976_v45 = vunpack.i.l.bf16 %v2182_v34  ;;  %v2187_v8 = vpop.permute.xlu0 %1266  ;;  %v1324_v56 = vunpack.i.h.bf16 %v1322_v12  ;;  %v1323_v6 = vunpack.i.l.bf16 %v1322_v12  ;;  %vm1029_vm2 = vmpackc.low %vm184_vm15, %vm110_vm4 }
  0xba   :  { %v2978_v49 = vunpack.i.h.bf16 %v2187_v8  ;;  %v3086_v26 = vunpack.i.h.bf16 %v2187_v8  ;;  %v3088_v51 = vunpack.i.l.bf16 %v2182_v34  ;;  %v3093_v34 = vunpack.i.h.bf16 %v2152_v52 }
  0xbb   :  { %v458_v40 = vsel %vm453_vm10, %v2976_v45, %v2975_v16  ;;  %v2214_v11 = vsel %vm3065_vm8, %v3064_v2, %v1323_v6  ;;  %v2980_v16 = vunpack.i.l.bf16 %v2105_v59  ;;  %v2227_v22 = vsel %vm3069_vm9, %v1323_v6, %v3068_v41  ;;  %vm1004_vm8 = vmpackc.low %vm478_vm6, %vm478_vm6 }
  0xbc   :  { %v457_v12 = vsel %vm453_vm10, %v2978_v49, %v2977_v5  ;;  %v2221_v5 = vsel %vm3067_vm0, %v3066_v31, %v1324_v56  ;;  %v3070_v2 = vunpack.i.l.bf16 %v1947_v43  ;;  %v3072_v41 = vunpack.i.h.bf16 %v2105_v59 }
  0xbd   :  { %v1045_v45 = vpack.c.bf16 %v458_v40, %v457_v12  ;;  %v175_v31 = vperm.slane %v2097_v63, 0  ;;  %vm3091_vm0 = vcmp.lt.s32.totalorder %v1711_v18, 127 }
  0xbe   :  { %v2235_v40 = vsel %vm3071_vm12, %v1324_v56, %v3070_v2  ;;  %v156_v2 = vsel %vm149_vm1, %v2980_v16, %v3072_v41  ;;  %v3074_v41 = vunpack.i.l.bf16 %v2187_v8  ;;  %vm3094_vm9 = vmmov %vm3091_vm0  ;;  %vm3095_vm12 = vcmp.eq.s32.totalorder %v1715_v20, 1 }
  0xbf   :  { %1046 = vmatpush.bf16.msk.msra.mxu3 %vm1044_vm3, %v1045_v45  ;;  %v2293_v13 = vperm.slane %v175_v31, 0  ;;  %vm3084_vm3 = vcmp.lt.s32.totalorder %v1711_v18, 1  ;;  %vm1047_vm6 = vmpackc.low %vm3095_vm12, %vm3095_vm12  ;;  %v343_v20 = vperm.slane %v1677_v60, 4 }
  0xc0   :  { %v2240_v46 = vpop.permute.xlu1 %1286  ;;  %v2245_v6 = vpop.permute.xlu2 %1336  ;;  %v462_v16 = vsel %vm453_vm10, %v3074_v41, %v3073_v53 }
  0xc1   :  { %v2981_v43 = vunpack.i.h.bf16 %v2240_v46  ;;  %v2982_v56 = vunpack.i.l.bf16 %v2240_v46  ;;  %v2249_v45 = vpop.permute.xlu0 %1281  ;;  %vm183_vm5 = vcmp.eq.s32.totalorder %v2293_v13, 1  ;;  %v3128_v13 = vunpack.i.h.bf16 %v2101_v39 }
  0xc2   :  { %v2984_v49 = vunpack.i.l.bf16 %v2249_v45  ;;  %vm986_vm15 = vmpackc.low %vm183_vm5, %vm183_vm5 }
  0xc3   :  { %v83_v12 = vsel %vm74_vm7, %v2982_v56, %v2981_v43  ;;  %v3076_v43 = vunpack.i.h.bf16 %v2249_v45  ;;  %v3077_v56 = vunpack.i.l.bf16 %v1959_v36 }
  0xc4   :  { %v525_v58 = vsel %vm518_vm11, %v2984_v49, %v3075_v50  ;;  %v1030_v37 = vpack.c.bf16 %v156_v2, %v83_v12 }
  0xc5   :  { %v2291_v53 = vsel %vm518_vm11, %v3077_v56, %v3076_v43  ;;  %v1002_v41 = vpack.c.bf16 %v525_v58, %v462_v16  ;;  %v3079_v16 = vunpack.i.l.bf16 %v2156_v1  ;;  %v3080_v56 = vunpack.i.h.bf16 %v2156_v1 }
  0xc6   :  { %1031 = vmatpush.bf16.msk.msra.mxu2 %vm1029_vm2, %v1030_v37  ;;  %v3087_v1 = vunpack.i.h.bf16 %v2043_v7  ;;  %v3090_v7 = vunpack.i.l.bf16 %v2152_v52  ;;  %vm3098_vm2 = vmmov %vm3084_vm3 }
  0xc7   :  { %1003 = vmatpush.bf16.msk.msra.mxu1 %vm1001_vm14, %v1002_v41  ;;  %v3081_v41 = vunpack.i.h.bf16 %v1959_v36  ;;  %vm3099_vm14 = vcmask 1043456  }
  0xc8   :  { %v2295_v50 = vpop.permute.xlu1 %1301  ;;  %v2297_v49 = vpop.permute.xlu2 %1351  ;;  %v460_v57 = vsel %vm453_vm10, %v3087_v1, %v3086_v26  ;;  %vm3106_vm12 = vmmov %vm3099_vm14 }
  0xc9   :  { %v2299_v54 = vpop.permute.xlu0 %1296  ;;  %v2989_v12 = vunpack.i.l.bf16 %v2297_v49  ;;  %v3082_v36 = vunpack.i.h.bf16 %v2295_v50  ;;  %v3097_v0 = vunpack.i.l.bf16 %v2295_v50 }
  0xca   :  { %3078 = vst [vmem:[#allocation12_spill] sm:$0xff] %v2299_v54  ;;  %v2986_v2 = vunpack.i.h.bf16 %v2299_v54  ;;  %v2985_v43 = vunpack.i.l.bf16 %v2299_v54  ;;  %v3083_v54 = vunpack.i.h.bf16 %v1900_v30 }
  0xcb   :  { %v2327_v58 = vsel %vm518_vm11, %v3081_v41, %v2989_v12 }
  0xcc   :  { %v160_v31 = vsel %vm149_vm1, %v2985_v43, %v3079_v16  ;;  %v161_v37 = vsel %vm149_vm1, %v2986_v2, %v3080_v56  ;;  %v536_v56 = vperm.slane %v1888_v29, 4  ;;  %v2336_v2 = vld [vmem:[%s2925_s2] sm:$0xff]  ;;  %v3112_v33 = vpack.c.bf16 %v2327_v58, %v2291_v53 }
  0xcd   :  { %v987_v16 = vpack.c.bf16 %v161_v37, %v160_v31  ;;  %v2344_v31 = vsel %vm3084_vm3, %v3083_v54, %v3082_v36  ;;  %v676_v54 = vpack.c.bf16 %v2015_v28, %v2015_v28 }
  0xce   :  { %3085 = vst [vmem:[#allocation13_spill] sm:$0xff] %v2344_v31  ;;  %v540_v36 = vperm.slane %v536_v56, 0 }
  0xcf   :  { %988 = vmatpush.bf16.msk.msra.mxu0 %vm986_vm15, %v987_v16  ;;  %v685_v16 = vunpack.c.h.b16 %v2336_v2  ;;  %vm689_vm15 = vcmask 719872  }
  0xd0   :  { %v2349_v12 = vpop.permute.xlu1 %1316  ;;  %v2353_v43 = vpop.permute.xlu2 %1366  ;;  %vm544_vm3 = vcmp.eq.s32.totalorder %v540_v36, 1 }
  0xd1   :  { %v2356_v30 = vpop.permute.xlu0 %1311  ;;  %v3089_v31 = vunpack.i.l.bf16 %v2349_v12 }
  0xd2   :  { %v2998_v37 = vunpack.i.l.bf16 %v2356_v30  ;;  %v3092_v1 = vunpack.i.h.bf16 %v2356_v30 }
  0xd3   :  { %v461_v28 = vsel %vm453_vm10, %v3089_v31, %v3088_v51  ;;  %v701_v31 = vsel %vm3099_vm14, %v676_v54, 0  ;;  %v3100_v54 = vunpack.i.l.bf16 %v2353_v43 }
  0xd4   :  { %v1005_v41 = vpack.c.bf16 %v461_v28, %v460_v57  ;;  %v394_v26 = vsel %vm3091_vm0, %v3090_v7, %v2998_v37  ;;  %v395_v51 = vsel %vm3094_vm9, %v3093_v34, %v3092_v1  ;;  %v3096_v57 = vunpack.i.h.bf16 %v1891_v23  ;;  %vm1078_vm0 = vmpackc.low %vm544_vm3, %vm544_vm3 }
  0xd5   :  { %v1048_v7 = vpack.c.bf16 %v395_v51, %v394_v26  ;;  %v472_v28 = vperm.slane %v2031_v48, 4  ;;  %v101_v34 = vperm.slane %v2178_v10, 0  ;;  %v407_v1 = vperm.slane %v1680_v62, 4 }
  0xd6   :  { %v2400_v56 = vsel %vm3098_vm2, %v3097_v0, %v3096_v57  ;;  %1006 = vmatpush.bf16.msk.msra.mxu1 %vm1004_vm8, %v1005_v41  ;;  %v2407_v37 = vpack.c.b16 %v685_v16, %v685_v16  ;;  %v537_v23 = vperm.slane %v1888_v29, 6  ;;  %v3101_v51 = vunpack.i.h.bf16 %v2150_v17  ;;  %vm1075_vm8 = vmpackc.low %vm608_vm13, %vm608_vm13 }
  0xd7   :  { %1049 = vmatpush.bf16.msk.msra.mxu3 %vm1047_vm6, %v1048_v7  ;;  %v677_v16 = vpack.c.bf16 %v2019_v32, %v2019_v32  ;;  %v2436_v61 = vperm.slane %v101_v34, 0  ;;  %v684_v32 = vunpack.c.l.b16 %v2336_v2  ;;  %v3003_v29 = vunpack.i.h.bf16 %v2349_v12  ;;  %vm1032_vm13 = vmpackc.low %vm110_vm4, %vm110_vm4 }
  0xd8   :  { %v2418_v41 = vsel %vm149_vm1, %v3101_v51, %v3100_v54  ;;  %v2420_v57 = vpop.permute.xlu1 %1331  ;;  %v2432_v54 = vperm.slane %v472_v28, 0  ;;  %v2442_v0 = vperm.slane %v343_v20, 0  ;;  %v2444_v27 = vperm.slane %v407_v1, 0 }
  0xd9   :  { %v2427_v26 = vpop.permute.xlu0 %1326  ;;  %v2446_v7 = vperm.slane %v537_v23, 0  ;;  %v3002_v28 = vunpack.i.h.bf16 %v2297_v49  ;;  %v3103_v34 = vunpack.i.l.bf16 %v2420_v57  ;;  %v3104_v20 = vunpack.i.h.bf16 %v2420_v57 }
  0xda   :  { %v3000_v51 = vunpack.i.l.bf16 %v2427_v26  ;;  %1050 = vmatmul.msk.bf16.vlgmr.msra.gmra.mxu3 %vm689_vm15, %v2407_v37  ;;  %v3105_v1 = vunpack.i.h.bf16 %v2427_v26  ;;  %vm3001_vm9 = vcmp.eq.s32.totalorder %v2432_v54, 1  ;;  %vm109_vm4 = vcmp.eq.s32.totalorder %v2436_v61, 1 }
  0xdb   :  { %773 = vmatpush.bf16.msrb.mxu3 %v701_v31  ;;  %v3102_v31 = vpack.c.bf16 %v2221_v5, %v2214_v11  ;;  %v473_v5 = vperm.slane %v2031_v48, 6  ;;  %v3109_v48 = vunpack.i.h.bf16 %v2109_v38  ;;  %vm351_vm6 = vcmp.eq.s32.totalorder %v2442_v0, 1  ;;  %vm2510_vm2 = vmpackc.low %vm544_vm3, %vm3001_vm9 }
  0xdc   :  { %v81_v2 = vsel %vm74_vm7, %v3000_v51, %v3103_v34  ;;  %v82_v23 = vsel %vm74_vm7, %v3105_v1, %v3104_v20  ;;  %v3107_v34 = vunpack.i.l.bf16 %v2240_v46  ;;  %v3108_v51 = vunpack.i.l.bf16 %v2245_v6 }
  0xdd   :  { %v1033_v11 = vpack.c.bf16 %v82_v23, %v81_v2  ;;  %v2480_v1 = vpack.c.b16 %v684_v32, %v684_v32  ;;  %v3110_v2 = vunpack.i.l.bf16 %v2101_v39  ;;  %v3113_v32 = vunpack.i.h.bf16 %v1896_v19 }
  0xde   :  { %v86_v20 = vsel %vm74_vm7, %v3108_v51, %v3107_v34  ;;  %v3111_v51 = vunpack.i.h.bf16 %v2249_v45  ;;  %vm415_vm14 = vcmp.eq.s32.totalorder %v2444_v27, 1  ;;  %v2516_v53 = vperm.slane %v473_v5, 0  ;;  %v3175_v27 = vld [vmem:[#allocation3_spill] sm:$0xff] }
  0xdf   :  { %1077 = vmatpush.bf16.msk.msrb.mxu3 %vm1075_vm8, %v3102_v31  ;;  %v704_v31 = vsel %vm3106_vm12, %v677_v16, 0  ;;  %1034 = vmatpush.bf16.msk.msra.mxu2 %vm1032_vm13, %v1033_v11  ;;  %v456_v16 = vsel %vm453_vm10, %v3109_v48, %v3003_v29  ;;  %v519_v23 = vsel %vm518_vm11, %v3113_v32, %v3002_v28  ;;  %vm545_vm8 = vcmp.eq.s32.totalorder %v2446_v7, 1 }
  0xe0   :  { %v529_v4 = vsel %vm518_vm11, %v3111_v51, %v3110_v2  ;;  %v2499_v38 = vpop.permute.xlu1 %1346  ;;  %vm3116_vm13 = vcmp.eq.s32.totalorder %v1937_v55, 1  ;;  %v316_v34 = vperm.slane %v1724_v24, 4  ;;  %v344_v48 = vperm.slane %v1677_v60, 6 }
  0xe1   :  { %v1349_v58 = vunpack.i.h.bf16 %v2499_v38  ;;  %v1348_v19 = vunpack.i.l.bf16 %v2499_v38  ;;  %v1082_v51 = vpack.c.bf16 %v519_v23, %v456_v16  ;;  %vm3119_vm3 = vcmp.eq.s32.totalorder %v1751_v44, 1 }
  0xe2   :  { %vm2536_vm12 = vmpackc.low %vm3119_vm3, %vm3119_vm3  ;;  %v408_v55 = vperm.slane %v1680_v62, 6  ;;  %740 = vmatmul.bf16.vlgmr.msra.gmra.mxu2 %v2480_v1  ;;  %v3124_v16 = vunpack.i.l.bf16 %v2152_v52  ;;  %vm3125_vm3 = vcmp.lt.s32.totalorder %v1711_v18, 127  ;;  %v3126_v32 = vunpack.i.h.bf16 %v2152_v52 }
  0xe3   :  { %1080 = vmatpush.bf16.msk.msrb.mxu3 %vm1078_vm0, %v3112_v33  ;;  %799 = vmatpush.bf16.msrb.mxu2 %v704_v31  ;;  %v2520_v31 = vpop.permute.xlu0 %1341  ;;  %vm2525_vm0 = vmpackc.low %vm3116_vm13, %vm3116_vm13  ;;  %v3129_v23 = vunpack.i.l.bf16 %v2297_v49  ;;  %v251_v29 = vperm.slane %v1839_v42, 4  ;;  %v3130_v52 = vpack.c.bf16 %v2235_v40, %v2227_v22  ;;  %v3132_v11 = vunpack.i.l.bf16 %v2150_v17  ;;  %v35_v40 = vld [vmem:[%s2926_s3] sm:$0xff] }
  0xe4   :  { %v1344_v5 = vunpack.i.h.bf16 %v2520_v31  ;;  %v1343_v2 = vunpack.i.l.bf16 %v2520_v31  ;;  %vm2546_vm13 = vmpackc.low %vm183_vm5, %vm109_vm4  ;;  %v397_v44 = vsel %vm3125_vm3, %v1348_v19, %v3124_v16  ;;  %v3131_v16 = vunpack.i.l.bf16 %v2105_v59  ;;  %680 = vperm.xlu0 %1385, %v35_v40  }
  0xe5   :  { %vm3127_vm9 = vmmov %vm3125_vm3  ;;  %v530_v28 = vsel %vm518_vm11, %v3129_v23, %v3128_v13  ;;  %v3134_v13 = vunpack.i.h.bf16 %v2349_v12  ;;  %v348_v23 = vperm.slane %v344_v48, 0  ;;  %v2615_v33 = vperm.slane %v251_v29, 0 }
  0xe6   :  { %v398_v62 = vsel %vm3127_vm9, %v1349_v58, %v3126_v32  ;;  %v159_v39 = vsel %vm149_vm1, %v1343_v2, %v3131_v16  ;;  %vm1051_vm5 = vmpackc.low %vm415_vm14, %vm351_vm6  ;;  %v2590_v22 = vsel %vm149_vm1, %v3132_v11, %v1344_v5  ;;  %v1119_v17 = vpack.c.bf16 %v530_v28, %v529_v4 }
  0xe7   :  { %1083 = vmatpush.bf16.msk.msrb.mxu3 %vm2510_vm2, %v1082_v51  ;;  %1117 = vmatpush.bf16.msk.msrb.mxu2 %vm2525_vm0, %v3130_v52  ;;  %v1008_v32 = vpack.c.bf16 %v398_v62, %v397_v44  ;;  %v990_v36 = vpack.c.bf16 %v159_v39, %v86_v20  ;;  %vm1118_vm9 = vmpackc.low %vm545_vm8, %vm545_vm8  ;;  %vm481_vm2 = vcmp.eq.s32.totalorder %v2516_v53, 1  ;;  %v320_v51 = vperm.slane %v316_v34, 0 }
  0xe8   :  { %v1067_v44 = vpack.c.bf16 %v2418_v41, %v2590_v22  ;;  %v3133_v62 = vunpack.i.l.bf16 %v2187_v8  ;;  %v2609_v52 = vperm.slane %v408_v55, 0  ;;  %v1055_v34 = vpack.c.bf16 %v1496_v21, %v1461_v9  ;;  %v2618_v8 = vpop.permute.xlu1 %1361  ;;  %vm1054_vm0 = vmpackc.low %vm351_vm6, %vm351_vm6 }
  0xe9   :  { %1009 = vmatpush.bf16.msk.msra.mxu1 %vm2536_vm12, %v1008_v32  ;;  %991 = vmatpush.bf16.msk.msra.mxu0 %vm2546_vm13, %v990_v36  ;;  %v1339_v28 = vunpack.i.h.bf16 %v2245_v6  ;;  %v3135_v4 = vunpack.i.l.bf16 %v2249_v45  ;;  %v3136_v48 = vunpack.i.h.bf16 %v2297_v49  ;;  %v3137_v9 = vunpack.i.l.bf16 %v2295_v50  ;;  %vm1121_vm6 = vmpackc.low %vm545_vm8, %vm481_vm2 }
  0xea   :  { %v465_v20 = vsel %vm453_vm10, %v3134_v13, %v3133_v62  ;;  %v3138_v21 = vunpack.i.h.bf16 %v1611_v47  ;;  %vm3139_vm12 = vcmp.lt.s32.totalorder %v1711_v18, 1  ;;  %v317_v55 = vperm.slane %v1724_v24, 6 }
  0xeb   :  { %1120 = vmatpush.bf16.msk.msrb.mxu2 %vm1118_vm9, %v1119_v17  ;;  %v1369_v0 = vunpack.i.h.bf16 %v2353_v43  ;;  %v2637_v60 = vpop.permute.xlu0 %1356  ;;  %vm352_vm13 = vcmp.eq.s32.totalorder %v348_v23, 1  ;;  %vm416_vm3 = vcmp.eq.s32.totalorder %v2609_v52, 1  ;;  %vm259_vm8 = vcmp.eq.s32.totalorder %v2615_v33, 1 }
  0xec   :  { %v303_v29 = vsel %vm3139_vm12, %v3138_v21, %v3137_v9  ;;  %1010 = vmatmul.msk.bf16.vlgmr.msra.gmra.mxu1 %vm689_vm15, %v2407_v37  ;;  %v1359_v47 = vunpack.i.h.bf16 %v2637_v60  ;;  %v1358_v45 = vunpack.i.l.bf16 %v2637_v60  ;;  %v177_v16 = vperm.slane %v2097_v63, 4  ;;  %vm1091_vm9 = vmpackc.low %vm416_vm3, %vm352_vm13 }
  0xed   :  { %1053 = vmatpush.bf16.msk.msrb.mxu1 %vm1051_vm5, %v1052_v14  ;;  %v528_v14 = vsel %vm518_vm11, %v3136_v48, %v3135_v4  ;;  %vm324_vm11 = vcmp.eq.s32.totalorder %v320_v51, 1  ;;  %vm2651_vm5 = vmpackc.low %vm109_vm4, %vm109_vm4  ;;  %v1058_v7 = vpack.c.bf16 %v303_v29, %v1883_v3  ;;  %v252_v39 = vperm.slane %v1839_v42, 6  ;;  %v3146_v29 = vld [vmem:[#allocation9_spill] sm:$0xff] }
  0xee   :  { %v1122_v49 = vpack.c.bf16 %v528_v14, %v465_v20  ;;  %v3142_v32 = vunpack.i.l.bf16 %v2427_v26  ;;  %v3143_v11 = vunpack.i.h.bf16 %v2427_v26  ;;  %vm1057_vm4 = vmpackc.low %vm324_vm11, %vm324_vm11  ;;  %v2673_v40 = vperm.slane %v317_v55, 0  ;;  %v947_v14 = vld [vmem:[%s2927_s5] sm:$0xf] }
  0xef   :  { %v2679_v42 = vsel %vm149_vm1, %v1369_v0, %v1343_v2  ;;  %v1364_v36 = vunpack.i.h.bf16 %v2618_v8  ;;  %v1363_v26 = vunpack.i.l.bf16 %v2618_v8  ;;  %v3144_v62 = vunpack.i.l.bf16 %v2245_v6  ;;  %950 = vperm.xlu0 %1385, %v947_v14   ;;  %vm1094_vm12 = vmpackc.low %vm352_vm13, %vm352_vm13  ;;  %v3161_v14 = vld [vmem:[#allocation8_spill] sm:$0xff] }
  0xf0   :  { %1123 = vmatpush.bf16.msk.msrb.mxu2 %vm1121_vm6, %v1122_v49  ;;  %v84_v61 = vsel %vm74_vm7, %v1339_v28, %v3142_v32  ;;  %v85_v3 = vsel %vm74_vm7, %v1358_v45, %v3143_v11  ;;  %v1092_v2 = vpack.c.bf16 %v1835_v35, %v1506_v25  ;;  %v2702_v4 = vperm.slane %v252_v39, 0  ;;  %v1377_v9 = vpop.permute.xlu1 %1376  ;;  %v3145_v25 = vld [vmem:[#allocation2_spill] sm:$0xff]  ;;  %v3154_v32 = vld [vmem:[#allocation13_spill] sm:$0xff] }
  0xf1   :  { %1056 = vmatpush.bf16.msk.msrb.mxu1 %vm1054_vm0, %v1055_v34  ;;  %v993_v17 = vpack.c.bf16 %v85_v3, %v84_v61  ;;  %v2692_v13 = vsel %vm74_vm7, %v1359_v47, %v3144_v62  ;;  %v2700_v34 = vperm.slane %v177_v16, 0  ;;  %v103_v48 = vperm.slane %v2178_v10, 4  ;;  %vm1060_vm0 = vmpackc.low %vm324_vm11, %vm259_vm8  ;;  %v3155_v61 = vld [vmem:[#allocation6_spill] sm:$0xff] }
  0xf2   :  { %v1110_v20 = vpack.c.bf16 %v2679_v42, %v2692_v13  ;;  %v1095_v35 = vpack.c.bf16 %v3145_v25, %v1478_v15  ;;  %v3147_v55 = vunpack.i.l.bf16 %v3146_v29  ;;  %vm3148_vm6 = vcmp.lt.s32.totalorder %v1711_v18, 15  ;;  %v3181_v39 = vld [vmem:[#allocation10_spill] sm:$0xff] }
  0xf3   :  { %994 = vmatpush.bf16.msk.msra.mxu0 %vm2651_vm5, %v993_v17  ;;  %v1372_v21 = vpop.permute.xlu0 %1371  ;;  %v3149_v51 = vunpack.i.h.bf16 %v3146_v29  ;;  %vm3150_vm11 = vmmov %vm3148_vm6  ;;  %vm325_vm5 = vcmp.eq.s32.totalorder %v2673_v40, 1  ;;  %v1379_v15 = vunpack.i.h.bf16 %v1377_v9  ;;  %v1378_v23 = vunpack.i.l.bf16 %v1377_v9  ;;  %v3159_v17 = vld [vmem:[#allocation11_spill] sm:$0xff] }
  0xf4   :  { %v227_v49 = vsel %vm3148_vm6, %v3147_v55, %v1363_v26  ;;  %v1373_v16 = vunpack.i.l.bf16 %v1372_v21  ;;  %vm3151_vm13 = vcmp.eq.s32.totalorder %v2432_v54, 1  ;;  %v3156_v11 = vpack.c.bf16 %v3154_v32, %v3155_v61 }
  0xf5   :  { %1059 = vmatpush.bf16.msk.msrb.mxu1 %vm1057_vm4, %v1058_v7  ;;  %v228_v24 = vsel %vm3150_vm11, %v3149_v51, %v1364_v36  ;;  %v1374_v7 = vunpack.i.h.bf16 %v1372_v21  ;;  %vm2732_vm4 = vmpackc.low %vm3151_vm13, %vm3151_vm13  ;;  %vm185_vm6 = vcmp.eq.s32.totalorder %v2700_v34, 1  ;;  %vm260_vm11 = vcmp.eq.s32.totalorder %v2702_v4, 1 }
  0xf6   :  { %714 = vmatmul.bf16.vlgmr.msra.gmra.mxu0 %v2480_v1  ;;  %v107_v54 = vperm.slane %v103_v48, 0  ;;  %v3160_v62 = vunpack.i.h.bf16 %v3159_v17  ;;  %v3162_v9 = vunpack.i.l.bf16 %v3161_v14  ;;  %v3163_v25 = vunpack.i.h.bf16 %v3161_v14  ;;  %v3183_v14 = vld [vmem:[#allocation7_spill] sm:$0xff] }
  0xf7   :  { %1093 = vmatpush.bf16.msk.msrb.mxu0 %vm1091_vm9, %v1092_v2  ;;  %vm2742_vm9 = vmpackc.low %vm481_vm2, %vm481_vm2  ;;  %v3164_v29 = vunpack.i.l.bf16 %v2349_v12  ;;  %v1064_v32 = vpack.c.bf16 %v228_v24, %v227_v49  ;;  %v3167_v12 = vunpack.i.l.bf16 %v2356_v30  ;;  %v3169_v33 = vunpack.i.h.bf16 %v2356_v30  ;;  %v1382_v24 = vpop.permute.xlu2 %1381 }
  0xf8   :  { %v454_v2 = vsel %vm453_vm10, %v3160_v62, %v1373_v16  ;;  %v455_v53 = vsel %vm453_vm10, %v3162_v9, %v1374_v7  ;;  %v463_v21 = vsel %vm453_vm10, %v1373_v16, %v3163_v25  ;;  %vm2767_vm2 = vmpackc.low %vm259_vm8, %vm259_vm8  ;;  %v178_v16 = vperm.slane %v2097_v63, 6 }
  0xf9   :  { %1062 = vmatpush.bf16.msk.msrb.mxu1 %vm1060_vm0, %v3156_v11  ;;  %v464_v48 = vsel %vm453_vm10, %v1374_v7, %v3164_v29  ;;  %v1085_v55 = vpack.c.bf16 %v455_v53, %v454_v2  ;;  %vm1097_vm0 = vmpackc.low %vm325_vm5, %vm325_vm5  ;;  %vm3168_vm10 = vcmp.lt.s32.totalorder %v1711_v18, 127  ;;  %v3176_v11 = vunpack.i.l.bf16 %v3175_v27 }
  0xfa   :  { %v1125_v51 = vpack.c.bf16 %v464_v48, %v463_v21  ;;  %v391_v7 = vsel %vm3168_vm10, %v3167_v12, %v1378_v23  ;;  %vm3170_vm8 = vmmov %vm3168_vm10  ;;  %v182_v17 = vperm.slane %v178_v16, 0  ;;  %v104_v62 = vperm.slane %v2178_v10, 6  ;;  %v3186_v10 = vld [vmem:[#allocation5_spill] sm:$0xff] }
  0xfb   :  { %1096 = vmatpush.bf16.msk.msrb.mxu0 %vm1094_vm12, %v1095_v35  ;;  %v392_v61 = vsel %vm3170_vm8, %v3169_v33, %v1379_v15  ;;  %vm2786_vm12 = vmpackc.low %vm415_vm14, %vm415_vm14  ;;  %1086 = vmatpush.bf16.msk.msrb.mxu3 %vm2732_vm4, %v1085_v55  ;;  %v3182_v2 = vunpack.i.h.bf16 %v2240_v46  ;;  %v3184_v9 = vunpack.i.h.bf16 %v3183_v14  ;;  %v3187_v25 = vunpack.i.l.bf16 %v3186_v10 }
  0xfc   :  { %vm3173_vm13 = vmmov %vm3170_vm8  ;;  %1126 = vmatpush.bf16.msk.msrb.mxu2 %vm2742_vm9, %v1125_v51  ;;  %v1088_v52 = vpack.c.bf16 %v392_v61, %v391_v7  ;;  %vm111_vm9 = vcmp.eq.s32.totalorder %v107_v54, 1  ;;  %v3189_v46 = vunpack.i.h.bf16 %v2105_v59  ;;  %v108_v41 = vperm.slane %v104_v62, 0 }
  0xfd   :  { %v400_v63 = vsel %vm3173_vm13, %v1378_v23, %v1348_v19  ;;  %vm3174_vm10 = vmmov %vm3170_vm8  ;;  %v3177_v19 = vunpack.i.h.bf16 %v2295_v50  ;;  %vm3178_vm8 = vcmp.lt.s32.totalorder %v1711_v18, 1  ;;  %1065 = vmatpush.bf16.msk.msrb.mxu1 %vm2767_vm2, %v1064_v32  ;;  %v1384_v50 = vunpack.i.h.bf16 %v1382_v24 }
  0xfe   :  { %v401_v30 = vsel %vm3174_vm10, %v1379_v15, %v1349_v58  ;;  %vm1127_vm14 = vmpackc.low %vm416_vm3, %vm416_vm3  ;;  %v3179_v58 = vld [vmem:[#allocation4_spill] sm:$0xff]  ;;  %v80_v40 = vsel %vm74_vm7, %v3182_v2, %v1359_v47  ;;  %v153_v47 = vsel %vm149_vm1, %v3189_v46, %v1369_v0  ;;  %v3190_v22 = vunpack.i.l.bf16 %v2420_v57 }
  0xff   :  { %v298_v38 = vsel %vm3178_vm8, %v3177_v19, %v3176_v11  ;;  %v3180_v15 = vpack.c.bf16 %v2400_v56, %v3179_v58  ;;  %vm1066_vm4 = vmpackc.low %vm185_vm6, %vm185_vm6  ;;  %v1128_v23 = vpack.c.bf16 %v401_v30, %v400_v63  ;;  %v1383_v56 = vunpack.i.l.bf16 %v1382_v24  ;;  %1089 = vmatpush.bf16.msk.msrb.mxu3 %vm2786_vm12, %v1088_v52 }
 0x100   :  { %vm1100_vm3 = vmpackc.low %vm325_vm5, %vm260_vm11  ;;  %v1101_v3 = vpack.c.bf16 %v298_v38, %v3181_v39  ;;  %vm3185_vm5 = vcmp.lt.s32.totalorder %v1711_v18, 15  ;;  %v1070_v8 = vpack.c.bf16 %v153_v47, %v80_v40  ;;  %v3195_v29 = vunpack.i.l.bf16 %v2353_v43 }
 0x101   :  { %1099 = vmatpush.bf16.msk.msrb.mxu0 %vm1097_vm0, %v3180_v15  ;;  %1129 = vmatpush.bf16.msk.msrb.mxu2 %vm1127_vm14, %v1128_v23  ;;  %v224_v53 = vsel %vm3185_vm5, %v1363_v26, %v3184_v9  ;;  %vm3188_vm2 = vmmov %vm3185_vm5  ;;  %v78_v59 = vsel %vm74_vm7, %v3190_v22, %v1383_v56  ;;  %v3192_v26 = vld [vmem:[#allocation12_spill] sm:$0xff]  ;;  %vm112_vm13 = vcmp.eq.s32.totalorder %v108_v41, 1  ;;  %v76_v43 = vsel %vm74_vm7, %v1384_v50, %v1358_v45 }
 0x102   :  { %v225_v21 = vsel %vm3188_vm2, %v1364_v36, %v3187_v25  ;;  %1068 = vmatpush.bf16.msk.msrb.mxu1 %vm1066_vm4, %v1067_v44  ;;  %vm1069_vm0 = vmpackc.low %vm185_vm6, %vm111_vm9  ;;  %1090 = vmatmul.msk.bf16.vlgmr.msrb.gmra.mxu3 %vm689_vm15, %v2407_v37  ;;  %vm186_vm6 = vcmp.eq.s32.totalorder %v182_v17, 1  ;;  %v3191_v44 = vunpack.i.h.bf16 %v2420_v57  ;;  %v3193_v34 = vunpack.i.l.bf16 %v3192_v26 }
 0x103   :  { %vm1103_vm12 = vmpackc.low %vm260_vm11, %vm260_vm11  ;;  %v1104_v36 = vpack.c.bf16 %v225_v21, %v224_v53  ;;  %vm3196_vm2 = vcmask 1043456  }
 0x104   :  { %1130 = vmatmul.msk.bf16.vlgmr.msrb.gmra.mxu2 %vm689_vm15, %v2407_v37  ;;  %v79_v0 = vsel %vm74_vm7, %v3191_v44, %v1384_v50  ;;  %v151_v4 = vsel %vm149_vm1, %v1344_v5, %v3193_v34  ;;  %vm1072_vm15 = vmpackc.low %vm111_vm9, %vm111_vm9  ;;  %v3194_v37 = vunpack.i.h.bf16 %v3192_v26  ;;  %v75_v5 = vsel %vm74_vm7, %v1383_v56, %v1339_v28 }
 0x105   :  { %1102 = vmatpush.bf16.msk.msrb.mxu0 %vm1100_vm3, %v1101_v3  ;;  %vm1106_vm11 = vmpackc.low %vm186_vm6, %vm186_vm6  ;;  %v1073_v48 = vpack.c.bf16 %v79_v0, %v78_v59  ;;  %v1113_v54 = vpack.c.bf16 %v76_v43, %v75_v5 }
 0x106   :  { %1071 = vmatpush.bf16.msk.msrb.mxu1 %vm1069_vm0, %v1070_v8  ;;  %v152_v57 = vsel %vm149_vm1, %v3195_v29, %v3194_v37  ;;  %vm1109_vm10 = vmpackc.low %vm186_vm6, %vm112_vm13 }
 0x107   :  { %v1107_v31 = vpack.c.bf16 %v152_v57, %v151_v4  ;;  %vm1112_vm1 = vmpackc.low %vm112_vm13, %vm112_vm13 }
 0x108   :  { %vm3197_vm0 = vmmov %vm3196_vm2 }
 0x109   :  { %1105 = vmatpush.bf16.msk.msrb.mxu0 %vm1103_vm12, %v1104_v36  ;;  %vm3198_vm12 = vmmov %vm3197_vm0 }
 0x10a   :  { %1074 = vmatpush.bf16.msk.msrb.mxu1 %vm1072_vm15, %v1073_v48  ;;  %vm3199_vm6 = vmmov %vm3197_vm0  ;;  %vm865_vm15 = vcmask 64512  }
 0x10b   :  { %vm3201_vm13 = vmmov %vm3197_vm0 }
 0x10d   :  { %1108 = vmatpush.bf16.msk.msrb.mxu0 %vm1106_vm11, %v1107_v31  ;;  %766 = vmatmul.bf16.vlgmr.msrb.gmra.mxu1 %v2480_v1  ;;  %vm3200_vm11 = vmmov %vm3197_vm0 }
 0x111   :  { %1111 = vmatpush.bf16.msk.msrb.mxu0 %vm1109_vm10, %v1110_v20 }
 0x115   :  { %1114 = vmatpush.bf16.msk.msrb.mxu0 %vm1112_vm1, %v1113_v54 }
 0x118   :  { %792 = vmatmul.bf16.vlgmr.msrb.gmra.mxu0 %v2480_v1 }
 0x156   :  { %v681_v42 = vpop.permute.xlu0 %680 }
 0x15d   :  { %v754_v35 = vpop.f32.mrf.mxu3 }
 0x165   :  { %v741_v55 = vpop.f32.mrf.mxu2  ;;  %v756_v60 = vpop.f32.mrf.mxu3 }
 0x166   :  { %v742_v7 = vadd.f32 %v741_v55, %v681_v42 }
 0x168   :  { %v755_v61 = vadd.f32 %v754_v35, %v742_v7 }
 0x169   :  { %v728_v51 = vpop.f32.mrf.mxu1 }
 0x16a   :  { %v817_v24 = vmul.f32 %v755_v61, %v755_v61 }
 0x16d   :  { %v743_v32 = vpop.f32.mrf.mxu2 }
 0x171   :  { %v730_v45 = vpop.f32.mrf.mxu1 }
 0x173   :  { %v715_v16 = vpop.f32.mrf.mxu0 }
 0x174   :  { %v716_v6 = vadd.f32 %v715_v16, %v681_v42 }
 0x176   :  { %v729_v33 = vadd.f32 %v728_v51, %v716_v6  ;;  %v1397_v6 = vmov 839922192  }
 0x177   :  { %v953_v7 = vunpack.c.l.s4 %v1397_v6 }
 0x178   :  { %v816_v30 = vmul.f32 %v729_v33, %v729_v33  ;;  %v810_v58 = vadd.f32 %v755_v61, %v729_v33 }
 0x17a   :  { %v820_v23 = vadd.f32 %v817_v24, %v816_v30  ;;  %v934_v24 = vld [vmem:[%s2929_s6 + $0x8] sm:$0xff] }
 0x17b   :  { %v717_v12 = vpop.f32.mrf.mxu0 }
 0x185   :  { %v780_v13 = vpop.f32.mrf.mxu3 }
 0x187   :  { %v806_v20 = vpop.f32.mrf.mxu2 }
 0x18a   :  { %v767_v18 = vpop.f32.mrf.mxu1 }
 0x18b   :  { %v768_v28 = vadd.f32 %v767_v18, %v681_v42 }
 0x18d   :  { %v781_v49 = vadd.f32 %v780_v13, %v768_v28  ;;  %v782_v63 = vpop.f32.mrf.mxu3 }
 0x18e   :  { %v951_v63 = vpop.permute.xlu0 %950 }
 0x18f   :  { %v808_v1 = vpop.f32.mrf.mxu2  ;;  %v818_v19 = vmul.f32 %v781_v49, %v781_v49  ;;  %v811_v52 = vadd.f32 %v810_v58, %v781_v49 }
 0x190   :  { %v933_v1 = vld [vmem:[%s2929_s6] sm:$0xff] }
 0x191   :  { %v821_v3 = vadd.f32 %v820_v23, %v818_v19 }
 0x192   :  { %v769_v27 = vpop.f32.mrf.mxu1 }
 0x195   :  { %v793_v11 = vpop.f32.mrf.mxu0 }
 0x196   :  { %v794_v38 = vadd.f32 %v793_v11, %v681_v42 }
 0x198   :  { %v807_v15 = vadd.f32 %v806_v20, %v794_v38  ;;  %v860_v20 = vld [vmem:[%s2928_s4] sm:$0x3] }
 0x19a   :  { %v812_v50 = vadd.f32 %v811_v52, %v807_v15  ;;  %v819_v39 = vmul.f32 %v807_v15, %v807_v15 }
 0x19c   :  { %813 = vadd.xlane.f32.xlu1 %v812_v50  ;;  %v822_v17 = vadd.f32 %v821_v3, %v819_v39 }
 0x19d   :  { %v795_v62 = vpop.f32.mrf.mxu0 }
 0x19e   :  { %823 = vadd.xlane.f32.xlu2 %v822_v17 }
 0x20f   :  { %v814_v56 = vpop.xlane.xlu1 %813 }
 0x210   :  { %v815_v2 = vmul.f32 0.001953125, %v814_v56 }
 0x211   :  { %v824_v40 = vpop.xlane.xlu2 %823 }
 0x212   :  { %v825_v14 = vmul.f32 0.001953125, %v824_v40  ;;  %v826_v9 = vmul.f32 %v815_v2, %v815_v2  ;;  %v829_v22 = vsub.f32 %v729_v33, %v815_v2  ;;  %v830_v59 = vsub.f32 %v755_v61, %v815_v2 }
 0x213   :  { %v831_v44 = vsub.f32 %v781_v49, %v815_v2  ;;  %v832_v0 = vsub.f32 %v807_v15, %v815_v2  ;;  %v954_v61 = vunpack.c.0.s8 %v953_v7 }
 0x214   :  { %v827_v53 = vsub.f32 %v825_v14, %v826_v9 }
 0x215   :  { %v955_v19 = vperm.slane %v951_v63, %v954_v61 }
 0x216   :  { %v828_v10 = vmax.f32 %v827_v53, 0.0 }
 0x218   :  { %v833_v25 = vadd.f32 1e-05, %v828_v10 }
 0x21a   :  { %1386 = vrsqrt.f32 %v833_v25  ;;  %vm840_vm14 = vweird.f32 %v833_v25 }
 0x220   :  { %v1387_v21 = vpop.eup %1386 }
 0x221   :  { %v835_v46 = vmul.f32 %v1387_v21, %v833_v25  ;;  %vm841_vm7 = vweird.f32 %v1387_v21 }
 0x222   :  { %vm842_vm8 = vmor %vm840_vm14, %vm841_vm7 }
 0x223   :  { %v836_v47 = vmul.f32 %v1387_v21, %v835_v46 }
 0x225   :  { %v837_v8 = vmul.f32 0.5, %v836_v47 }
 0x227   :  { %v838_v36 = vsub.f32 1.5, %v837_v8 }
 0x229   :  { %v839_v41 = vmul.f32 %v1387_v21, %v838_v36 }
 0x22b   :  { %v843_v26 = vsel %vm842_vm8, %v1387_v21, %v839_v41 }
 0x22c   :  { %v844_v34 = vmul.f32 %v843_v26, %v829_v22  ;;  %v845_v4 = vmul.f32 %v843_v26, %v830_v59  ;;  %v846_v37 = vmul.f32 %v843_v26, %v831_v44  ;;  %v847_v29 = vmul.f32 %v843_v26, %v832_v0 }
 0x22e   :  { %vm848_vm4 = vcmp.ge.f32.partialorder %v844_v34, 0.0  ;;  %v852_v57 = vmul.f32 0.2, %v844_v34  ;;  %vm849_vm3 = vcmp.ge.f32.partialorder %v845_v4, 0.0  ;;  %v853_v48 = vmul.f32 0.2, %v845_v4 }
 0x22f   :  { %vm850_vm9 = vcmp.ge.f32.partialorder %v846_v37, 0.0  ;;  %v854_v31 = vmul.f32 0.2, %v846_v37  ;;  %vm851_vm5 = vcmp.ge.f32.partialorder %v847_v29, 0.0  ;;  %v855_v43 = vmul.f32 0.2, %v847_v29 }
 0x230   :  { %v856_v5 = vsel %vm848_vm4, %v844_v34, %v852_v57  ;;  %v857_v54 = vsel %vm849_vm3, %v845_v4, %v853_v48 }
 0x231   :  { %v861_v35 = vpack.c.bf16 %v856_v5, %v856_v5  ;;  %v862_v55 = vpack.c.bf16 %v857_v54, %v857_v54  ;;  %v858_v60 = vsel %vm850_vm9, %v846_v37, %v854_v31  ;;  %v859_v51 = vsel %vm851_vm5, %v847_v29, %v855_v43 }
 0x232   :  { %v863_v32 = vpack.c.bf16 %v858_v60, %v858_v60  ;;  %v864_v45 = vpack.c.bf16 %v859_v51, %v859_v51 }
 0x233   :  { %v870_v16 = vsel %vm3196_vm2, %v861_v35, 0  ;;  %v873_v12 = vsel %vm3197_vm0, %v862_v55, 0 }
 0x234   :  { %888 = vmatpush.bf16.msra.mxu3 %v870_v16  ;;  %901 = vmatpush.bf16.msra.mxu1 %v873_v12  ;;  %v876_v42 = vsel %vm3198_vm12, %v863_v32, 0  ;;  %v879_v13 = vsel %vm3199_vm6, %v864_v45, 0 }
 0x235   :  { %914 = vmatpush.bf16.msra.mxu2 %v876_v42  ;;  %927 = vmatpush.bf16.msra.mxu0 %v879_v13 }
 0x237   :  { %1131 = vmatmul.msk.bf16.vlgmr.msra.gmra.mxu3 %vm865_vm15, %v860_v20  ;;  %1132 = vmatmul.msk.bf16.vlgmr.msra.gmra.mxu1 %vm865_vm15, %v860_v20 }
 0x238   :  { %1133 = vmatmul.msk.bf16.vlgmr.msra.gmra.mxu2 %vm865_vm15, %v860_v20  ;;  %1134 = vmatmul.msk.bf16.vlgmr.msra.gmra.mxu0 %vm865_vm15, %v860_v20 }
 0x2b4   :  { %v903_v18 = vpop.f32.mrf.mxu1 }
 0x2b5   :  { %v929_v28 = vpop.f32.mrf.mxu0  ;;  %v939_v33 = vrot.slane %v903_v18, 4 }
 0x2b6   :  { %v940_v49 = vrot.slane %v929_v28, 4 }
 0x2ba   :  { %v890_v30 = vpop.f32.mrf.mxu3 }
 0x2bb   :  { %v941_v27 = vsel %vm3200_vm11, %v890_v30, %v939_v33  ;;  %v916_v11 = vpop.f32.mrf.mxu2 }
 0x2bc   :  { %v945_v38 = vadd.f32 %v941_v27, %v933_v1  ;;  %v942_v58 = vsel %vm3201_vm13, %v916_v11, %v940_v49  ;;  %v905_v15 = vpop.f32.mrf.mxu1 }
 0x2bd   :  { %v946_v52 = vadd.f32 %v942_v58, %v934_v24  ;;  %v931_v23 = vpop.f32.mrf.mxu0 }
 0x2be   :  { %v957_v50 = vadd.f32 %v955_v19, %v945_v38 }
 0x2bf   :  { %v958_v39 = vadd.f32 %v955_v19, %v946_v52 }
 0x2c0   :  { %959 = vst [vmem:[%s2930_s7] sm:$0xff] %v957_v50 }
 0x2c1   :  { %960 = vst [vmem:[%s2930_s7 + $0x8] sm:$0xff] %v958_v39 }
 0x2c2   :  { %v892_v3 = vpop.f32.mrf.mxu3 }
 0x2c3   :  { %v918_v17 = vpop.f32.mrf.mxu2 }

// kernel: segmorph_runet_forward.41
= control target key start
LH: loop header
LB: loop body
LE: loop exit
PB: predicated region body
PF: predicated region fallthrough
CT: control target
= control target key end

     0   :  { %s59_s0 = inlined_call_operand.vmem [shape: f32[2,512], index: 0, kind: input, shape index: {}]   ;;  %s60_s1 = inlined_call_operand.vmem [shape: f32[2,512], index: 1, kind: output, shape index: {}]  }
   0x1   :  { %v8_v0 = vld [vmem:[%s59_s0] sm:$0xff] }
   0x2   :  { %v9_v1 = vmax.f32 %v8_v0, 0.0 }
   0x4   :  { %v10_v2 = vsub.f32 %v8_v0, %v9_v1  ;;  %v13_v3 = vsub.f32 0.0, %v9_v1 }
   0x6   :  { %v11_v4 = vmul.f32 1.442695, %v10_v2  ;;  %v14_v5 = vmul.f32 1.442695, %v13_v3 }
   0x8   :  { %37 = vpow2.f32 %v11_v4 }
   0x9   :  { %39 = vpow2.f32 %v14_v5 }
   0xe   :  { %v38_v6 = vpop.eup %37 }
   0xf   :  { %v40_v7 = vpop.eup %39 }
  0x10   :  { %v16_v8 = vadd.f32 %v40_v7, %v38_v6 }
  0x12   :  { %41 = vrcp.f32 %v16_v8  ;;  %v28_v11 = vand.u32 2147483648, %v16_v8  ;;  %vm22_vm0 = vweird.f32 %v16_v8  ;;  %v26_v13 = vand.u32 2147483647, %v16_v8 }
  0x14   :  { %v29_v15 = vor.u32 1.1754944e-38, %v28_v11  ;;  %vm27_vm3 = vcmp.eq.f32.partialorder %v26_v13, 8.507059e+37 }
  0x18   :  { %v42_v9 = vpop.eup %41 }
  0x19   :  { %v18_v10 = vmul.f32 %v42_v9, %v16_v8  ;;  %vm23_vm1 = vweird.f32 %v42_v9 }
  0x1a   :  { %vm24_vm2 = vmor %vm22_vm0, %vm23_vm1 }
  0x1b   :  { %v19_v12 = vsub.f32 1.0, %v18_v10 }
  0x1d   :  { %v20_v14 = vmul.f32 %v42_v9, %v19_v12 }
  0x1f   :  { %v21_v16 = vadd.f32 %v42_v9, %v20_v14 }
  0x21   :  { %v25_v17 = vsel %vm24_vm2, %v42_v9, %v21_v16 }
  0x22   :  { %v30_v18 = vsel %vm27_vm3, %v29_v15, %v25_v17 }
  0x23   :  { %v31_v19 = vmul.f32 %v38_v6, %v30_v18 }
  0x25   :  { %32 = vst [vmem:[%s60_s1] sm:$0xff] %v31_v19 }

</bundles_post_ra>
